<compile_context>
chip_gen: v7x
topology: tpu7x:2x2x1
jax: 0.10.0
libtpu: 0.0.40
codegen_flags: <defaults>
</compile_context>

<pallas_src>
import functools
import math

import jax
import jax.numpy as jnp
from jax.experimental import pallas as pl
from jax.experimental.pallas import tpu as pltpu

LRELU_SLOPE = 0.2   # TODO(synk): 'lrelu' slope assumed 0.2 (nn.LeakyReLU default is 0.01).
EPS = 1e-5
# MXU operand dtype; accumulation is always f32 via preferred_element_type.
MATMUL_DTYPE = jnp.bfloat16

_N_EDGE_LAYERS = 3     # Decoder21 chain length
_N_WEIGHT_LAYERS = 6   # Decoder2 chain length


def _round_up(n, m):
    return ((n + m - 1) // m) * m


def _mm(a, b):
    """MXU matmul with bf16 operands / f32 accumulation."""
    return jnp.dot(a.astype(MATMUL_DTYPE), b.astype(MATMUL_DTYPE),
                   preferred_element_type=jnp.float32)


def _make_decoder20_kernel(block_b, nroi, logit_thr):
    BB = block_b

    def kernel(*refs):
        a1_ref, xo_ref = refs[-2], refs[-1]
        it = iter(refs[:-2])

        x_ref = next(it)
        s11_ref, s12_ref, s21_ref, s22_ref = (next(it) for _ in range(4))

        def read_chain(n_layers):
            layers = [(next(it), next(it)) for _ in range(n_layers)]   # (W, b)
            return layers, next(it)                                    # wgb_cat

        chain_e1 = read_chain(_N_EDGE_LAYERS)
        chain_e2 = read_chain(_N_EDGE_LAYERS)
        chain_w1 = read_chain(_N_WEIGHT_LAYERS)
        chain_w2 = read_chain(_N_WEIGHT_LAYERS)
        gcn_refs = [tuple(next(it) for _ in range(4)) for _ in range(2)]

        x = x_ref[...]                                       # (BB, nroi, Fin) f32

        def mlp_chain(h, style_ref, chain):
            """Fused MLP_Graph_Unit chain: Linear -> InstanceNorm(nroi) ->
            style (gamma, beta) -> LeakyReLU. All layers' gammas/betas come
            from ONE merged style matmul; elementwise stays f32."""
            layers, wgb_ref = chain
            style = style_ref[...].reshape(BB, -1)           # (BB, style_dim)
            gb = _mm(style, wgb_ref[...])                    # (BB, 2*total_fout) f32
            total = wgb_ref.shape[-1] // 2
            g_all = 1.0 + gb[:, :total]
            b_all = gb[:, total:]
            off = 0
            for w_ref, b_ref in layers:
                fout = w_ref.shape[-1]
                # Flatten so the MXU sees M = BB*nroi (nroi kept sublane-aligned
                # by the caller: multiple of 8 f32 / 16 bf16 makes this a free
                # relayout).
                h2 = h.reshape(BB * nroi, h.shape[-1])
                y = _mm(h2, w_ref[...]) + b_ref[...]
                y = y.reshape(BB, nroi, fout)
                # One-pass InstanceNorm over the nroi nodes of each graph:
                # var = E[y^2] - mean^2 (halves the cross-sublane reductions).
                # TODO(synk): normalization axis of MLP_Graph_Unit assumed.
                mean = jnp.mean(y, axis=1, keepdims=True)
                meansq = jnp.mean(y * y, axis=1, keepdims=True)
                var = jnp.maximum(meansq - mean * mean, 0.0)
                y = (y - mean) * jax.lax.rsqrt(var + EPS)
                gamma = g_all[:, off:off + fout][:, None, :]
                beta = b_all[:, off:off + fout][:, None, :]
                y = gamma * y + beta
                h = jnp.where(y > 0, y, LRELU_SLOPE * y)
                off += fout
            return h

        # ---- edge prediction (Decoder21) -----------------------------------
        x1 = mlp_chain(x, s11_ref, chain_e1)                 # (BB, nroi, 8F)
        x2 = mlp_chain(x, s12_ref, chain_e2)
        a1 = jnp.einsum('bnf,bmf->bnm',
                        x1.astype(MATMUL_DTYPE), x2.astype(MATMUL_DTYPE),
                        preferred_element_type=jnp.float32)   # (BB, nroi, nroi)

        # ---- thresholded graph -> per-graph scaled Laplacian ----------------
        # sigmoid(a1) > thr  <=>  a1 > logit(thr); edge weight = a1 value.
        adj = jnp.where(a1 > logit_thr, a1, 0.0)
        rid = jax.lax.broadcasted_iota(jnp.int32, (nroi, nroi), 0)
        cid = jax.lax.broadcasted_iota(jnp.int32, (nroi, nroi), 1)
        adj = jnp.where((rid == cid)[None, :, :], 0.0, adj)   # drop self-loops
        deg = jnp.sum(adj, axis=2)                            # row (source) degrees
        # TODO(synk): PyG deg^-0.5 would NaN on deg<=0 (possible for thr<0.5);
        # zeroed here instead.
        dinv = jnp.where(deg > 0.0,
                         jax.lax.rsqrt(jnp.maximum(deg, 1e-12)), 0.0)
        # ChebConv(K=2, lambda_max=2, sym): L_hat = -D^-1/2 A D^-1/2. The
        # transpose needed by PyG's target-node aggregation is folded into the
        # contraction ('bji,bjf->bif') below — no swapaxes / extra VMEM temp.
        lhat = -(dinv[:, :, None] * adj * dinv[:, None, :])

        # ---- weight prediction (Decoder2) -----------------------------------
        y1 = mlp_chain(x, s21_ref, chain_w1)
        y2 = mlp_chain(x, s22_ref, chain_w2)
        a2 = jnp.einsum('bnf,bmf->bnm',
                        y1.astype(MATMUL_DTYPE), y2.astype(MATMUL_DTYPE),
                        preferred_element_type=jnp.float32)   # (BB, nroi, nroi)

        # ---- two fused GCN_Units (ChebConv K=2 + eval BatchNorm + LReLU) ----
        # lhat is computed once and stays VMEM-resident for both layers.
        def cheb_gcn_unit(feat, g):
            w01_ref, b_ref, bn_s_ref, bn_sh_ref = g
            fin = feat.shape[-1]
            # T1 = L_hat^T feat as a transposed contraction (MXU consumes the
            # transposed LHS; no XLU transpose).
            t1 = jnp.einsum('bji,bjf->bif',
                            lhat.astype(MATMUL_DTYPE), feat.astype(MATMUL_DTYPE),
                            preferred_element_type=jnp.float32)
            # Single stacked matmul: [T0 | T1] @ [W0 ; W1] (one MXU op/unit).
            f01 = jnp.concatenate([feat, t1], axis=-1).reshape(BB * nroi, 2 * fin)
            out = _mm(f01, w01_ref[...]) + b_ref[...]
            # eval-mode BatchNorm1d folded into a per-feature scale/shift.
            out = out * bn_s_ref[...] + bn_sh_ref[...]
            out = jnp.where(out > 0, out, LRELU_SLOPE * out)
            return out.reshape(BB, nroi, out.shape[-1])

        feat = cheb_gcn_unit(a2, gcn_refs[0])
        feat = cheb_gcn_unit(feat, gcn_refs[1])   # last unit lane-padded at init

        # ---- stores: a1 at logical width, x_out lane-dense (padded weights) --
        a1_ref[...] = a1
        xo_ref[...] = feat

    return kernel


# -----------------------------------------------------------------------------
# Parameter construction
# -----------------------------------------------------------------------------
def _init_linear(key, fin, fout, scale=None):
    kw, kb = jax.random.split(key)
    s = (1.0 / math.sqrt(fin)) if scale is None else scale
    w = s * jax.random.normal(kw, (fin, fout), jnp.float32)
    b = s * jax.random.normal(kb, (1, fout), jnp.float32)
    return w, b


def _init_mlp_chain(key, dims, style_dim):
    keys = jax.random.split(key, len(dims) + 1)
    layers = []
    for k, (fin, fout) in zip(keys[:len(dims)], dims):
        w, b = _init_linear(k, fin, fout)
        layers.append({"w": w, "b": b})
    total_fout = sum(fout for _, fout in dims)
    # Merged style -> [gamma | beta] weight: ONE style matmul per chain.
    wgb_cat = 0.1 * jax.random.normal(keys[-1], (style_dim, 2 * total_fout),
                                      jnp.float32)
    return {"layers": layers, "wgb_cat": wgb_cat}


def _init_gcn_unit(key, fin, fout, fout_pad):
    k0, k1 = jax.random.split(key)
    w0, b = _init_linear(k0, fin, fout)
    w1, _ = _init_linear(k1, fin, fout)
    # Stack the two ChebConv weights along K: out = [T0 | T1] @ [W0 ; W1].
    w01 = jnp.concatenate([w0, w1], axis=0)                   # (2*fin, fout)
    # BatchNorm1d at PyTorch init (eval): gamma=1, beta=0, mean=0, var=1.
    bn_scale = jnp.full((1, fout), 1.0 / math.sqrt(1.0 + EPS), jnp.float32)
    bn_shift = jnp.zeros((1, fout), jnp.float32)
    if fout_pad > fout:
        # Pad the output width ONCE at init so the kernel's last matmul writes
        # a lane-dense slab directly (padded columns stay exactly zero).
        pad = fout_pad - fout
        w01 = jnp.pad(w01, ((0, 0), (0, pad)))
        b = jnp.pad(b, ((0, 0), (0, pad)))
        bn_scale = jnp.pad(bn_scale, ((0, 0), (0, pad)), constant_values=1.0)
        bn_shift = jnp.pad(bn_shift, ((0, 0), (0, pad)))
    return {"w01": w01, "b": b, "bn_scale": bn_scale, "bn_shift": bn_shift}


def make_decoder20_params(key, input_size, output_size, style_dim1, style_dim2):
    f = input_size
    edge_dims = [(f, 2 * f), (2 * f, 4 * f), (4 * f, 8 * f)]              # Decoder21
    weight_dims = [(f, f), (f, 2 * f), (2 * f, 2 * f), (2 * f, 4 * f),
                   (4 * f, 4 * f), (4 * f, 8 * f)]                        # Decoder2
    lanes_xo = _round_up(output_size, 128)
    ks = jax.random.split(key, 6)
    return {
        "edge1": _init_mlp_chain(ks[0], edge_dims, style_dim2),
        "edge2": _init_mlp_chain(ks[1], edge_dims, style_dim2),
        "weight1": _init_mlp_chain(ks[2], weight_dims, style_dim1),
        "weight2": _init_mlp_chain(ks[3], weight_dims, style_dim1),
        "gcn1": _init_gcn_unit(ks[4], output_size, output_size, output_size),
        "gcn2": _init_gcn_unit(ks[5], output_size, output_size, lanes_xo),
    }


# -----------------------------------------------------------------------------
# Forward wrapper: one fused pallas_call, gridded (parallel) over the batch
# -----------------------------------------------------------------------------
def _pick_block_b(B, nroi, fin, lanes_xo, budget_bytes):
    """Largest divisor of B whose f32 working set fits `budget_bytes`, keeping
    >= 2 grid steps when B >= 2 so both v7x TensorCores get work."""
    def per_block_bytes(bb):
        f32 = 4
        acts = bb * nroi * (8 * fin) * f32 * 4            # x1/x2/y1/y2 chain peaks
        mats = bb * nroi * nroi * f32 * 4                 # a1, a2, adj, lhat
        gcn = bb * nroi * max(nroi, lanes_xo) * f32 * 3   # GCN intermediates
        io = 2 * bb * nroi * (fin + nroi + lanes_xo) * f32  # double-buffered tiles
        return acts + mats + gcn + io
    for d in sorted((d for d in range(1, B + 1) if B % d == 0), reverse=True):
        if per_block_bytes(d) <= budget_bytes and (B == 1 or B // d >= 2):
            return d
    return 1


@functools.partial(jax.jit,
                   static_argnames=("batch_size", "nroi", "matrix_threshold"))
def decoder20_forward(params, x, style11, style12, style21, style22,
                      batch_size, nroi, matrix_threshold=0.5):
    """x: (batch_size*nroi, input_size) PyG-style node matrix.
    Returns (A_matrix1 (B, nroi, nroi), x_out (B, nroi, output_size))."""
    B = batch_size
    fin = x.shape[-1]
    output_size = params["gcn1"]["w01"].shape[0] // 2
    lanes_xo = params["gcn2"]["w01"].shape[-1]
    x3 = x.reshape(B, nroi, fin)
    # 3-D styles so each (block_b, 1, style_dim) block's last two dims equal
    # the full array dims (keeps the (8,128) BlockSpec rule trivially satisfied).
    styles = [v.reshape(B, 1, -1) for v in (style11, style12, style21, style22)]

    # Working-set budget conservative vs v5e's 16 MiB default scoped VMEM;
    # scoped limit raised explicitly below (still < v7x 64 MiB physical).
    block_b = _pick_block_b(B, nroi, fin, lanes_xo, budget_bytes=14 << 20)
    grid = (B // block_b,)

    cast = lambda w: w.astype(MATMUL_DTYPE)   # matmul weights stored bf16

    def chain_args(c):
        out = []
        for layer in c["layers"]:
            out += [cast(layer["w"]), layer["b"]]
        out += [cast(c["wgb_cat"])]
        return out

    args = [x3] + styles
    for name in ("edge1", "edge2", "weight1", "weight2"):
        args += chain_args(params[name])
    for name in ("gcn1", "gcn2"):
        g = params[name]
        args += [cast(g["w01"]), g["b"], g["bn_scale"], g["bn_shift"]]

    def batch_spec(a):
        zeros = (0,) * (a.ndim - 1)
        return pl.BlockSpec((block_b,) + a.shape[1:], lambda i: (i,) + zeros)

    def resident_spec(a):
        zeros = (0,) * a.ndim
        return pl.BlockSpec(a.shape, lambda i: zeros)   # weights stay resident

    in_specs = ([batch_spec(a) for a in args[:5]]
                + [resident_spec(a) for a in args[5:]])

    logit_thr = float(math.log(matrix_threshold / (1.0 - matrix_threshold)))
    kernel = _make_decoder20_kernel(block_b, nroi, logit_thr)

    a1, xo_pad = pl.pallas_call(
        kernel,
        grid=grid,
        out_shape=(jax.ShapeDtypeStruct((B, nroi, nroi), jnp.float32),
                   jax.ShapeDtypeStruct((B, nroi, lanes_xo), jnp.float32)),
        in_specs=in_specs,
        out_specs=(pl.BlockSpec((block_b, nroi, nroi), lambda i: (i, 0, 0)),
                   pl.BlockSpec((block_b, nroi, lanes_xo), lambda i: (i, 0, 0))),
        compiler_params=pltpu.CompilerParams(
            dimension_semantics=("parallel",),
            vmem_limit_bytes=48 * 1024 * 1024),
    )(*args)
    # x_out is computed lane-dense via init-time weight padding; slice here.
    return a1, xo_pad[..., :output_size]


if __name__ == "__main__":
    # Small, module-consistent shapes. The module implies output_size == nroi
    # (A_matrix2 (B, nroi, nroi) is the GCN input with feature dim output_size).
    input_size = 16
    nroi = 16                 # keep a multiple of 8 (f32) / 16 (bf16) sublanes
    output_size = nroi
    style_dim1, style_dim2 = 8, 8
    batch_size = 2

    key = jax.random.PRNGKey(0)
    kp, kx, k11, k12, k21, k22 = jax.random.split(key, 6)

    params = make_decoder20_params(kp, input_size, output_size,
                                   style_dim1, style_dim2)

    x = jax.random.normal(kx, (batch_size * nroi, input_size), jnp.float32)
    style11 = jax.random.normal(k11, (batch_size, style_dim2), jnp.float32)
    style12 = jax.random.normal(k12, (batch_size, style_dim2), jnp.float32)
    style21 = jax.random.normal(k21, (batch_size, style_dim1), jnp.float32)
    style22 = jax.random.normal(k22, (batch_size, style_dim1), jnp.float32)

    a_matrix1, x_out = decoder20_forward(
        params, x, style11, style12, style21, style22,
        batch_size=batch_size, nroi=nroi, matrix_threshold=0.5)
    a_matrix1 = jax.block_until_ready(a_matrix1)
    x_out = jax.block_until_ready(x_out)

    assert a_matrix1.shape == (batch_size, nroi, nroi), a_matrix1.shape
    assert x_out.shape == (batch_size, nroi, output_size), x_out.shape
    assert bool(jnp.all(jnp.isfinite(a_matrix1)))
    assert bool(jnp.all(jnp.isfinite(x_out)))
    print("KERNEL_OK")
</pallas_src>

<mosaic_0001>
module attributes {stable_mosaic.version = 11 : i64} {
  func.func @kernel(%arg0: i32, %arg1: memref<1x16x16xf32, #tpu.memory_space<vmem>>, %arg2: memref<1x1x8xf32, #tpu.memory_space<vmem>>, %arg3: memref<1x1x8xf32, #tpu.memory_space<vmem>>, %arg4: memref<1x1x8xf32, #tpu.memory_space<vmem>>, %arg5: memref<1x1x8xf32, #tpu.memory_space<vmem>>, %arg6: memref<16x32xbf16, #tpu.memory_space<vmem>>, %arg7: memref<1x32xf32, #tpu.memory_space<vmem>>, %arg8: memref<32x64xbf16, #tpu.memory_space<vmem>>, %arg9: memref<1x64xf32, #tpu.memory_space<vmem>>, %arg10: memref<64x128xbf16, #tpu.memory_space<vmem>>, %arg11: memref<1x128xf32, #tpu.memory_space<vmem>>, %arg12: memref<8x448xbf16, #tpu.memory_space<vmem>>, %arg13: memref<16x32xbf16, #tpu.memory_space<vmem>>, %arg14: memref<1x32xf32, #tpu.memory_space<vmem>>, %arg15: memref<32x64xbf16, #tpu.memory_space<vmem>>, %arg16: memref<1x64xf32, #tpu.memory_space<vmem>>, %arg17: memref<64x128xbf16, #tpu.memory_space<vmem>>, %arg18: memref<1x128xf32, #tpu.memory_space<vmem>>, %arg19: memref<8x448xbf16, #tpu.memory_space<vmem>>, %arg20: memref<16x16xbf16, #tpu.memory_space<vmem>>, %arg21: memref<1x16xf32, #tpu.memory_space<vmem>>, %arg22: memref<16x32xbf16, #tpu.memory_space<vmem>>, %arg23: memref<1x32xf32, #tpu.memory_space<vmem>>, %arg24: memref<32x32xbf16, #tpu.memory_space<vmem>>, %arg25: memref<1x32xf32, #tpu.memory_space<vmem>>, %arg26: memref<32x64xbf16, #tpu.memory_space<vmem>>, %arg27: memref<1x64xf32, #tpu.memory_space<vmem>>, %arg28: memref<64x64xbf16, #tpu.memory_space<vmem>>, %arg29: memref<1x64xf32, #tpu.memory_space<vmem>>, %arg30: memref<64x128xbf16, #tpu.memory_space<vmem>>, %arg31: memref<1x128xf32, #tpu.memory_space<vmem>>, %arg32: memref<8x672xbf16, #tpu.memory_space<vmem>>, %arg33: memref<16x16xbf16, #tpu.memory_space<vmem>>, %arg34: memref<1x16xf32, #tpu.memory_space<vmem>>, %arg35: memref<16x32xbf16, #tpu.memory_space<vmem>>, %arg36: memref<1x32xf32, #tpu.memory_space<vmem>>, %arg37: memref<32x32xbf16, #tpu.memory_space<vmem>>, %arg38: memref<1x32xf32, #tpu.memory_space<vmem>>, %arg39: memref<32x64xbf16, #tpu.memory_space<vmem>>, %arg40: memref<1x64xf32, #tpu.memory_space<vmem>>, %arg41: memref<64x64xbf16, #tpu.memory_space<vmem>>, %arg42: memref<1x64xf32, #tpu.memory_space<vmem>>, %arg43: memref<64x128xbf16, #tpu.memory_space<vmem>>, %arg44: memref<1x128xf32, #tpu.memory_space<vmem>>, %arg45: memref<8x672xbf16, #tpu.memory_space<vmem>>, %arg46: memref<32x16xbf16, #tpu.memory_space<vmem>>, %arg47: memref<1x16xf32, #tpu.memory_space<vmem>>, %arg48: memref<1x16xf32, #tpu.memory_space<vmem>>, %arg49: memref<1x16xf32, #tpu.memory_space<vmem>>, %arg50: memref<32x128xbf16, #tpu.memory_space<vmem>>, %arg51: memref<1x128xf32, #tpu.memory_space<vmem>>, %arg52: memref<1x128xf32, #tpu.memory_space<vmem>>, %arg53: memref<1x128xf32, #tpu.memory_space<vmem>>, %arg54: memref<1x16x16xf32, #tpu.memory_space<vmem>>, %arg55: memref<1x16x128xf32, #tpu.memory_space<vmem>>) attributes {dimension_semantics = [#tpu.dimension_semantics<parallel>], iteration_bounds = array<i64: 2>, scalar_prefetch = 0 : i64, scratch_operands = 0 : i64, tpu.core_type = #tpu.core_type<tc>, window_params = [{transform_indices = @transform_0, window_bounds = array<i64: 1, 16, 16>}, {transform_indices = @transform_1, window_bounds = array<i64: 1, 1, 8>}, {transform_indices = @transform_2, window_bounds = array<i64: 1, 1, 8>}, {transform_indices = @transform_3, window_bounds = array<i64: 1, 1, 8>}, {transform_indices = @transform_4, window_bounds = array<i64: 1, 1, 8>}, {pipeline_mode = #tpu.pipeline_mode<synchronous>, transform_indices = @transform_5, window_bounds = array<i64: 16, 32>}, {pipeline_mode = #tpu.pipeline_mode<synchronous>, transform_indices = @transform_6, window_bounds = array<i64: 1, 32>}, {pipeline_mode = #tpu.pipeline_mode<synchronous>, transform_indices = @transform_7, window_bounds = array<i64: 32, 64>}, {pipeline_mode = #tpu.pipeline_mode<synchronous>, transform_indices = @transform_8, window_bounds = array<i64: 1, 64>}, {pipeline_mode = #tpu.pipeline_mode<synchronous>, transform_indices = @transform_9, window_bounds = array<i64: 64, 128>}, {pipeline_mode = #tpu.pipeline_mode<synchronous>, transform_indices = @transform_10, window_bounds = array<i64: 1, 128>}, {pipeline_mode = #tpu.pipeline_mode<synchronous>, transform_indices = @transform_11, window_bounds = array<i64: 8, 448>}, {pipeline_mode = #tpu.pipeline_mode<synchronous>, transform_indices = @transform_12, window_bounds = array<i64: 16, 32>}, {pipeline_mode = #tpu.pipeline_mode<synchronous>, transform_indices = @transform_13, window_bounds = array<i64: 1, 32>}, {pipeline_mode = #tpu.pipeline_mode<synchronous>, transform_indices = @transform_14, window_bounds = array<i64: 32, 64>}, {pipeline_mode = #tpu.pipeline_mode<synchronous>, transform_indices = @transform_15, window_bounds = array<i64: 1, 64>}, {pipeline_mode = #tpu.pipeline_mode<synchronous>, transform_indices = @transform_16, window_bounds = array<i64: 64, 128>}, {pipeline_mode = #tpu.pipeline_mode<synchronous>, transform_indices = @transform_17, window_bounds = array<i64: 1, 128>}, {pipeline_mode = #tpu.pipeline_mode<synchronous>, transform_indices = @transform_18, window_bounds = array<i64: 8, 448>}, {pipeline_mode = #tpu.pipeline_mode<synchronous>, transform_indices = @transform_19, window_bounds = array<i64: 16, 16>}, {pipeline_mode = #tpu.pipeline_mode<synchronous>, transform_indices = @transform_20, window_bounds = array<i64: 1, 16>}, {pipeline_mode = #tpu.pipeline_mode<synchronous>, transform_indices = @transform_21, window_bounds = array<i64: 16, 32>}, {pipeline_mode = #tpu.pipeline_mode<synchronous>, transform_indices = @transform_22, window_bounds = array<i64: 1, 32>}, {pipeline_mode = #tpu.pipeline_mode<synchronous>, transform_indices = @transform_23, window_bounds = array<i64: 32, 32>}, {pipeline_mode = #tpu.pipeline_mode<synchronous>, transform_indices = @transform_24, window_bounds = array<i64: 1, 32>}, {pipeline_mode = #tpu.pipeline_mode<synchronous>, transform_indices = @transform_25, window_bounds = array<i64: 32, 64>}, {pipeline_mode = #tpu.pipeline_mode<synchronous>, transform_indices = @transform_26, window_bounds = array<i64: 1, 64>}, {pipeline_mode = #tpu.pipeline_mode<synchronous>, transform_indices = @transform_27, window_bounds = array<i64: 64, 64>}, {pipeline_mode = #tpu.pipeline_mode<synchronous>, transform_indices = @transform_28, window_bounds = array<i64: 1, 64>}, {pipeline_mode = #tpu.pipeline_mode<synchronous>, transform_indices = @transform_29, window_bounds = array<i64: 64, 128>}, {pipeline_mode = #tpu.pipeline_mode<synchronous>, transform_indices = @transform_30, window_bounds = array<i64: 1, 128>}, {pipeline_mode = #tpu.pipeline_mode<synchronous>, transform_indices = @transform_31, window_bounds = array<i64: 8, 672>}, {pipeline_mode = #tpu.pipeline_mode<synchronous>, transform_indices = @transform_32, window_bounds = array<i64: 16, 16>}, {pipeline_mode = #tpu.pipeline_mode<synchronous>, transform_indices = @transform_33, window_bounds = array<i64: 1, 16>}, {pipeline_mode = #tpu.pipeline_mode<synchronous>, transform_indices = @transform_34, window_bounds = array<i64: 16, 32>}, {pipeline_mode = #tpu.pipeline_mode<synchronous>, transform_indices = @transform_35, window_bounds = array<i64: 1, 32>}, {pipeline_mode = #tpu.pipeline_mode<synchronous>, transform_indices = @transform_36, window_bounds = array<i64: 32, 32>}, {pipeline_mode = #tpu.pipeline_mode<synchronous>, transform_indices = @transform_37, window_bounds = array<i64: 1, 32>}, {pipeline_mode = #tpu.pipeline_mode<synchronous>, transform_indices = @transform_38, window_bounds = array<i64: 32, 64>}, {pipeline_mode = #tpu.pipeline_mode<synchronous>, transform_indices = @transform_39, window_bounds = array<i64: 1, 64>}, {pipeline_mode = #tpu.pipeline_mode<synchronous>, transform_indices = @transform_40, window_bounds = array<i64: 64, 64>}, {pipeline_mode = #tpu.pipeline_mode<synchronous>, transform_indices = @transform_41, window_bounds = array<i64: 1, 64>}, {pipeline_mode = #tpu.pipeline_mode<synchronous>, transform_indices = @transform_42, window_bounds = array<i64: 64, 128>}, {pipeline_mode = #tpu.pipeline_mode<synchronous>, transform_indices = @transform_43, window_bounds = array<i64: 1, 128>}, {pipeline_mode = #tpu.pipeline_mode<synchronous>, transform_indices = @transform_44, window_bounds = array<i64: 8, 672>}, {pipeline_mode = #tpu.pipeline_mode<synchronous>, transform_indices = @transform_45, window_bounds = array<i64: 32, 16>}, {pipeline_mode = #tpu.pipeline_mode<synchronous>, transform_indices = @transform_46, window_bounds = array<i64: 1, 16>}, {pipeline_mode = #tpu.pipeline_mode<synchronous>, transform_indices = @transform_47, window_bounds = array<i64: 1, 16>}, {pipeline_mode = #tpu.pipeline_mode<synchronous>, transform_indices = @transform_48, window_bounds = array<i64: 1, 16>}, {pipeline_mode = #tpu.pipeline_mode<synchronous>, transform_indices = @transform_49, window_bounds = array<i64: 32, 128>}, {pipeline_mode = #tpu.pipeline_mode<synchronous>, transform_indices = @transform_50, window_bounds = array<i64: 1, 128>}, {pipeline_mode = #tpu.pipeline_mode<synchronous>, transform_indices = @transform_51, window_bounds = array<i64: 1, 128>}, {pipeline_mode = #tpu.pipeline_mode<synchronous>, transform_indices = @transform_52, window_bounds = array<i64: 1, 128>}, {transform_indices = @transform_53, window_bounds = array<i64: 1, 16, 16>}, {transform_indices = @transform_54, window_bounds = array<i64: 1, 16, 128>}]} {
    %c0 = arith.constant 0 : index
    %c0_0 = arith.constant 0 : index
    %c0_1 = arith.constant 0 : index
    %0 = vector.load %arg1[%c0, %c0_0, %c0_1] : memref<1x16x16xf32, #tpu.memory_space<vmem>>, vector<1x16x16xf32>
    %c0_2 = arith.constant 0 : index
    %c0_3 = arith.constant 0 : index
    %c0_4 = arith.constant 0 : index
    %1 = vector.load %arg2[%c0_2, %c0_3, %c0_4] : memref<1x1x8xf32, #tpu.memory_space<vmem>>, vector<1x1x8xf32>
    %2 = vector.shape_cast %1 : vector<1x1x8xf32> to vector<1x8xf32>
    %c0_5 = arith.constant 0 : index
    %c0_6 = arith.constant 0 : index
    %3 = vector.load %arg12[%c0_5, %c0_6] : memref<8x448xbf16, #tpu.memory_space<vmem>>, vector<8x448xbf16>
    %4 = arith.truncf %2 : vector<1x8xf32> to vector<1x8xbf16>
    %cst = arith.constant dense<0.000000e+00> : vector<1x448xf32>
    %5 = tpu.matmul %4, %3, %cst {dimension_numbers = #tpu.dot_dimension_numbers<[1], [0], [0], [1], [0, 0, 1, 1], [], []>} : vector<1x8xbf16>, vector<8x448xbf16>, vector<1x448xf32> -> vector<1x448xf32>
    %6 = vector.extract_strided_slice %5 {offsets = [0, 0], sizes = [1, 224], strides = [1, 1]} : vector<1x448xf32> to vector<1x224xf32>
    %cst_7 = arith.constant 1.000000e+00 : f32
    %7 = vector.broadcast %cst_7 : f32 to vector<1x224xf32>
    %8 = arith.addf %7, %6 : vector<1x224xf32>
    %9 = vector.extract_strided_slice %5 {offsets = [0, 224], sizes = [1, 224], strides = [1, 1]} : vector<1x448xf32> to vector<1x224xf32>
    %10 = vector.shape_cast %0 : vector<1x16x16xf32> to vector<16x16xf32>
    %c0_8 = arith.constant 0 : index
    %c0_9 = arith.constant 0 : index
    %11 = vector.load %arg6[%c0_8, %c0_9] : memref<16x32xbf16, #tpu.memory_space<vmem>>, vector<16x32xbf16>
    %12 = arith.truncf %10 : vector<16x16xf32> to vector<16x16xbf16>
    %cst_10 = arith.constant dense<0.000000e+00> : vector<16x32xf32>
    %13 = tpu.matmul %12, %11, %cst_10 {dimension_numbers = #tpu.dot_dimension_numbers<[1], [0], [0], [1], [0, 0, 1, 1], [], []>} : vector<16x16xbf16>, vector<16x32xbf16>, vector<16x32xf32> -> vector<16x32xf32>
    %c0_11 = arith.constant 0 : index
    %c0_12 = arith.constant 0 : index
    %14 = vector.load %arg7[%c0_11, %c0_12] : memref<1x32xf32, #tpu.memory_space<vmem>>, vector<1x32xf32>
    %15 = vector.broadcast %14 : vector<1x32xf32> to vector<16x32xf32>
    %16 = arith.addf %13, %15 : vector<16x32xf32>
    %17 = vector.shape_cast %16 : vector<16x32xf32> to vector<1x16x32xf32>
    %cst_13 = arith.constant dense<0.000000e+00> : vector<1x32xf32>
    %18 = vector.multi_reduction <add>, %17, %cst_13 [1] : vector<1x16x32xf32> to vector<1x32xf32>
    %19 = vector.shape_cast %18 : vector<1x32xf32> to vector<1x1x32xf32>
    %cst_14 = arith.constant 1.600000e+01 : f32
    %20 = vector.broadcast %cst_14 : f32 to vector<1x1x32xf32>
    %21 = arith.divf %19, %20 : vector<1x1x32xf32>
    %22 = arith.mulf %17, %17 : vector<1x16x32xf32>
    %cst_15 = arith.constant dense<0.000000e+00> : vector<1x32xf32>
    %23 = vector.multi_reduction <add>, %22, %cst_15 [1] : vector<1x16x32xf32> to vector<1x32xf32>
    %24 = vector.shape_cast %23 : vector<1x32xf32> to vector<1x1x32xf32>
    %cst_16 = arith.constant 1.600000e+01 : f32
    %25 = vector.broadcast %cst_16 : f32 to vector<1x1x32xf32>
    %26 = arith.divf %24, %25 : vector<1x1x32xf32>
    %27 = arith.mulf %21, %21 : vector<1x1x32xf32>
    %28 = arith.subf %26, %27 : vector<1x1x32xf32>
    %cst_17 = arith.constant 0.000000e+00 : f32
    %29 = vector.broadcast %cst_17 : f32 to vector<1x1x32xf32>
    %30 = arith.maximumf %28, %29 : vector<1x1x32xf32>
    %31 = vector.broadcast %21 : vector<1x1x32xf32> to vector<1x16x32xf32>
    %32 = arith.subf %17, %31 : vector<1x16x32xf32>
    %cst_18 = arith.constant 9.99999974E-6 : f32
    %33 = vector.broadcast %cst_18 : f32 to vector<1x1x32xf32>
    %34 = arith.addf %30, %33 : vector<1x1x32xf32>
    %35 = math.rsqrt %34 : vector<1x1x32xf32>
    %36 = vector.broadcast %35 : vector<1x1x32xf32> to vector<1x16x32xf32>
    %37 = arith.mulf %32, %36 : vector<1x16x32xf32>
    %38 = vector.extract_strided_slice %8 {offsets = [0, 0], sizes = [1, 32], strides = [1, 1]} : vector<1x224xf32> to vector<1x32xf32>
    %39 = vector.shape_cast %38 : vector<1x32xf32> to vector<1x1x32xf32>
    %40 = vector.extract_strided_slice %9 {offsets = [0, 0], sizes = [1, 32], strides = [1, 1]} : vector<1x224xf32> to vector<1x32xf32>
    %41 = vector.shape_cast %40 : vector<1x32xf32> to vector<1x1x32xf32>
    %42 = vector.broadcast %39 : vector<1x1x32xf32> to vector<1x16x32xf32>
    %43 = arith.mulf %42, %37 : vector<1x16x32xf32>
    %44 = vector.broadcast %41 : vector<1x1x32xf32> to vector<1x16x32xf32>
    %45 = arith.addf %43, %44 : vector<1x16x32xf32>
    %cst_19 = arith.constant 0.000000e+00 : f32
    %46 = vector.broadcast %cst_19 : f32 to vector<1x16x32xf32>
    %47 = arith.cmpf ogt, %45, %46 : vector<1x16x32xf32>
    %cst_20 = arith.constant 2.000000e-01 : f32
    %48 = vector.broadcast %cst_20 : f32 to vector<1x16x32xf32>
    %49 = arith.mulf %48, %45 : vector<1x16x32xf32>
    %50 = arith.select %47, %45, %49 : vector<1x16x32xi1>, vector<1x16x32xf32>
    %51 = vector.shape_cast %50 : vector<1x16x32xf32> to vector<16x32xf32>
    %c0_21 = arith.constant 0 : index
    %c0_22 = arith.constant 0 : index
    %52 = vector.load %arg8[%c0_21, %c0_22] : memref<32x64xbf16, #tpu.memory_space<vmem>>, vector<32x64xbf16>
    %53 = arith.truncf %51 : vector<16x32xf32> to vector<16x32xbf16>
    %cst_23 = arith.constant dense<0.000000e+00> : vector<16x64xf32>
    %54 = tpu.matmul %53, %52, %cst_23 {dimension_numbers = #tpu.dot_dimension_numbers<[1], [0], [0], [1], [0, 0, 1, 1], [], []>} : vector<16x32xbf16>, vector<32x64xbf16>, vector<16x64xf32> -> vector<16x64xf32>
    %c0_24 = arith.constant 0 : index
    %c0_25 = arith.constant 0 : index
    %55 = vector.load %arg9[%c0_24, %c0_25] : memref<1x64xf32, #tpu.memory_space<vmem>>, vector<1x64xf32>
    %56 = vector.broadcast %55 : vector<1x64xf32> to vector<16x64xf32>
    %57 = arith.addf %54, %56 : vector<16x64xf32>
    %58 = vector.shape_cast %57 : vector<16x64xf32> to vector<1x16x64xf32>
    %cst_26 = arith.constant dense<0.000000e+00> : vector<1x64xf32>
    %59 = vector.multi_reduction <add>, %58, %cst_26 [1] : vector<1x16x64xf32> to vector<1x64xf32>
    %60 = vector.shape_cast %59 : vector<1x64xf32> to vector<1x1x64xf32>
    %cst_27 = arith.constant 1.600000e+01 : f32
    %61 = vector.broadcast %cst_27 : f32 to vector<1x1x64xf32>
    %62 = arith.divf %60, %61 : vector<1x1x64xf32>
    %63 = arith.mulf %58, %58 : vector<1x16x64xf32>
    %cst_28 = arith.constant dense<0.000000e+00> : vector<1x64xf32>
    %64 = vector.multi_reduction <add>, %63, %cst_28 [1] : vector<1x16x64xf32> to vector<1x64xf32>
    %65 = vector.shape_cast %64 : vector<1x64xf32> to vector<1x1x64xf32>
    %cst_29 = arith.constant 1.600000e+01 : f32
    %66 = vector.broadcast %cst_29 : f32 to vector<1x1x64xf32>
    %67 = arith.divf %65, %66 : vector<1x1x64xf32>
    %68 = arith.mulf %62, %62 : vector<1x1x64xf32>
    %69 = arith.subf %67, %68 : vector<1x1x64xf32>
    %cst_30 = arith.constant 0.000000e+00 : f32
    %70 = vector.broadcast %cst_30 : f32 to vector<1x1x64xf32>
    %71 = arith.maximumf %69, %70 : vector<1x1x64xf32>
    %72 = vector.broadcast %62 : vector<1x1x64xf32> to vector<1x16x64xf32>
    %73 = arith.subf %58, %72 : vector<1x16x64xf32>
    %cst_31 = arith.constant 9.99999974E-6 : f32
    %74 = vector.broadcast %cst_31 : f32 to vector<1x1x64xf32>
    %75 = arith.addf %71, %74 : vector<1x1x64xf32>
    %76 = math.rsqrt %75 : vector<1x1x64xf32>
    %77 = vector.broadcast %76 : vector<1x1x64xf32> to vector<1x16x64xf32>
    %78 = arith.mulf %73, %77 : vector<1x16x64xf32>
    %79 = vector.extract_strided_slice %8 {offsets = [0, 32], sizes = [1, 64], strides = [1, 1]} : vector<1x224xf32> to vector<1x64xf32>
    %80 = vector.shape_cast %79 : vector<1x64xf32> to vector<1x1x64xf32>
    %81 = vector.extract_strided_slice %9 {offsets = [0, 32], sizes = [1, 64], strides = [1, 1]} : vector<1x224xf32> to vector<1x64xf32>
    %82 = vector.shape_cast %81 : vector<1x64xf32> to vector<1x1x64xf32>
    %83 = vector.broadcast %80 : vector<1x1x64xf32> to vector<1x16x64xf32>
    %84 = arith.mulf %83, %78 : vector<1x16x64xf32>
    %85 = vector.broadcast %82 : vector<1x1x64xf32> to vector<1x16x64xf32>
    %86 = arith.addf %84, %85 : vector<1x16x64xf32>
    %cst_32 = arith.constant 0.000000e+00 : f32
    %87 = vector.broadcast %cst_32 : f32 to vector<1x16x64xf32>
    %88 = arith.cmpf ogt, %86, %87 : vector<1x16x64xf32>
    %cst_33 = arith.constant 2.000000e-01 : f32
    %89 = vector.broadcast %cst_33 : f32 to vector<1x16x64xf32>
    %90 = arith.mulf %89, %86 : vector<1x16x64xf32>
    %91 = arith.select %88, %86, %90 : vector<1x16x64xi1>, vector<1x16x64xf32>
    %92 = vector.shape_cast %91 : vector<1x16x64xf32> to vector<16x64xf32>
    %c0_34 = arith.constant 0 : index
    %c0_35 = arith.constant 0 : index
    %93 = vector.load %arg10[%c0_34, %c0_35] : memref<64x128xbf16, #tpu.memory_space<vmem>>, vector<64x128xbf16>
    %94 = arith.truncf %92 : vector<16x64xf32> to vector<16x64xbf16>
    %cst_36 = arith.constant dense<0.000000e+00> : vector<16x128xf32>
    %95 = tpu.matmul %94, %93, %cst_36 {dimension_numbers = #tpu.dot_dimension_numbers<[1], [0], [0], [1], [0, 0, 1, 1], [], []>} : vector<16x64xbf16>, vector<64x128xbf16>, vector<16x128xf32> -> vector<16x128xf32>
    %c0_37 = arith.constant 0 : index
    %c0_38 = arith.constant 0 : index
    %96 = vector.load %arg11[%c0_37, %c0_38] : memref<1x128xf32, #tpu.memory_space<vmem>>, vector<1x128xf32>
    %97 = vector.broadcast %96 : vector<1x128xf32> to vector<16x128xf32>
    %98 = arith.addf %95, %97 : vector<16x128xf32>
    %99 = vector.shape_cast %98 : vector<16x128xf32> to vector<1x16x128xf32>
    %cst_39 = arith.constant dense<0.000000e+00> : vector<1x128xf32>
    %100 = vector.multi_reduction <add>, %99, %cst_39 [1] : vector<1x16x128xf32> to vector<1x128xf32>
    %101 = vector.shape_cast %100 : vector<1x128xf32> to vector<1x1x128xf32>
    %cst_40 = arith.constant 1.600000e+01 : f32
    %102 = vector.broadcast %cst_40 : f32 to vector<1x1x128xf32>
    %103 = arith.divf %101, %102 : vector<1x1x128xf32>
    %104 = arith.mulf %99, %99 : vector<1x16x128xf32>
    %cst_41 = arith.constant dense<0.000000e+00> : vector<1x128xf32>
    %105 = vector.multi_reduction <add>, %104, %cst_41 [1] : vector<1x16x128xf32> to vector<1x128xf32>
    %106 = vector.shape_cast %105 : vector<1x128xf32> to vector<1x1x128xf32>
    %cst_42 = arith.constant 1.600000e+01 : f32
    %107 = vector.broadcast %cst_42 : f32 to vector<1x1x128xf32>
    %108 = arith.divf %106, %107 : vector<1x1x128xf32>
    %109 = arith.mulf %103, %103 : vector<1x1x128xf32>
    %110 = arith.subf %108, %109 : vector<1x1x128xf32>
    %cst_43 = arith.constant 0.000000e+00 : f32
    %111 = vector.broadcast %cst_43 : f32 to vector<1x1x128xf32>
    %112 = arith.maximumf %110, %111 : vector<1x1x128xf32>
    %113 = vector.broadcast %103 : vector<1x1x128xf32> to vector<1x16x128xf32>
    %114 = arith.subf %99, %113 : vector<1x16x128xf32>
    %cst_44 = arith.constant 9.99999974E-6 : f32
    %115 = vector.broadcast %cst_44 : f32 to vector<1x1x128xf32>
    %116 = arith.addf %112, %115 : vector<1x1x128xf32>
    %117 = math.rsqrt %116 : vector<1x1x128xf32>
    %118 = vector.broadcast %117 : vector<1x1x128xf32> to vector<1x16x128xf32>
    %119 = arith.mulf %114, %118 : vector<1x16x128xf32>
    %120 = vector.extract_strided_slice %8 {offsets = [0, 96], sizes = [1, 128], strides = [1, 1]} : vector<1x224xf32> to vector<1x128xf32>
    %121 = vector.shape_cast %120 : vector<1x128xf32> to vector<1x1x128xf32>
    %122 = vector.extract_strided_slice %9 {offsets = [0, 96], sizes = [1, 128], strides = [1, 1]} : vector<1x224xf32> to vector<1x128xf32>
    %123 = vector.shape_cast %122 : vector<1x128xf32> to vector<1x1x128xf32>
    %124 = vector.broadcast %121 : vector<1x1x128xf32> to vector<1x16x128xf32>
    %125 = arith.mulf %124, %119 : vector<1x16x128xf32>
    %126 = vector.broadcast %123 : vector<1x1x128xf32> to vector<1x16x128xf32>
    %127 = arith.addf %125, %126 : vector<1x16x128xf32>
    %cst_45 = arith.constant 0.000000e+00 : f32
    %128 = vector.broadcast %cst_45 : f32 to vector<1x16x128xf32>
    %129 = arith.cmpf ogt, %127, %128 : vector<1x16x128xf32>
    %cst_46 = arith.constant 2.000000e-01 : f32
    %130 = vector.broadcast %cst_46 : f32 to vector<1x16x128xf32>
    %131 = arith.mulf %130, %127 : vector<1x16x128xf32>
    %132 = arith.select %129, %127, %131 : vector<1x16x128xi1>, vector<1x16x128xf32>
    %c0_47 = arith.constant 0 : index
    %c0_48 = arith.constant 0 : index
    %c0_49 = arith.constant 0 : index
    %133 = vector.load %arg3[%c0_47, %c0_48, %c0_49] : memref<1x1x8xf32, #tpu.memory_space<vmem>>, vector<1x1x8xf32>
    %134 = vector.shape_cast %133 : vector<1x1x8xf32> to vector<1x8xf32>
    %c0_50 = arith.constant 0 : index
    %c0_51 = arith.constant 0 : index
    %135 = vector.load %arg19[%c0_50, %c0_51] : memref<8x448xbf16, #tpu.memory_space<vmem>>, vector<8x448xbf16>
    %136 = arith.truncf %134 : vector<1x8xf32> to vector<1x8xbf16>
    %cst_52 = arith.constant dense<0.000000e+00> : vector<1x448xf32>
    %137 = tpu.matmul %136, %135, %cst_52 {dimension_numbers = #tpu.dot_dimension_numbers<[1], [0], [0], [1], [0, 0, 1, 1], [], []>} : vector<1x8xbf16>, vector<8x448xbf16>, vector<1x448xf32> -> vector<1x448xf32>
    %138 = vector.extract_strided_slice %137 {offsets = [0, 0], sizes = [1, 224], strides = [1, 1]} : vector<1x448xf32> to vector<1x224xf32>
    %cst_53 = arith.constant 1.000000e+00 : f32
    %139 = vector.broadcast %cst_53 : f32 to vector<1x224xf32>
    %140 = arith.addf %139, %138 : vector<1x224xf32>
    %141 = vector.extract_strided_slice %137 {offsets = [0, 224], sizes = [1, 224], strides = [1, 1]} : vector<1x448xf32> to vector<1x224xf32>
    %142 = vector.shape_cast %0 : vector<1x16x16xf32> to vector<16x16xf32>
    %c0_54 = arith.constant 0 : index
    %c0_55 = arith.constant 0 : index
    %143 = vector.load %arg13[%c0_54, %c0_55] : memref<16x32xbf16, #tpu.memory_space<vmem>>, vector<16x32xbf16>
    %144 = arith.truncf %142 : vector<16x16xf32> to vector<16x16xbf16>
    %cst_56 = arith.constant dense<0.000000e+00> : vector<16x32xf32>
    %145 = tpu.matmul %144, %143, %cst_56 {dimension_numbers = #tpu.dot_dimension_numbers<[1], [0], [0], [1], [0, 0, 1, 1], [], []>} : vector<16x16xbf16>, vector<16x32xbf16>, vector<16x32xf32> -> vector<16x32xf32>
    %c0_57 = arith.constant 0 : index
    %c0_58 = arith.constant 0 : index
    %146 = vector.load %arg14[%c0_57, %c0_58] : memref<1x32xf32, #tpu.memory_space<vmem>>, vector<1x32xf32>
    %147 = vector.broadcast %146 : vector<1x32xf32> to vector<16x32xf32>
    %148 = arith.addf %145, %147 : vector<16x32xf32>
    %149 = vector.shape_cast %148 : vector<16x32xf32> to vector<1x16x32xf32>
    %cst_59 = arith.constant dense<0.000000e+00> : vector<1x32xf32>
    %150 = vector.multi_reduction <add>, %149, %cst_59 [1] : vector<1x16x32xf32> to vector<1x32xf32>
    %151 = vector.shape_cast %150 : vector<1x32xf32> to vector<1x1x32xf32>
    %cst_60 = arith.constant 1.600000e+01 : f32
    %152 = vector.broadcast %cst_60 : f32 to vector<1x1x32xf32>
    %153 = arith.divf %151, %152 : vector<1x1x32xf32>
    %154 = arith.mulf %149, %149 : vector<1x16x32xf32>
    %cst_61 = arith.constant dense<0.000000e+00> : vector<1x32xf32>
    %155 = vector.multi_reduction <add>, %154, %cst_61 [1] : vector<1x16x32xf32> to vector<1x32xf32>
    %156 = vector.shape_cast %155 : vector<1x32xf32> to vector<1x1x32xf32>
    %cst_62 = arith.constant 1.600000e+01 : f32
    %157 = vector.broadcast %cst_62 : f32 to vector<1x1x32xf32>
    %158 = arith.divf %156, %157 : vector<1x1x32xf32>
    %159 = arith.mulf %153, %153 : vector<1x1x32xf32>
    %160 = arith.subf %158, %159 : vector<1x1x32xf32>
    %cst_63 = arith.constant 0.000000e+00 : f32
    %161 = vector.broadcast %cst_63 : f32 to vector<1x1x32xf32>
    %162 = arith.maximumf %160, %161 : vector<1x1x32xf32>
    %163 = vector.broadcast %153 : vector<1x1x32xf32> to vector<1x16x32xf32>
    %164 = arith.subf %149, %163 : vector<1x16x32xf32>
    %cst_64 = arith.constant 9.99999974E-6 : f32
    %165 = vector.broadcast %cst_64 : f32 to vector<1x1x32xf32>
    %166 = arith.addf %162, %165 : vector<1x1x32xf32>
    %167 = math.rsqrt %166 : vector<1x1x32xf32>
    %168 = vector.broadcast %167 : vector<1x1x32xf32> to vector<1x16x32xf32>
    %169 = arith.mulf %164, %168 : vector<1x16x32xf32>
    %170 = vector.extract_strided_slice %140 {offsets = [0, 0], sizes = [1, 32], strides = [1, 1]} : vector<1x224xf32> to vector<1x32xf32>
    %171 = vector.shape_cast %170 : vector<1x32xf32> to vector<1x1x32xf32>
    %172 = vector.extract_strided_slice %141 {offsets = [0, 0], sizes = [1, 32], strides = [1, 1]} : vector<1x224xf32> to vector<1x32xf32>
    %173 = vector.shape_cast %172 : vector<1x32xf32> to vector<1x1x32xf32>
    %174 = vector.broadcast %171 : vector<1x1x32xf32> to vector<1x16x32xf32>
    %175 = arith.mulf %174, %169 : vector<1x16x32xf32>
    %176 = vector.broadcast %173 : vector<1x1x32xf32> to vector<1x16x32xf32>
    %177 = arith.addf %175, %176 : vector<1x16x32xf32>
    %cst_65 = arith.constant 0.000000e+00 : f32
    %178 = vector.broadcast %cst_65 : f32 to vector<1x16x32xf32>
    %179 = arith.cmpf ogt, %177, %178 : vector<1x16x32xf32>
    %cst_66 = arith.constant 2.000000e-01 : f32
    %180 = vector.broadcast %cst_66 : f32 to vector<1x16x32xf32>
    %181 = arith.mulf %180, %177 : vector<1x16x32xf32>
    %182 = arith.select %179, %177, %181 : vector<1x16x32xi1>, vector<1x16x32xf32>
    %183 = vector.shape_cast %182 : vector<1x16x32xf32> to vector<16x32xf32>
    %c0_67 = arith.constant 0 : index
    %c0_68 = arith.constant 0 : index
    %184 = vector.load %arg15[%c0_67, %c0_68] : memref<32x64xbf16, #tpu.memory_space<vmem>>, vector<32x64xbf16>
    %185 = arith.truncf %183 : vector<16x32xf32> to vector<16x32xbf16>
    %cst_69 = arith.constant dense<0.000000e+00> : vector<16x64xf32>
    %186 = tpu.matmul %185, %184, %cst_69 {dimension_numbers = #tpu.dot_dimension_numbers<[1], [0], [0], [1], [0, 0, 1, 1], [], []>} : vector<16x32xbf16>, vector<32x64xbf16>, vector<16x64xf32> -> vector<16x64xf32>
    %c0_70 = arith.constant 0 : index
    %c0_71 = arith.constant 0 : index
    %187 = vector.load %arg16[%c0_70, %c0_71] : memref<1x64xf32, #tpu.memory_space<vmem>>, vector<1x64xf32>
    %188 = vector.broadcast %187 : vector<1x64xf32> to vector<16x64xf32>
    %189 = arith.addf %186, %188 : vector<16x64xf32>
    %190 = vector.shape_cast %189 : vector<16x64xf32> to vector<1x16x64xf32>
    %cst_72 = arith.constant dense<0.000000e+00> : vector<1x64xf32>
    %191 = vector.multi_reduction <add>, %190, %cst_72 [1] : vector<1x16x64xf32> to vector<1x64xf32>
    %192 = vector.shape_cast %191 : vector<1x64xf32> to vector<1x1x64xf32>
    %cst_73 = arith.constant 1.600000e+01 : f32
    %193 = vector.broadcast %cst_73 : f32 to vector<1x1x64xf32>
    %194 = arith.divf %192, %193 : vector<1x1x64xf32>
    %195 = arith.mulf %190, %190 : vector<1x16x64xf32>
    %cst_74 = arith.constant dense<0.000000e+00> : vector<1x64xf32>
    %196 = vector.multi_reduction <add>, %195, %cst_74 [1] : vector<1x16x64xf32> to vector<1x64xf32>
    %197 = vector.shape_cast %196 : vector<1x64xf32> to vector<1x1x64xf32>
    %cst_75 = arith.constant 1.600000e+01 : f32
    %198 = vector.broadcast %cst_75 : f32 to vector<1x1x64xf32>
    %199 = arith.divf %197, %198 : vector<1x1x64xf32>
    %200 = arith.mulf %194, %194 : vector<1x1x64xf32>
    %201 = arith.subf %199, %200 : vector<1x1x64xf32>
    %cst_76 = arith.constant 0.000000e+00 : f32
    %202 = vector.broadcast %cst_76 : f32 to vector<1x1x64xf32>
    %203 = arith.maximumf %201, %202 : vector<1x1x64xf32>
    %204 = vector.broadcast %194 : vector<1x1x64xf32> to vector<1x16x64xf32>
    %205 = arith.subf %190, %204 : vector<1x16x64xf32>
    %cst_77 = arith.constant 9.99999974E-6 : f32
    %206 = vector.broadcast %cst_77 : f32 to vector<1x1x64xf32>
    %207 = arith.addf %203, %206 : vector<1x1x64xf32>
    %208 = math.rsqrt %207 : vector<1x1x64xf32>
    %209 = vector.broadcast %208 : vector<1x1x64xf32> to vector<1x16x64xf32>
    %210 = arith.mulf %205, %209 : vector<1x16x64xf32>
    %211 = vector.extract_strided_slice %140 {offsets = [0, 32], sizes = [1, 64], strides = [1, 1]} : vector<1x224xf32> to vector<1x64xf32>
    %212 = vector.shape_cast %211 : vector<1x64xf32> to vector<1x1x64xf32>
    %213 = vector.extract_strided_slice %141 {offsets = [0, 32], sizes = [1, 64], strides = [1, 1]} : vector<1x224xf32> to vector<1x64xf32>
    %214 = vector.shape_cast %213 : vector<1x64xf32> to vector<1x1x64xf32>
    %215 = vector.broadcast %212 : vector<1x1x64xf32> to vector<1x16x64xf32>
    %216 = arith.mulf %215, %210 : vector<1x16x64xf32>
    %217 = vector.broadcast %214 : vector<1x1x64xf32> to vector<1x16x64xf32>
    %218 = arith.addf %216, %217 : vector<1x16x64xf32>
    %cst_78 = arith.constant 0.000000e+00 : f32
    %219 = vector.broadcast %cst_78 : f32 to vector<1x16x64xf32>
    %220 = arith.cmpf ogt, %218, %219 : vector<1x16x64xf32>
    %cst_79 = arith.constant 2.000000e-01 : f32
    %221 = vector.broadcast %cst_79 : f32 to vector<1x16x64xf32>
    %222 = arith.mulf %221, %218 : vector<1x16x64xf32>
    %223 = arith.select %220, %218, %222 : vector<1x16x64xi1>, vector<1x16x64xf32>
    %224 = vector.shape_cast %223 : vector<1x16x64xf32> to vector<16x64xf32>
    %c0_80 = arith.constant 0 : index
    %c0_81 = arith.constant 0 : index
    %225 = vector.load %arg17[%c0_80, %c0_81] : memref<64x128xbf16, #tpu.memory_space<vmem>>, vector<64x128xbf16>
    %226 = arith.truncf %224 : vector<16x64xf32> to vector<16x64xbf16>
    %cst_82 = arith.constant dense<0.000000e+00> : vector<16x128xf32>
    %227 = tpu.matmul %226, %225, %cst_82 {dimension_numbers = #tpu.dot_dimension_numbers<[1], [0], [0], [1], [0, 0, 1, 1], [], []>} : vector<16x64xbf16>, vector<64x128xbf16>, vector<16x128xf32> -> vector<16x128xf32>
    %c0_83 = arith.constant 0 : index
    %c0_84 = arith.constant 0 : index
    %228 = vector.load %arg18[%c0_83, %c0_84] : memref<1x128xf32, #tpu.memory_space<vmem>>, vector<1x128xf32>
    %229 = vector.broadcast %228 : vector<1x128xf32> to vector<16x128xf32>
    %230 = arith.addf %227, %229 : vector<16x128xf32>
    %231 = vector.shape_cast %230 : vector<16x128xf32> to vector<1x16x128xf32>
    %cst_85 = arith.constant dense<0.000000e+00> : vector<1x128xf32>
    %232 = vector.multi_reduction <add>, %231, %cst_85 [1] : vector<1x16x128xf32> to vector<1x128xf32>
    %233 = vector.shape_cast %232 : vector<1x128xf32> to vector<1x1x128xf32>
    %cst_86 = arith.constant 1.600000e+01 : f32
    %234 = vector.broadcast %cst_86 : f32 to vector<1x1x128xf32>
    %235 = arith.divf %233, %234 : vector<1x1x128xf32>
    %236 = arith.mulf %231, %231 : vector<1x16x128xf32>
    %cst_87 = arith.constant dense<0.000000e+00> : vector<1x128xf32>
    %237 = vector.multi_reduction <add>, %236, %cst_87 [1] : vector<1x16x128xf32> to vector<1x128xf32>
    %238 = vector.shape_cast %237 : vector<1x128xf32> to vector<1x1x128xf32>
    %cst_88 = arith.constant 1.600000e+01 : f32
    %239 = vector.broadcast %cst_88 : f32 to vector<1x1x128xf32>
    %240 = arith.divf %238, %239 : vector<1x1x128xf32>
    %241 = arith.mulf %235, %235 : vector<1x1x128xf32>
    %242 = arith.subf %240, %241 : vector<1x1x128xf32>
    %cst_89 = arith.constant 0.000000e+00 : f32
    %243 = vector.broadcast %cst_89 : f32 to vector<1x1x128xf32>
    %244 = arith.maximumf %242, %243 : vector<1x1x128xf32>
    %245 = vector.broadcast %235 : vector<1x1x128xf32> to vector<1x16x128xf32>
    %246 = arith.subf %231, %245 : vector<1x16x128xf32>
    %cst_90 = arith.constant 9.99999974E-6 : f32
    %247 = vector.broadcast %cst_90 : f32 to vector<1x1x128xf32>
    %248 = arith.addf %244, %247 : vector<1x1x128xf32>
    %249 = math.rsqrt %248 : vector<1x1x128xf32>
    %250 = vector.broadcast %249 : vector<1x1x128xf32> to vector<1x16x128xf32>
    %251 = arith.mulf %246, %250 : vector<1x16x128xf32>
    %252 = vector.extract_strided_slice %140 {offsets = [0, 96], sizes = [1, 128], strides = [1, 1]} : vector<1x224xf32> to vector<1x128xf32>
    %253 = vector.shape_cast %252 : vector<1x128xf32> to vector<1x1x128xf32>
    %254 = vector.extract_strided_slice %141 {offsets = [0, 96], sizes = [1, 128], strides = [1, 1]} : vector<1x224xf32> to vector<1x128xf32>
    %255 = vector.shape_cast %254 : vector<1x128xf32> to vector<1x1x128xf32>
    %256 = vector.broadcast %253 : vector<1x1x128xf32> to vector<1x16x128xf32>
    %257 = arith.mulf %256, %251 : vector<1x16x128xf32>
    %258 = vector.broadcast %255 : vector<1x1x128xf32> to vector<1x16x128xf32>
    %259 = arith.addf %257, %258 : vector<1x16x128xf32>
    %cst_91 = arith.constant 0.000000e+00 : f32
    %260 = vector.broadcast %cst_91 : f32 to vector<1x16x128xf32>
    %261 = arith.cmpf ogt, %259, %260 : vector<1x16x128xf32>
    %cst_92 = arith.constant 2.000000e-01 : f32
    %262 = vector.broadcast %cst_92 : f32 to vector<1x16x128xf32>
    %263 = arith.mulf %262, %259 : vector<1x16x128xf32>
    %264 = arith.select %261, %259, %263 : vector<1x16x128xi1>, vector<1x16x128xf32>
    %265 = arith.truncf %132 : vector<1x16x128xf32> to vector<1x16x128xbf16>
    %266 = arith.truncf %264 : vector<1x16x128xf32> to vector<1x16x128xbf16>
    "tpu.trace_start"() <{level = 10 : i32, message = "bnf,bmf->bnm"}> : () -> ()
    %cst_93 = arith.constant dense<0.000000e+00> : vector<1x16x16xf32>
    %267 = tpu.matmul %265, %266, %cst_93 {dimension_numbers = #tpu.dot_dimension_numbers<[2], [2], [1], [1], [0, 0, 0, 1, 1, 1], [0], [0]>} : vector<1x16x128xbf16>, vector<1x16x128xbf16>, vector<1x16x16xf32> -> vector<1x16x16xf32>
    %cst_94 = arith.constant 0.000000e+00 : f32
    "tpu.trace_stop"() : () -> ()
    %268 = vector.broadcast %cst_94 : f32 to vector<1x16x16xf32>
    %269 = arith.cmpf ogt, %267, %268 : vector<1x16x16xf32>
    %cst_95 = arith.constant 0.000000e+00 : f32
    %270 = vector.broadcast %cst_95 : f32 to vector<1x16x16xf32>
    %271 = arith.select %269, %267, %270 : vector<1x16x16xi1>, vector<1x16x16xf32>
    %272 = tpu.iota {dimensions = array<i32: 0>} : vector<16x16xi32>
    %273 = tpu.iota {dimensions = array<i32: 1>} : vector<16x16xi32>
    %274 = arith.cmpi eq, %272, %273 : vector<16x16xi32>
    %275 = vector.shape_cast %274 : vector<16x16xi1> to vector<1x16x16xi1>
    %cst_96 = arith.constant 0.000000e+00 : f32
    %276 = vector.broadcast %cst_96 : f32 to vector<1x16x16xf32>
    %277 = arith.select %275, %276, %271 : vector<1x16x16xi1>, vector<1x16x16xf32>
    %cst_97 = arith.constant dense<0.000000e+00> : vector<1x16xf32>
    %278 = vector.multi_reduction <add>, %277, %cst_97 [2] : vector<1x16x16xf32> to vector<1x16xf32>
    %cst_98 = arith.constant 0.000000e+00 : f32
    %279 = vector.broadcast %cst_98 : f32 to vector<1x16xf32>
    %280 = arith.cmpf ogt, %278, %279 : vector<1x16xf32>
    %cst_99 = arith.constant 9.99999996E-13 : f32
    %281 = vector.broadcast %cst_99 : f32 to vector<1x16xf32>
    %282 = arith.maximumf %278, %281 : vector<1x16xf32>
    %283 = math.rsqrt %282 : vector<1x16xf32>
    %cst_100 = arith.constant 0.000000e+00 : f32
    %284 = vector.broadcast %cst_100 : f32 to vector<1x16xf32>
    %285 = arith.select %280, %283, %284 : vector<1x16xi1>, vector<1x16xf32>
    %286 = vector.shape_cast %285 : vector<1x16xf32> to vector<1x16x1xf32>
    %287 = vector.broadcast %286 : vector<1x16x1xf32> to vector<1x16x16xf32>
    %288 = arith.mulf %287, %277 : vector<1x16x16xf32>
    %289 = vector.shape_cast %285 : vector<1x16xf32> to vector<1x1x16xf32>
    %290 = vector.broadcast %289 : vector<1x1x16xf32> to vector<1x16x16xf32>
    %291 = arith.mulf %288, %290 : vector<1x16x16xf32>
    %cst_101 = arith.constant 0.000000e+00 : f32
    %292 = vector.broadcast %cst_101 : f32 to vector<1x16x16xf32>
    %293 = arith.subf %292, %291 : vector<1x16x16xf32>
    %c0_102 = arith.constant 0 : index
    %c0_103 = arith.constant 0 : index
    %c0_104 = arith.constant 0 : index
    %294 = vector.load %arg4[%c0_102, %c0_103, %c0_104] : memref<1x1x8xf32, #tpu.memory_space<vmem>>, vector<1x1x8xf32>
    %295 = vector.shape_cast %294 : vector<1x1x8xf32> to vector<1x8xf32>
    %c0_105 = arith.constant 0 : index
    %c0_106 = arith.constant 0 : index
    %296 = vector.load %arg32[%c0_105, %c0_106] : memref<8x672xbf16, #tpu.memory_space<vmem>>, vector<8x672xbf16>
    %297 = arith.truncf %295 : vector<1x8xf32> to vector<1x8xbf16>
    %cst_107 = arith.constant dense<0.000000e+00> : vector<1x672xf32>
    %298 = tpu.matmul %297, %296, %cst_107 {dimension_numbers = #tpu.dot_dimension_numbers<[1], [0], [0], [1], [0, 0, 1, 1], [], []>} : vector<1x8xbf16>, vector<8x672xbf16>, vector<1x672xf32> -> vector<1x672xf32>
    %299 = vector.extract_strided_slice %298 {offsets = [0, 0], sizes = [1, 336], strides = [1, 1]} : vector<1x672xf32> to vector<1x336xf32>
    %cst_108 = arith.constant 1.000000e+00 : f32
    %300 = vector.broadcast %cst_108 : f32 to vector<1x336xf32>
    %301 = arith.addf %300, %299 : vector<1x336xf32>
    %302 = vector.extract_strided_slice %298 {offsets = [0, 336], sizes = [1, 336], strides = [1, 1]} : vector<1x672xf32> to vector<1x336xf32>
    %303 = vector.shape_cast %0 : vector<1x16x16xf32> to vector<16x16xf32>
    %c0_109 = arith.constant 0 : index
    %c0_110 = arith.constant 0 : index
    %304 = vector.load %arg20[%c0_109, %c0_110] : memref<16x16xbf16, #tpu.memory_space<vmem>>, vector<16x16xbf16>
    %305 = arith.truncf %303 : vector<16x16xf32> to vector<16x16xbf16>
    %cst_111 = arith.constant dense<0.000000e+00> : vector<16x16xf32>
    %306 = tpu.matmul %305, %304, %cst_111 {dimension_numbers = #tpu.dot_dimension_numbers<[1], [0], [0], [1], [0, 0, 1, 1], [], []>} : vector<16x16xbf16>, vector<16x16xbf16>, vector<16x16xf32> -> vector<16x16xf32>
    %c0_112 = arith.constant 0 : index
    %c0_113 = arith.constant 0 : index
    %307 = vector.load %arg21[%c0_112, %c0_113] : memref<1x16xf32, #tpu.memory_space<vmem>>, vector<1x16xf32>
    %308 = vector.broadcast %307 : vector<1x16xf32> to vector<16x16xf32>
    %309 = arith.addf %306, %308 : vector<16x16xf32>
    %310 = vector.shape_cast %309 : vector<16x16xf32> to vector<1x16x16xf32>
    %cst_114 = arith.constant dense<0.000000e+00> : vector<1x16xf32>
    %311 = vector.multi_reduction <add>, %310, %cst_114 [1] : vector<1x16x16xf32> to vector<1x16xf32>
    %312 = vector.shape_cast %311 : vector<1x16xf32> to vector<1x1x16xf32>
    %cst_115 = arith.constant 1.600000e+01 : f32
    %313 = vector.broadcast %cst_115 : f32 to vector<1x1x16xf32>
    %314 = arith.divf %312, %313 : vector<1x1x16xf32>
    %315 = arith.mulf %310, %310 : vector<1x16x16xf32>
    %cst_116 = arith.constant dense<0.000000e+00> : vector<1x16xf32>
    %316 = vector.multi_reduction <add>, %315, %cst_116 [1] : vector<1x16x16xf32> to vector<1x16xf32>
    %317 = vector.shape_cast %316 : vector<1x16xf32> to vector<1x1x16xf32>
    %cst_117 = arith.constant 1.600000e+01 : f32
    %318 = vector.broadcast %cst_117 : f32 to vector<1x1x16xf32>
    %319 = arith.divf %317, %318 : vector<1x1x16xf32>
    %320 = arith.mulf %314, %314 : vector<1x1x16xf32>
    %321 = arith.subf %319, %320 : vector<1x1x16xf32>
    %cst_118 = arith.constant 0.000000e+00 : f32
    %322 = vector.broadcast %cst_118 : f32 to vector<1x1x16xf32>
    %323 = arith.maximumf %321, %322 : vector<1x1x16xf32>
    %324 = vector.broadcast %314 : vector<1x1x16xf32> to vector<1x16x16xf32>
    %325 = arith.subf %310, %324 : vector<1x16x16xf32>
    %cst_119 = arith.constant 9.99999974E-6 : f32
    %326 = vector.broadcast %cst_119 : f32 to vector<1x1x16xf32>
    %327 = arith.addf %323, %326 : vector<1x1x16xf32>
    %328 = math.rsqrt %327 : vector<1x1x16xf32>
    %329 = vector.broadcast %328 : vector<1x1x16xf32> to vector<1x16x16xf32>
    %330 = arith.mulf %325, %329 : vector<1x16x16xf32>
    %331 = vector.extract_strided_slice %301 {offsets = [0, 0], sizes = [1, 16], strides = [1, 1]} : vector<1x336xf32> to vector<1x16xf32>
    %332 = vector.shape_cast %331 : vector<1x16xf32> to vector<1x1x16xf32>
    %333 = vector.extract_strided_slice %302 {offsets = [0, 0], sizes = [1, 16], strides = [1, 1]} : vector<1x336xf32> to vector<1x16xf32>
    %334 = vector.shape_cast %333 : vector<1x16xf32> to vector<1x1x16xf32>
    %335 = vector.broadcast %332 : vector<1x1x16xf32> to vector<1x16x16xf32>
    %336 = arith.mulf %335, %330 : vector<1x16x16xf32>
    %337 = vector.broadcast %334 : vector<1x1x16xf32> to vector<1x16x16xf32>
    %338 = arith.addf %336, %337 : vector<1x16x16xf32>
    %cst_120 = arith.constant 0.000000e+00 : f32
    %339 = vector.broadcast %cst_120 : f32 to vector<1x16x16xf32>
    %340 = arith.cmpf ogt, %338, %339 : vector<1x16x16xf32>
    %cst_121 = arith.constant 2.000000e-01 : f32
    %341 = vector.broadcast %cst_121 : f32 to vector<1x16x16xf32>
    %342 = arith.mulf %341, %338 : vector<1x16x16xf32>
    %343 = arith.select %340, %338, %342 : vector<1x16x16xi1>, vector<1x16x16xf32>
    %344 = vector.shape_cast %343 : vector<1x16x16xf32> to vector<16x16xf32>
    %c0_122 = arith.constant 0 : index
    %c0_123 = arith.constant 0 : index
    %345 = vector.load %arg22[%c0_122, %c0_123] : memref<16x32xbf16, #tpu.memory_space<vmem>>, vector<16x32xbf16>
    %346 = arith.truncf %344 : vector<16x16xf32> to vector<16x16xbf16>
    %cst_124 = arith.constant dense<0.000000e+00> : vector<16x32xf32>
    %347 = tpu.matmul %346, %345, %cst_124 {dimension_numbers = #tpu.dot_dimension_numbers<[1], [0], [0], [1], [0, 0, 1, 1], [], []>} : vector<16x16xbf16>, vector<16x32xbf16>, vector<16x32xf32> -> vector<16x32xf32>
    %c0_125 = arith.constant 0 : index
    %c0_126 = arith.constant 0 : index
    %348 = vector.load %arg23[%c0_125, %c0_126] : memref<1x32xf32, #tpu.memory_space<vmem>>, vector<1x32xf32>
    %349 = vector.broadcast %348 : vector<1x32xf32> to vector<16x32xf32>
    %350 = arith.addf %347, %349 : vector<16x32xf32>
    %351 = vector.shape_cast %350 : vector<16x32xf32> to vector<1x16x32xf32>
    %cst_127 = arith.constant dense<0.000000e+00> : vector<1x32xf32>
    %352 = vector.multi_reduction <add>, %351, %cst_127 [1] : vector<1x16x32xf32> to vector<1x32xf32>
    %353 = vector.shape_cast %352 : vector<1x32xf32> to vector<1x1x32xf32>
    %cst_128 = arith.constant 1.600000e+01 : f32
    %354 = vector.broadcast %cst_128 : f32 to vector<1x1x32xf32>
    %355 = arith.divf %353, %354 : vector<1x1x32xf32>
    %356 = arith.mulf %351, %351 : vector<1x16x32xf32>
    %cst_129 = arith.constant dense<0.000000e+00> : vector<1x32xf32>
    %357 = vector.multi_reduction <add>, %356, %cst_129 [1] : vector<1x16x32xf32> to vector<1x32xf32>
    %358 = vector.shape_cast %357 : vector<1x32xf32> to vector<1x1x32xf32>
    %cst_130 = arith.constant 1.600000e+01 : f32
    %359 = vector.broadcast %cst_130 : f32 to vector<1x1x32xf32>
    %360 = arith.divf %358, %359 : vector<1x1x32xf32>
    %361 = arith.mulf %355, %355 : vector<1x1x32xf32>
    %362 = arith.subf %360, %361 : vector<1x1x32xf32>
    %cst_131 = arith.constant 0.000000e+00 : f32
    %363 = vector.broadcast %cst_131 : f32 to vector<1x1x32xf32>
    %364 = arith.maximumf %362, %363 : vector<1x1x32xf32>
    %365 = vector.broadcast %355 : vector<1x1x32xf32> to vector<1x16x32xf32>
    %366 = arith.subf %351, %365 : vector<1x16x32xf32>
    %cst_132 = arith.constant 9.99999974E-6 : f32
    %367 = vector.broadcast %cst_132 : f32 to vector<1x1x32xf32>
    %368 = arith.addf %364, %367 : vector<1x1x32xf32>
    %369 = math.rsqrt %368 : vector<1x1x32xf32>
    %370 = vector.broadcast %369 : vector<1x1x32xf32> to vector<1x16x32xf32>
    %371 = arith.mulf %366, %370 : vector<1x16x32xf32>
    %372 = vector.extract_strided_slice %301 {offsets = [0, 16], sizes = [1, 32], strides = [1, 1]} : vector<1x336xf32> to vector<1x32xf32>
    %373 = vector.shape_cast %372 : vector<1x32xf32> to vector<1x1x32xf32>
    %374 = vector.extract_strided_slice %302 {offsets = [0, 16], sizes = [1, 32], strides = [1, 1]} : vector<1x336xf32> to vector<1x32xf32>
    %375 = vector.shape_cast %374 : vector<1x32xf32> to vector<1x1x32xf32>
    %376 = vector.broadcast %373 : vector<1x1x32xf32> to vector<1x16x32xf32>
    %377 = arith.mulf %376, %371 : vector<1x16x32xf32>
    %378 = vector.broadcast %375 : vector<1x1x32xf32> to vector<1x16x32xf32>
    %379 = arith.addf %377, %378 : vector<1x16x32xf32>
    %cst_133 = arith.constant 0.000000e+00 : f32
    %380 = vector.broadcast %cst_133 : f32 to vector<1x16x32xf32>
    %381 = arith.cmpf ogt, %379, %380 : vector<1x16x32xf32>
    %cst_134 = arith.constant 2.000000e-01 : f32
    %382 = vector.broadcast %cst_134 : f32 to vector<1x16x32xf32>
    %383 = arith.mulf %382, %379 : vector<1x16x32xf32>
    %384 = arith.select %381, %379, %383 : vector<1x16x32xi1>, vector<1x16x32xf32>
    %385 = vector.shape_cast %384 : vector<1x16x32xf32> to vector<16x32xf32>
    %c0_135 = arith.constant 0 : index
    %c0_136 = arith.constant 0 : index
    %386 = vector.load %arg24[%c0_135, %c0_136] : memref<32x32xbf16, #tpu.memory_space<vmem>>, vector<32x32xbf16>
    %387 = arith.truncf %385 : vector<16x32xf32> to vector<16x32xbf16>
    %cst_137 = arith.constant dense<0.000000e+00> : vector<16x32xf32>
    %388 = tpu.matmul %387, %386, %cst_137 {dimension_numbers = #tpu.dot_dimension_numbers<[1], [0], [0], [1], [0, 0, 1, 1], [], []>} : vector<16x32xbf16>, vector<32x32xbf16>, vector<16x32xf32> -> vector<16x32xf32>
    %c0_138 = arith.constant 0 : index
    %c0_139 = arith.constant 0 : index
    %389 = vector.load %arg25[%c0_138, %c0_139] : memref<1x32xf32, #tpu.memory_space<vmem>>, vector<1x32xf32>
    %390 = vector.broadcast %389 : vector<1x32xf32> to vector<16x32xf32>
    %391 = arith.addf %388, %390 : vector<16x32xf32>
    %392 = vector.shape_cast %391 : vector<16x32xf32> to vector<1x16x32xf32>
    %cst_140 = arith.constant dense<0.000000e+00> : vector<1x32xf32>
    %393 = vector.multi_reduction <add>, %392, %cst_140 [1] : vector<1x16x32xf32> to vector<1x32xf32>
    %394 = vector.shape_cast %393 : vector<1x32xf32> to vector<1x1x32xf32>
    %cst_141 = arith.constant 1.600000e+01 : f32
    %395 = vector.broadcast %cst_141 : f32 to vector<1x1x32xf32>
    %396 = arith.divf %394, %395 : vector<1x1x32xf32>
    %397 = arith.mulf %392, %392 : vector<1x16x32xf32>
    %cst_142 = arith.constant dense<0.000000e+00> : vector<1x32xf32>
    %398 = vector.multi_reduction <add>, %397, %cst_142 [1] : vector<1x16x32xf32> to vector<1x32xf32>
    %399 = vector.shape_cast %398 : vector<1x32xf32> to vector<1x1x32xf32>
    %cst_143 = arith.constant 1.600000e+01 : f32
    %400 = vector.broadcast %cst_143 : f32 to vector<1x1x32xf32>
    %401 = arith.divf %399, %400 : vector<1x1x32xf32>
    %402 = arith.mulf %396, %396 : vector<1x1x32xf32>
    %403 = arith.subf %401, %402 : vector<1x1x32xf32>
    %cst_144 = arith.constant 0.000000e+00 : f32
    %404 = vector.broadcast %cst_144 : f32 to vector<1x1x32xf32>
    %405 = arith.maximumf %403, %404 : vector<1x1x32xf32>
    %406 = vector.broadcast %396 : vector<1x1x32xf32> to vector<1x16x32xf32>
    %407 = arith.subf %392, %406 : vector<1x16x32xf32>
    %cst_145 = arith.constant 9.99999974E-6 : f32
    %408 = vector.broadcast %cst_145 : f32 to vector<1x1x32xf32>
    %409 = arith.addf %405, %408 : vector<1x1x32xf32>
    %410 = math.rsqrt %409 : vector<1x1x32xf32>
    %411 = vector.broadcast %410 : vector<1x1x32xf32> to vector<1x16x32xf32>
    %412 = arith.mulf %407, %411 : vector<1x16x32xf32>
    %413 = vector.extract_strided_slice %301 {offsets = [0, 48], sizes = [1, 32], strides = [1, 1]} : vector<1x336xf32> to vector<1x32xf32>
    %414 = vector.shape_cast %413 : vector<1x32xf32> to vector<1x1x32xf32>
    %415 = vector.extract_strided_slice %302 {offsets = [0, 48], sizes = [1, 32], strides = [1, 1]} : vector<1x336xf32> to vector<1x32xf32>
    %416 = vector.shape_cast %415 : vector<1x32xf32> to vector<1x1x32xf32>
    %417 = vector.broadcast %414 : vector<1x1x32xf32> to vector<1x16x32xf32>
    %418 = arith.mulf %417, %412 : vector<1x16x32xf32>
    %419 = vector.broadcast %416 : vector<1x1x32xf32> to vector<1x16x32xf32>
    %420 = arith.addf %418, %419 : vector<1x16x32xf32>
    %cst_146 = arith.constant 0.000000e+00 : f32
    %421 = vector.broadcast %cst_146 : f32 to vector<1x16x32xf32>
    %422 = arith.cmpf ogt, %420, %421 : vector<1x16x32xf32>
    %cst_147 = arith.constant 2.000000e-01 : f32
    %423 = vector.broadcast %cst_147 : f32 to vector<1x16x32xf32>
    %424 = arith.mulf %423, %420 : vector<1x16x32xf32>
    %425 = arith.select %422, %420, %424 : vector<1x16x32xi1>, vector<1x16x32xf32>
    %426 = vector.shape_cast %425 : vector<1x16x32xf32> to vector<16x32xf32>
    %c0_148 = arith.constant 0 : index
    %c0_149 = arith.constant 0 : index
    %427 = vector.load %arg26[%c0_148, %c0_149] : memref<32x64xbf16, #tpu.memory_space<vmem>>, vector<32x64xbf16>
    %428 = arith.truncf %426 : vector<16x32xf32> to vector<16x32xbf16>
    %cst_150 = arith.constant dense<0.000000e+00> : vector<16x64xf32>
    %429 = tpu.matmul %428, %427, %cst_150 {dimension_numbers = #tpu.dot_dimension_numbers<[1], [0], [0], [1], [0, 0, 1, 1], [], []>} : vector<16x32xbf16>, vector<32x64xbf16>, vector<16x64xf32> -> vector<16x64xf32>
    %c0_151 = arith.constant 0 : index
    %c0_152 = arith.constant 0 : index
    %430 = vector.load %arg27[%c0_151, %c0_152] : memref<1x64xf32, #tpu.memory_space<vmem>>, vector<1x64xf32>
    %431 = vector.broadcast %430 : vector<1x64xf32> to vector<16x64xf32>
    %432 = arith.addf %429, %431 : vector<16x64xf32>
    %433 = vector.shape_cast %432 : vector<16x64xf32> to vector<1x16x64xf32>
    %cst_153 = arith.constant dense<0.000000e+00> : vector<1x64xf32>
    %434 = vector.multi_reduction <add>, %433, %cst_153 [1] : vector<1x16x64xf32> to vector<1x64xf32>
    %435 = vector.shape_cast %434 : vector<1x64xf32> to vector<1x1x64xf32>
    %cst_154 = arith.constant 1.600000e+01 : f32
    %436 = vector.broadcast %cst_154 : f32 to vector<1x1x64xf32>
    %437 = arith.divf %435, %436 : vector<1x1x64xf32>
    %438 = arith.mulf %433, %433 : vector<1x16x64xf32>
    %cst_155 = arith.constant dense<0.000000e+00> : vector<1x64xf32>
    %439 = vector.multi_reduction <add>, %438, %cst_155 [1] : vector<1x16x64xf32> to vector<1x64xf32>
    %440 = vector.shape_cast %439 : vector<1x64xf32> to vector<1x1x64xf32>
    %cst_156 = arith.constant 1.600000e+01 : f32
    %441 = vector.broadcast %cst_156 : f32 to vector<1x1x64xf32>
    %442 = arith.divf %440, %441 : vector<1x1x64xf32>
    %443 = arith.mulf %437, %437 : vector<1x1x64xf32>
    %444 = arith.subf %442, %443 : vector<1x1x64xf32>
    %cst_157 = arith.constant 0.000000e+00 : f32
    %445 = vector.broadcast %cst_157 : f32 to vector<1x1x64xf32>
    %446 = arith.maximumf %444, %445 : vector<1x1x64xf32>
    %447 = vector.broadcast %437 : vector<1x1x64xf32> to vector<1x16x64xf32>
    %448 = arith.subf %433, %447 : vector<1x16x64xf32>
    %cst_158 = arith.constant 9.99999974E-6 : f32
    %449 = vector.broadcast %cst_158 : f32 to vector<1x1x64xf32>
    %450 = arith.addf %446, %449 : vector<1x1x64xf32>
    %451 = math.rsqrt %450 : vector<1x1x64xf32>
    %452 = vector.broadcast %451 : vector<1x1x64xf32> to vector<1x16x64xf32>
    %453 = arith.mulf %448, %452 : vector<1x16x64xf32>
    %454 = vector.extract_strided_slice %301 {offsets = [0, 80], sizes = [1, 64], strides = [1, 1]} : vector<1x336xf32> to vector<1x64xf32>
    %455 = vector.shape_cast %454 : vector<1x64xf32> to vector<1x1x64xf32>
    %456 = vector.extract_strided_slice %302 {offsets = [0, 80], sizes = [1, 64], strides = [1, 1]} : vector<1x336xf32> to vector<1x64xf32>
    %457 = vector.shape_cast %456 : vector<1x64xf32> to vector<1x1x64xf32>
    %458 = vector.broadcast %455 : vector<1x1x64xf32> to vector<1x16x64xf32>
    %459 = arith.mulf %458, %453 : vector<1x16x64xf32>
    %460 = vector.broadcast %457 : vector<1x1x64xf32> to vector<1x16x64xf32>
    %461 = arith.addf %459, %460 : vector<1x16x64xf32>
    %cst_159 = arith.constant 0.000000e+00 : f32
    %462 = vector.broadcast %cst_159 : f32 to vector<1x16x64xf32>
    %463 = arith.cmpf ogt, %461, %462 : vector<1x16x64xf32>
    %cst_160 = arith.constant 2.000000e-01 : f32
    %464 = vector.broadcast %cst_160 : f32 to vector<1x16x64xf32>
    %465 = arith.mulf %464, %461 : vector<1x16x64xf32>
    %466 = arith.select %463, %461, %465 : vector<1x16x64xi1>, vector<1x16x64xf32>
    %467 = vector.shape_cast %466 : vector<1x16x64xf32> to vector<16x64xf32>
    %c0_161 = arith.constant 0 : index
    %c0_162 = arith.constant 0 : index
    %468 = vector.load %arg28[%c0_161, %c0_162] : memref<64x64xbf16, #tpu.memory_space<vmem>>, vector<64x64xbf16>
    %469 = arith.truncf %467 : vector<16x64xf32> to vector<16x64xbf16>
    %cst_163 = arith.constant dense<0.000000e+00> : vector<16x64xf32>
    %470 = tpu.matmul %469, %468, %cst_163 {dimension_numbers = #tpu.dot_dimension_numbers<[1], [0], [0], [1], [0, 0, 1, 1], [], []>} : vector<16x64xbf16>, vector<64x64xbf16>, vector<16x64xf32> -> vector<16x64xf32>
    %c0_164 = arith.constant 0 : index
    %c0_165 = arith.constant 0 : index
    %471 = vector.load %arg29[%c0_164, %c0_165] : memref<1x64xf32, #tpu.memory_space<vmem>>, vector<1x64xf32>
    %472 = vector.broadcast %471 : vector<1x64xf32> to vector<16x64xf32>
    %473 = arith.addf %470, %472 : vector<16x64xf32>
    %474 = vector.shape_cast %473 : vector<16x64xf32> to vector<1x16x64xf32>
    %cst_166 = arith.constant dense<0.000000e+00> : vector<1x64xf32>
    %475 = vector.multi_reduction <add>, %474, %cst_166 [1] : vector<1x16x64xf32> to vector<1x64xf32>
    %476 = vector.shape_cast %475 : vector<1x64xf32> to vector<1x1x64xf32>
    %cst_167 = arith.constant 1.600000e+01 : f32
    %477 = vector.broadcast %cst_167 : f32 to vector<1x1x64xf32>
    %478 = arith.divf %476, %477 : vector<1x1x64xf32>
    %479 = arith.mulf %474, %474 : vector<1x16x64xf32>
    %cst_168 = arith.constant dense<0.000000e+00> : vector<1x64xf32>
    %480 = vector.multi_reduction <add>, %479, %cst_168 [1] : vector<1x16x64xf32> to vector<1x64xf32>
    %481 = vector.shape_cast %480 : vector<1x64xf32> to vector<1x1x64xf32>
    %cst_169 = arith.constant 1.600000e+01 : f32
    %482 = vector.broadcast %cst_169 : f32 to vector<1x1x64xf32>
    %483 = arith.divf %481, %482 : vector<1x1x64xf32>
    %484 = arith.mulf %478, %478 : vector<1x1x64xf32>
    %485 = arith.subf %483, %484 : vector<1x1x64xf32>
    %cst_170 = arith.constant 0.000000e+00 : f32
    %486 = vector.broadcast %cst_170 : f32 to vector<1x1x64xf32>
    %487 = arith.maximumf %485, %486 : vector<1x1x64xf32>
    %488 = vector.broadcast %478 : vector<1x1x64xf32> to vector<1x16x64xf32>
    %489 = arith.subf %474, %488 : vector<1x16x64xf32>
    %cst_171 = arith.constant 9.99999974E-6 : f32
    %490 = vector.broadcast %cst_171 : f32 to vector<1x1x64xf32>
    %491 = arith.addf %487, %490 : vector<1x1x64xf32>
    %492 = math.rsqrt %491 : vector<1x1x64xf32>
    %493 = vector.broadcast %492 : vector<1x1x64xf32> to vector<1x16x64xf32>
    %494 = arith.mulf %489, %493 : vector<1x16x64xf32>
    %495 = vector.extract_strided_slice %301 {offsets = [0, 144], sizes = [1, 64], strides = [1, 1]} : vector<1x336xf32> to vector<1x64xf32>
    %496 = vector.shape_cast %495 : vector<1x64xf32> to vector<1x1x64xf32>
    %497 = vector.extract_strided_slice %302 {offsets = [0, 144], sizes = [1, 64], strides = [1, 1]} : vector<1x336xf32> to vector<1x64xf32>
    %498 = vector.shape_cast %497 : vector<1x64xf32> to vector<1x1x64xf32>
    %499 = vector.broadcast %496 : vector<1x1x64xf32> to vector<1x16x64xf32>
    %500 = arith.mulf %499, %494 : vector<1x16x64xf32>
    %501 = vector.broadcast %498 : vector<1x1x64xf32> to vector<1x16x64xf32>
    %502 = arith.addf %500, %501 : vector<1x16x64xf32>
    %cst_172 = arith.constant 0.000000e+00 : f32
    %503 = vector.broadcast %cst_172 : f32 to vector<1x16x64xf32>
    %504 = arith.cmpf ogt, %502, %503 : vector<1x16x64xf32>
    %cst_173 = arith.constant 2.000000e-01 : f32
    %505 = vector.broadcast %cst_173 : f32 to vector<1x16x64xf32>
    %506 = arith.mulf %505, %502 : vector<1x16x64xf32>
    %507 = arith.select %504, %502, %506 : vector<1x16x64xi1>, vector<1x16x64xf32>
    %508 = vector.shape_cast %507 : vector<1x16x64xf32> to vector<16x64xf32>
    %c0_174 = arith.constant 0 : index
    %c0_175 = arith.constant 0 : index
    %509 = vector.load %arg30[%c0_174, %c0_175] : memref<64x128xbf16, #tpu.memory_space<vmem>>, vector<64x128xbf16>
    %510 = arith.truncf %508 : vector<16x64xf32> to vector<16x64xbf16>
    %cst_176 = arith.constant dense<0.000000e+00> : vector<16x128xf32>
    %511 = tpu.matmul %510, %509, %cst_176 {dimension_numbers = #tpu.dot_dimension_numbers<[1], [0], [0], [1], [0, 0, 1, 1], [], []>} : vector<16x64xbf16>, vector<64x128xbf16>, vector<16x128xf32> -> vector<16x128xf32>
    %c0_177 = arith.constant 0 : index
    %c0_178 = arith.constant 0 : index
    %512 = vector.load %arg31[%c0_177, %c0_178] : memref<1x128xf32, #tpu.memory_space<vmem>>, vector<1x128xf32>
    %513 = vector.broadcast %512 : vector<1x128xf32> to vector<16x128xf32>
    %514 = arith.addf %511, %513 : vector<16x128xf32>
    %515 = vector.shape_cast %514 : vector<16x128xf32> to vector<1x16x128xf32>
    %cst_179 = arith.constant dense<0.000000e+00> : vector<1x128xf32>
    %516 = vector.multi_reduction <add>, %515, %cst_179 [1] : vector<1x16x128xf32> to vector<1x128xf32>
    %517 = vector.shape_cast %516 : vector<1x128xf32> to vector<1x1x128xf32>
    %cst_180 = arith.constant 1.600000e+01 : f32
    %518 = vector.broadcast %cst_180 : f32 to vector<1x1x128xf32>
    %519 = arith.divf %517, %518 : vector<1x1x128xf32>
    %520 = arith.mulf %515, %515 : vector<1x16x128xf32>
    %cst_181 = arith.constant dense<0.000000e+00> : vector<1x128xf32>
    %521 = vector.multi_reduction <add>, %520, %cst_181 [1] : vector<1x16x128xf32> to vector<1x128xf32>
    %522 = vector.shape_cast %521 : vector<1x128xf32> to vector<1x1x128xf32>
    %cst_182 = arith.constant 1.600000e+01 : f32
    %523 = vector.broadcast %cst_182 : f32 to vector<1x1x128xf32>
    %524 = arith.divf %522, %523 : vector<1x1x128xf32>
    %525 = arith.mulf %519, %519 : vector<1x1x128xf32>
    %526 = arith.subf %524, %525 : vector<1x1x128xf32>
    %cst_183 = arith.constant 0.000000e+00 : f32
    %527 = vector.broadcast %cst_183 : f32 to vector<1x1x128xf32>
    %528 = arith.maximumf %526, %527 : vector<1x1x128xf32>
    %529 = vector.broadcast %519 : vector<1x1x128xf32> to vector<1x16x128xf32>
    %530 = arith.subf %515, %529 : vector<1x16x128xf32>
    %cst_184 = arith.constant 9.99999974E-6 : f32
    %531 = vector.broadcast %cst_184 : f32 to vector<1x1x128xf32>
    %532 = arith.addf %528, %531 : vector<1x1x128xf32>
    %533 = math.rsqrt %532 : vector<1x1x128xf32>
    %534 = vector.broadcast %533 : vector<1x1x128xf32> to vector<1x16x128xf32>
    %535 = arith.mulf %530, %534 : vector<1x16x128xf32>
    %536 = vector.extract_strided_slice %301 {offsets = [0, 208], sizes = [1, 128], strides = [1, 1]} : vector<1x336xf32> to vector<1x128xf32>
    %537 = vector.shape_cast %536 : vector<1x128xf32> to vector<1x1x128xf32>
    %538 = vector.extract_strided_slice %302 {offsets = [0, 208], sizes = [1, 128], strides = [1, 1]} : vector<1x336xf32> to vector<1x128xf32>
    %539 = vector.shape_cast %538 : vector<1x128xf32> to vector<1x1x128xf32>
    %540 = vector.broadcast %537 : vector<1x1x128xf32> to vector<1x16x128xf32>
    %541 = arith.mulf %540, %535 : vector<1x16x128xf32>
    %542 = vector.broadcast %539 : vector<1x1x128xf32> to vector<1x16x128xf32>
    %543 = arith.addf %541, %542 : vector<1x16x128xf32>
    %cst_185 = arith.constant 0.000000e+00 : f32
    %544 = vector.broadcast %cst_185 : f32 to vector<1x16x128xf32>
    %545 = arith.cmpf ogt, %543, %544 : vector<1x16x128xf32>
    %cst_186 = arith.constant 2.000000e-01 : f32
    %546 = vector.broadcast %cst_186 : f32 to vector<1x16x128xf32>
    %547 = arith.mulf %546, %543 : vector<1x16x128xf32>
    %548 = arith.select %545, %543, %547 : vector<1x16x128xi1>, vector<1x16x128xf32>
    %c0_187 = arith.constant 0 : index
    %c0_188 = arith.constant 0 : index
    %c0_189 = arith.constant 0 : index
    %549 = vector.load %arg5[%c0_187, %c0_188, %c0_189] : memref<1x1x8xf32, #tpu.memory_space<vmem>>, vector<1x1x8xf32>
    %550 = vector.shape_cast %549 : vector<1x1x8xf32> to vector<1x8xf32>
    %c0_190 = arith.constant 0 : index
    %c0_191 = arith.constant 0 : index
    %551 = vector.load %arg45[%c0_190, %c0_191] : memref<8x672xbf16, #tpu.memory_space<vmem>>, vector<8x672xbf16>
    %552 = arith.truncf %550 : vector<1x8xf32> to vector<1x8xbf16>
    %cst_192 = arith.constant dense<0.000000e+00> : vector<1x672xf32>
    %553 = tpu.matmul %552, %551, %cst_192 {dimension_numbers = #tpu.dot_dimension_numbers<[1], [0], [0], [1], [0, 0, 1, 1], [], []>} : vector<1x8xbf16>, vector<8x672xbf16>, vector<1x672xf32> -> vector<1x672xf32>
    %554 = vector.extract_strided_slice %553 {offsets = [0, 0], sizes = [1, 336], strides = [1, 1]} : vector<1x672xf32> to vector<1x336xf32>
    %cst_193 = arith.constant 1.000000e+00 : f32
    %555 = vector.broadcast %cst_193 : f32 to vector<1x336xf32>
    %556 = arith.addf %555, %554 : vector<1x336xf32>
    %557 = vector.extract_strided_slice %553 {offsets = [0, 336], sizes = [1, 336], strides = [1, 1]} : vector<1x672xf32> to vector<1x336xf32>
    %558 = vector.shape_cast %0 : vector<1x16x16xf32> to vector<16x16xf32>
    %c0_194 = arith.constant 0 : index
    %c0_195 = arith.constant 0 : index
    %559 = vector.load %arg33[%c0_194, %c0_195] : memref<16x16xbf16, #tpu.memory_space<vmem>>, vector<16x16xbf16>
    %560 = arith.truncf %558 : vector<16x16xf32> to vector<16x16xbf16>
    %cst_196 = arith.constant dense<0.000000e+00> : vector<16x16xf32>
    %561 = tpu.matmul %560, %559, %cst_196 {dimension_numbers = #tpu.dot_dimension_numbers<[1], [0], [0], [1], [0, 0, 1, 1], [], []>} : vector<16x16xbf16>, vector<16x16xbf16>, vector<16x16xf32> -> vector<16x16xf32>
    %c0_197 = arith.constant 0 : index
    %c0_198 = arith.constant 0 : index
    %562 = vector.load %arg34[%c0_197, %c0_198] : memref<1x16xf32, #tpu.memory_space<vmem>>, vector<1x16xf32>
    %563 = vector.broadcast %562 : vector<1x16xf32> to vector<16x16xf32>
    %564 = arith.addf %561, %563 : vector<16x16xf32>
    %565 = vector.shape_cast %564 : vector<16x16xf32> to vector<1x16x16xf32>
    %cst_199 = arith.constant dense<0.000000e+00> : vector<1x16xf32>
    %566 = vector.multi_reduction <add>, %565, %cst_199 [1] : vector<1x16x16xf32> to vector<1x16xf32>
    %567 = vector.shape_cast %566 : vector<1x16xf32> to vector<1x1x16xf32>
    %cst_200 = arith.constant 1.600000e+01 : f32
    %568 = vector.broadcast %cst_200 : f32 to vector<1x1x16xf32>
    %569 = arith.divf %567, %568 : vector<1x1x16xf32>
    %570 = arith.mulf %565, %565 : vector<1x16x16xf32>
    %cst_201 = arith.constant dense<0.000000e+00> : vector<1x16xf32>
    %571 = vector.multi_reduction <add>, %570, %cst_201 [1] : vector<1x16x16xf32> to vector<1x16xf32>
    %572 = vector.shape_cast %571 : vector<1x16xf32> to vector<1x1x16xf32>
    %cst_202 = arith.constant 1.600000e+01 : f32
    %573 = vector.broadcast %cst_202 : f32 to vector<1x1x16xf32>
    %574 = arith.divf %572, %573 : vector<1x1x16xf32>
    %575 = arith.mulf %569, %569 : vector<1x1x16xf32>
    %576 = arith.subf %574, %575 : vector<1x1x16xf32>
    %cst_203 = arith.constant 0.000000e+00 : f32
    %577 = vector.broadcast %cst_203 : f32 to vector<1x1x16xf32>
    %578 = arith.maximumf %576, %577 : vector<1x1x16xf32>
    %579 = vector.broadcast %569 : vector<1x1x16xf32> to vector<1x16x16xf32>
    %580 = arith.subf %565, %579 : vector<1x16x16xf32>
    %cst_204 = arith.constant 9.99999974E-6 : f32
    %581 = vector.broadcast %cst_204 : f32 to vector<1x1x16xf32>
    %582 = arith.addf %578, %581 : vector<1x1x16xf32>
    %583 = math.rsqrt %582 : vector<1x1x16xf32>
    %584 = vector.broadcast %583 : vector<1x1x16xf32> to vector<1x16x16xf32>
    %585 = arith.mulf %580, %584 : vector<1x16x16xf32>
    %586 = vector.extract_strided_slice %556 {offsets = [0, 0], sizes = [1, 16], strides = [1, 1]} : vector<1x336xf32> to vector<1x16xf32>
    %587 = vector.shape_cast %586 : vector<1x16xf32> to vector<1x1x16xf32>
    %588 = vector.extract_strided_slice %557 {offsets = [0, 0], sizes = [1, 16], strides = [1, 1]} : vector<1x336xf32> to vector<1x16xf32>
    %589 = vector.shape_cast %588 : vector<1x16xf32> to vector<1x1x16xf32>
    %590 = vector.broadcast %587 : vector<1x1x16xf32> to vector<1x16x16xf32>
    %591 = arith.mulf %590, %585 : vector<1x16x16xf32>
    %592 = vector.broadcast %589 : vector<1x1x16xf32> to vector<1x16x16xf32>
    %593 = arith.addf %591, %592 : vector<1x16x16xf32>
    %cst_205 = arith.constant 0.000000e+00 : f32
    %594 = vector.broadcast %cst_205 : f32 to vector<1x16x16xf32>
    %595 = arith.cmpf ogt, %593, %594 : vector<1x16x16xf32>
    %cst_206 = arith.constant 2.000000e-01 : f32
    %596 = vector.broadcast %cst_206 : f32 to vector<1x16x16xf32>
    %597 = arith.mulf %596, %593 : vector<1x16x16xf32>
    %598 = arith.select %595, %593, %597 : vector<1x16x16xi1>, vector<1x16x16xf32>
    %599 = vector.shape_cast %598 : vector<1x16x16xf32> to vector<16x16xf32>
    %c0_207 = arith.constant 0 : index
    %c0_208 = arith.constant 0 : index
    %600 = vector.load %arg35[%c0_207, %c0_208] : memref<16x32xbf16, #tpu.memory_space<vmem>>, vector<16x32xbf16>
    %601 = arith.truncf %599 : vector<16x16xf32> to vector<16x16xbf16>
    %cst_209 = arith.constant dense<0.000000e+00> : vector<16x32xf32>
    %602 = tpu.matmul %601, %600, %cst_209 {dimension_numbers = #tpu.dot_dimension_numbers<[1], [0], [0], [1], [0, 0, 1, 1], [], []>} : vector<16x16xbf16>, vector<16x32xbf16>, vector<16x32xf32> -> vector<16x32xf32>
    %c0_210 = arith.constant 0 : index
    %c0_211 = arith.constant 0 : index
    %603 = vector.load %arg36[%c0_210, %c0_211] : memref<1x32xf32, #tpu.memory_space<vmem>>, vector<1x32xf32>
    %604 = vector.broadcast %603 : vector<1x32xf32> to vector<16x32xf32>
    %605 = arith.addf %602, %604 : vector<16x32xf32>
    %606 = vector.shape_cast %605 : vector<16x32xf32> to vector<1x16x32xf32>
    %cst_212 = arith.constant dense<0.000000e+00> : vector<1x32xf32>
    %607 = vector.multi_reduction <add>, %606, %cst_212 [1] : vector<1x16x32xf32> to vector<1x32xf32>
    %608 = vector.shape_cast %607 : vector<1x32xf32> to vector<1x1x32xf32>
    %cst_213 = arith.constant 1.600000e+01 : f32
    %609 = vector.broadcast %cst_213 : f32 to vector<1x1x32xf32>
    %610 = arith.divf %608, %609 : vector<1x1x32xf32>
    %611 = arith.mulf %606, %606 : vector<1x16x32xf32>
    %cst_214 = arith.constant dense<0.000000e+00> : vector<1x32xf32>
    %612 = vector.multi_reduction <add>, %611, %cst_214 [1] : vector<1x16x32xf32> to vector<1x32xf32>
    %613 = vector.shape_cast %612 : vector<1x32xf32> to vector<1x1x32xf32>
    %cst_215 = arith.constant 1.600000e+01 : f32
    %614 = vector.broadcast %cst_215 : f32 to vector<1x1x32xf32>
    %615 = arith.divf %613, %614 : vector<1x1x32xf32>
    %616 = arith.mulf %610, %610 : vector<1x1x32xf32>
    %617 = arith.subf %615, %616 : vector<1x1x32xf32>
    %cst_216 = arith.constant 0.000000e+00 : f32
    %618 = vector.broadcast %cst_216 : f32 to vector<1x1x32xf32>
    %619 = arith.maximumf %617, %618 : vector<1x1x32xf32>
    %620 = vector.broadcast %610 : vector<1x1x32xf32> to vector<1x16x32xf32>
    %621 = arith.subf %606, %620 : vector<1x16x32xf32>
    %cst_217 = arith.constant 9.99999974E-6 : f32
    %622 = vector.broadcast %cst_217 : f32 to vector<1x1x32xf32>
    %623 = arith.addf %619, %622 : vector<1x1x32xf32>
    %624 = math.rsqrt %623 : vector<1x1x32xf32>
    %625 = vector.broadcast %624 : vector<1x1x32xf32> to vector<1x16x32xf32>
    %626 = arith.mulf %621, %625 : vector<1x16x32xf32>
    %627 = vector.extract_strided_slice %556 {offsets = [0, 16], sizes = [1, 32], strides = [1, 1]} : vector<1x336xf32> to vector<1x32xf32>
    %628 = vector.shape_cast %627 : vector<1x32xf32> to vector<1x1x32xf32>
    %629 = vector.extract_strided_slice %557 {offsets = [0, 16], sizes = [1, 32], strides = [1, 1]} : vector<1x336xf32> to vector<1x32xf32>
    %630 = vector.shape_cast %629 : vector<1x32xf32> to vector<1x1x32xf32>
    %631 = vector.broadcast %628 : vector<1x1x32xf32> to vector<1x16x32xf32>
    %632 = arith.mulf %631, %626 : vector<1x16x32xf32>
    %633 = vector.broadcast %630 : vector<1x1x32xf32> to vector<1x16x32xf32>
    %634 = arith.addf %632, %633 : vector<1x16x32xf32>
    %cst_218 = arith.constant 0.000000e+00 : f32
    %635 = vector.broadcast %cst_218 : f32 to vector<1x16x32xf32>
    %636 = arith.cmpf ogt, %634, %635 : vector<1x16x32xf32>
    %cst_219 = arith.constant 2.000000e-01 : f32
    %637 = vector.broadcast %cst_219 : f32 to vector<1x16x32xf32>
    %638 = arith.mulf %637, %634 : vector<1x16x32xf32>
    %639 = arith.select %636, %634, %638 : vector<1x16x32xi1>, vector<1x16x32xf32>
    %640 = vector.shape_cast %639 : vector<1x16x32xf32> to vector<16x32xf32>
    %c0_220 = arith.constant 0 : index
    %c0_221 = arith.constant 0 : index
    %641 = vector.load %arg37[%c0_220, %c0_221] : memref<32x32xbf16, #tpu.memory_space<vmem>>, vector<32x32xbf16>
    %642 = arith.truncf %640 : vector<16x32xf32> to vector<16x32xbf16>
    %cst_222 = arith.constant dense<0.000000e+00> : vector<16x32xf32>
    %643 = tpu.matmul %642, %641, %cst_222 {dimension_numbers = #tpu.dot_dimension_numbers<[1], [0], [0], [1], [0, 0, 1, 1], [], []>} : vector<16x32xbf16>, vector<32x32xbf16>, vector<16x32xf32> -> vector<16x32xf32>
    %c0_223 = arith.constant 0 : index
    %c0_224 = arith.constant 0 : index
    %644 = vector.load %arg38[%c0_223, %c0_224] : memref<1x32xf32, #tpu.memory_space<vmem>>, vector<1x32xf32>
    %645 = vector.broadcast %644 : vector<1x32xf32> to vector<16x32xf32>
    %646 = arith.addf %643, %645 : vector<16x32xf32>
    %647 = vector.shape_cast %646 : vector<16x32xf32> to vector<1x16x32xf32>
    %cst_225 = arith.constant dense<0.000000e+00> : vector<1x32xf32>
    %648 = vector.multi_reduction <add>, %647, %cst_225 [1] : vector<1x16x32xf32> to vector<1x32xf32>
    %649 = vector.shape_cast %648 : vector<1x32xf32> to vector<1x1x32xf32>
    %cst_226 = arith.constant 1.600000e+01 : f32
    %650 = vector.broadcast %cst_226 : f32 to vector<1x1x32xf32>
    %651 = arith.divf %649, %650 : vector<1x1x32xf32>
    %652 = arith.mulf %647, %647 : vector<1x16x32xf32>
    %cst_227 = arith.constant dense<0.000000e+00> : vector<1x32xf32>
    %653 = vector.multi_reduction <add>, %652, %cst_227 [1] : vector<1x16x32xf32> to vector<1x32xf32>
    %654 = vector.shape_cast %653 : vector<1x32xf32> to vector<1x1x32xf32>
    %cst_228 = arith.constant 1.600000e+01 : f32
    %655 = vector.broadcast %cst_228 : f32 to vector<1x1x32xf32>
    %656 = arith.divf %654, %655 : vector<1x1x32xf32>
    %657 = arith.mulf %651, %651 : vector<1x1x32xf32>
    %658 = arith.subf %656, %657 : vector<1x1x32xf32>
    %cst_229 = arith.constant 0.000000e+00 : f32
    %659 = vector.broadcast %cst_229 : f32 to vector<1x1x32xf32>
    %660 = arith.maximumf %658, %659 : vector<1x1x32xf32>
    %661 = vector.broadcast %651 : vector<1x1x32xf32> to vector<1x16x32xf32>
    %662 = arith.subf %647, %661 : vector<1x16x32xf32>
    %cst_230 = arith.constant 9.99999974E-6 : f32
    %663 = vector.broadcast %cst_230 : f32 to vector<1x1x32xf32>
    %664 = arith.addf %660, %663 : vector<1x1x32xf32>
    %665 = math.rsqrt %664 : vector<1x1x32xf32>
    %666 = vector.broadcast %665 : vector<1x1x32xf32> to vector<1x16x32xf32>
    %667 = arith.mulf %662, %666 : vector<1x16x32xf32>
    %668 = vector.extract_strided_slice %556 {offsets = [0, 48], sizes = [1, 32], strides = [1, 1]} : vector<1x336xf32> to vector<1x32xf32>
    %669 = vector.shape_cast %668 : vector<1x32xf32> to vector<1x1x32xf32>
    %670 = vector.extract_strided_slice %557 {offsets = [0, 48], sizes = [1, 32], strides = [1, 1]} : vector<1x336xf32> to vector<1x32xf32>
    %671 = vector.shape_cast %670 : vector<1x32xf32> to vector<1x1x32xf32>
    %672 = vector.broadcast %669 : vector<1x1x32xf32> to vector<1x16x32xf32>
    %673 = arith.mulf %672, %667 : vector<1x16x32xf32>
    %674 = vector.broadcast %671 : vector<1x1x32xf32> to vector<1x16x32xf32>
    %675 = arith.addf %673, %674 : vector<1x16x32xf32>
    %cst_231 = arith.constant 0.000000e+00 : f32
    %676 = vector.broadcast %cst_231 : f32 to vector<1x16x32xf32>
    %677 = arith.cmpf ogt, %675, %676 : vector<1x16x32xf32>
    %cst_232 = arith.constant 2.000000e-01 : f32
    %678 = vector.broadcast %cst_232 : f32 to vector<1x16x32xf32>
    %679 = arith.mulf %678, %675 : vector<1x16x32xf32>
    %680 = arith.select %677, %675, %679 : vector<1x16x32xi1>, vector<1x16x32xf32>
    %681 = vector.shape_cast %680 : vector<1x16x32xf32> to vector<16x32xf32>
    %c0_233 = arith.constant 0 : index
    %c0_234 = arith.constant 0 : index
    %682 = vector.load %arg39[%c0_233, %c0_234] : memref<32x64xbf16, #tpu.memory_space<vmem>>, vector<32x64xbf16>
    %683 = arith.truncf %681 : vector<16x32xf32> to vector<16x32xbf16>
    %cst_235 = arith.constant dense<0.000000e+00> : vector<16x64xf32>
    %684 = tpu.matmul %683, %682, %cst_235 {dimension_numbers = #tpu.dot_dimension_numbers<[1], [0], [0], [1], [0, 0, 1, 1], [], []>} : vector<16x32xbf16>, vector<32x64xbf16>, vector<16x64xf32> -> vector<16x64xf32>
    %c0_236 = arith.constant 0 : index
    %c0_237 = arith.constant 0 : index
    %685 = vector.load %arg40[%c0_236, %c0_237] : memref<1x64xf32, #tpu.memory_space<vmem>>, vector<1x64xf32>
    %686 = vector.broadcast %685 : vector<1x64xf32> to vector<16x64xf32>
    %687 = arith.addf %684, %686 : vector<16x64xf32>
    %688 = vector.shape_cast %687 : vector<16x64xf32> to vector<1x16x64xf32>
    %cst_238 = arith.constant dense<0.000000e+00> : vector<1x64xf32>
    %689 = vector.multi_reduction <add>, %688, %cst_238 [1] : vector<1x16x64xf32> to vector<1x64xf32>
    %690 = vector.shape_cast %689 : vector<1x64xf32> to vector<1x1x64xf32>
    %cst_239 = arith.constant 1.600000e+01 : f32
    %691 = vector.broadcast %cst_239 : f32 to vector<1x1x64xf32>
    %692 = arith.divf %690, %691 : vector<1x1x64xf32>
    %693 = arith.mulf %688, %688 : vector<1x16x64xf32>
    %cst_240 = arith.constant dense<0.000000e+00> : vector<1x64xf32>
    %694 = vector.multi_reduction <add>, %693, %cst_240 [1] : vector<1x16x64xf32> to vector<1x64xf32>
    %695 = vector.shape_cast %694 : vector<1x64xf32> to vector<1x1x64xf32>
    %cst_241 = arith.constant 1.600000e+01 : f32
    %696 = vector.broadcast %cst_241 : f32 to vector<1x1x64xf32>
    %697 = arith.divf %695, %696 : vector<1x1x64xf32>
    %698 = arith.mulf %692, %692 : vector<1x1x64xf32>
    %699 = arith.subf %697, %698 : vector<1x1x64xf32>
    %cst_242 = arith.constant 0.000000e+00 : f32
    %700 = vector.broadcast %cst_242 : f32 to vector<1x1x64xf32>
    %701 = arith.maximumf %699, %700 : vector<1x1x64xf32>
    %702 = vector.broadcast %692 : vector<1x1x64xf32> to vector<1x16x64xf32>
    %703 = arith.subf %688, %702 : vector<1x16x64xf32>
    %cst_243 = arith.constant 9.99999974E-6 : f32
    %704 = vector.broadcast %cst_243 : f32 to vector<1x1x64xf32>
    %705 = arith.addf %701, %704 : vector<1x1x64xf32>
    %706 = math.rsqrt %705 : vector<1x1x64xf32>
    %707 = vector.broadcast %706 : vector<1x1x64xf32> to vector<1x16x64xf32>
    %708 = arith.mulf %703, %707 : vector<1x16x64xf32>
    %709 = vector.extract_strided_slice %556 {offsets = [0, 80], sizes = [1, 64], strides = [1, 1]} : vector<1x336xf32> to vector<1x64xf32>
    %710 = vector.shape_cast %709 : vector<1x64xf32> to vector<1x1x64xf32>
    %711 = vector.extract_strided_slice %557 {offsets = [0, 80], sizes = [1, 64], strides = [1, 1]} : vector<1x336xf32> to vector<1x64xf32>
    %712 = vector.shape_cast %711 : vector<1x64xf32> to vector<1x1x64xf32>
    %713 = vector.broadcast %710 : vector<1x1x64xf32> to vector<1x16x64xf32>
    %714 = arith.mulf %713, %708 : vector<1x16x64xf32>
    %715 = vector.broadcast %712 : vector<1x1x64xf32> to vector<1x16x64xf32>
    %716 = arith.addf %714, %715 : vector<1x16x64xf32>
    %cst_244 = arith.constant 0.000000e+00 : f32
    %717 = vector.broadcast %cst_244 : f32 to vector<1x16x64xf32>
    %718 = arith.cmpf ogt, %716, %717 : vector<1x16x64xf32>
    %cst_245 = arith.constant 2.000000e-01 : f32
    %719 = vector.broadcast %cst_245 : f32 to vector<1x16x64xf32>
    %720 = arith.mulf %719, %716 : vector<1x16x64xf32>
    %721 = arith.select %718, %716, %720 : vector<1x16x64xi1>, vector<1x16x64xf32>
    %722 = vector.shape_cast %721 : vector<1x16x64xf32> to vector<16x64xf32>
    %c0_246 = arith.constant 0 : index
    %c0_247 = arith.constant 0 : index
    %723 = vector.load %arg41[%c0_246, %c0_247] : memref<64x64xbf16, #tpu.memory_space<vmem>>, vector<64x64xbf16>
    %724 = arith.truncf %722 : vector<16x64xf32> to vector<16x64xbf16>
    %cst_248 = arith.constant dense<0.000000e+00> : vector<16x64xf32>
    %725 = tpu.matmul %724, %723, %cst_248 {dimension_numbers = #tpu.dot_dimension_numbers<[1], [0], [0], [1], [0, 0, 1, 1], [], []>} : vector<16x64xbf16>, vector<64x64xbf16>, vector<16x64xf32> -> vector<16x64xf32>
    %c0_249 = arith.constant 0 : index
    %c0_250 = arith.constant 0 : index
    %726 = vector.load %arg42[%c0_249, %c0_250] : memref<1x64xf32, #tpu.memory_space<vmem>>, vector<1x64xf32>
    %727 = vector.broadcast %726 : vector<1x64xf32> to vector<16x64xf32>
    %728 = arith.addf %725, %727 : vector<16x64xf32>
    %729 = vector.shape_cast %728 : vector<16x64xf32> to vector<1x16x64xf32>
    %cst_251 = arith.constant dense<0.000000e+00> : vector<1x64xf32>
    %730 = vector.multi_reduction <add>, %729, %cst_251 [1] : vector<1x16x64xf32> to vector<1x64xf32>
    %731 = vector.shape_cast %730 : vector<1x64xf32> to vector<1x1x64xf32>
    %cst_252 = arith.constant 1.600000e+01 : f32
    %732 = vector.broadcast %cst_252 : f32 to vector<1x1x64xf32>
    %733 = arith.divf %731, %732 : vector<1x1x64xf32>
    %734 = arith.mulf %729, %729 : vector<1x16x64xf32>
    %cst_253 = arith.constant dense<0.000000e+00> : vector<1x64xf32>
    %735 = vector.multi_reduction <add>, %734, %cst_253 [1] : vector<1x16x64xf32> to vector<1x64xf32>
    %736 = vector.shape_cast %735 : vector<1x64xf32> to vector<1x1x64xf32>
    %cst_254 = arith.constant 1.600000e+01 : f32
    %737 = vector.broadcast %cst_254 : f32 to vector<1x1x64xf32>
    %738 = arith.divf %736, %737 : vector<1x1x64xf32>
    %739 = arith.mulf %733, %733 : vector<1x1x64xf32>
    %740 = arith.subf %738, %739 : vector<1x1x64xf32>
    %cst_255 = arith.constant 0.000000e+00 : f32
    %741 = vector.broadcast %cst_255 : f32 to vector<1x1x64xf32>
    %742 = arith.maximumf %740, %741 : vector<1x1x64xf32>
    %743 = vector.broadcast %733 : vector<1x1x64xf32> to vector<1x16x64xf32>
    %744 = arith.subf %729, %743 : vector<1x16x64xf32>
    %cst_256 = arith.constant 9.99999974E-6 : f32
    %745 = vector.broadcast %cst_256 : f32 to vector<1x1x64xf32>
    %746 = arith.addf %742, %745 : vector<1x1x64xf32>
    %747 = math.rsqrt %746 : vector<1x1x64xf32>
    %748 = vector.broadcast %747 : vector<1x1x64xf32> to vector<1x16x64xf32>
    %749 = arith.mulf %744, %748 : vector<1x16x64xf32>
    %750 = vector.extract_strided_slice %556 {offsets = [0, 144], sizes = [1, 64], strides = [1, 1]} : vector<1x336xf32> to vector<1x64xf32>
    %751 = vector.shape_cast %750 : vector<1x64xf32> to vector<1x1x64xf32>
    %752 = vector.extract_strided_slice %557 {offsets = [0, 144], sizes = [1, 64], strides = [1, 1]} : vector<1x336xf32> to vector<1x64xf32>
    %753 = vector.shape_cast %752 : vector<1x64xf32> to vector<1x1x64xf32>
    %754 = vector.broadcast %751 : vector<1x1x64xf32> to vector<1x16x64xf32>
    %755 = arith.mulf %754, %749 : vector<1x16x64xf32>
    %756 = vector.broadcast %753 : vector<1x1x64xf32> to vector<1x16x64xf32>
    %757 = arith.addf %755, %756 : vector<1x16x64xf32>
    %cst_257 = arith.constant 0.000000e+00 : f32
    %758 = vector.broadcast %cst_257 : f32 to vector<1x16x64xf32>
    %759 = arith.cmpf ogt, %757, %758 : vector<1x16x64xf32>
    %cst_258 = arith.constant 2.000000e-01 : f32
    %760 = vector.broadcast %cst_258 : f32 to vector<1x16x64xf32>
    %761 = arith.mulf %760, %757 : vector<1x16x64xf32>
    %762 = arith.select %759, %757, %761 : vector<1x16x64xi1>, vector<1x16x64xf32>
    %763 = vector.shape_cast %762 : vector<1x16x64xf32> to vector<16x64xf32>
    %c0_259 = arith.constant 0 : index
    %c0_260 = arith.constant 0 : index
    %764 = vector.load %arg43[%c0_259, %c0_260] : memref<64x128xbf16, #tpu.memory_space<vmem>>, vector<64x128xbf16>
    %765 = arith.truncf %763 : vector<16x64xf32> to vector<16x64xbf16>
    %cst_261 = arith.constant dense<0.000000e+00> : vector<16x128xf32>
    %766 = tpu.matmul %765, %764, %cst_261 {dimension_numbers = #tpu.dot_dimension_numbers<[1], [0], [0], [1], [0, 0, 1, 1], [], []>} : vector<16x64xbf16>, vector<64x128xbf16>, vector<16x128xf32> -> vector<16x128xf32>
    %c0_262 = arith.constant 0 : index
    %c0_263 = arith.constant 0 : index
    %767 = vector.load %arg44[%c0_262, %c0_263] : memref<1x128xf32, #tpu.memory_space<vmem>>, vector<1x128xf32>
    %768 = vector.broadcast %767 : vector<1x128xf32> to vector<16x128xf32>
    %769 = arith.addf %766, %768 : vector<16x128xf32>
    %770 = vector.shape_cast %769 : vector<16x128xf32> to vector<1x16x128xf32>
    %cst_264 = arith.constant dense<0.000000e+00> : vector<1x128xf32>
    %771 = vector.multi_reduction <add>, %770, %cst_264 [1] : vector<1x16x128xf32> to vector<1x128xf32>
    %772 = vector.shape_cast %771 : vector<1x128xf32> to vector<1x1x128xf32>
    %cst_265 = arith.constant 1.600000e+01 : f32
    %773 = vector.broadcast %cst_265 : f32 to vector<1x1x128xf32>
    %774 = arith.divf %772, %773 : vector<1x1x128xf32>
    %775 = arith.mulf %770, %770 : vector<1x16x128xf32>
    %cst_266 = arith.constant dense<0.000000e+00> : vector<1x128xf32>
    %776 = vector.multi_reduction <add>, %775, %cst_266 [1] : vector<1x16x128xf32> to vector<1x128xf32>
    %777 = vector.shape_cast %776 : vector<1x128xf32> to vector<1x1x128xf32>
    %cst_267 = arith.constant 1.600000e+01 : f32
    %778 = vector.broadcast %cst_267 : f32 to vector<1x1x128xf32>
    %779 = arith.divf %777, %778 : vector<1x1x128xf32>
    %780 = arith.mulf %774, %774 : vector<1x1x128xf32>
    %781 = arith.subf %779, %780 : vector<1x1x128xf32>
    %cst_268 = arith.constant 0.000000e+00 : f32
    %782 = vector.broadcast %cst_268 : f32 to vector<1x1x128xf32>
    %783 = arith.maximumf %781, %782 : vector<1x1x128xf32>
    %784 = vector.broadcast %774 : vector<1x1x128xf32> to vector<1x16x128xf32>
    %785 = arith.subf %770, %784 : vector<1x16x128xf32>
    %cst_269 = arith.constant 9.99999974E-6 : f32
    %786 = vector.broadcast %cst_269 : f32 to vector<1x1x128xf32>
    %787 = arith.addf %783, %786 : vector<1x1x128xf32>
    %788 = math.rsqrt %787 : vector<1x1x128xf32>
    %789 = vector.broadcast %788 : vector<1x1x128xf32> to vector<1x16x128xf32>
    %790 = arith.mulf %785, %789 : vector<1x16x128xf32>
    %791 = vector.extract_strided_slice %556 {offsets = [0, 208], sizes = [1, 128], strides = [1, 1]} : vector<1x336xf32> to vector<1x128xf32>
    %792 = vector.shape_cast %791 : vector<1x128xf32> to vector<1x1x128xf32>
    %793 = vector.extract_strided_slice %557 {offsets = [0, 208], sizes = [1, 128], strides = [1, 1]} : vector<1x336xf32> to vector<1x128xf32>
    %794 = vector.shape_cast %793 : vector<1x128xf32> to vector<1x1x128xf32>
    %795 = vector.broadcast %792 : vector<1x1x128xf32> to vector<1x16x128xf32>
    %796 = arith.mulf %795, %790 : vector<1x16x128xf32>
    %797 = vector.broadcast %794 : vector<1x1x128xf32> to vector<1x16x128xf32>
    %798 = arith.addf %796, %797 : vector<1x16x128xf32>
    %cst_270 = arith.constant 0.000000e+00 : f32
    %799 = vector.broadcast %cst_270 : f32 to vector<1x16x128xf32>
    %800 = arith.cmpf ogt, %798, %799 : vector<1x16x128xf32>
    %cst_271 = arith.constant 2.000000e-01 : f32
    %801 = vector.broadcast %cst_271 : f32 to vector<1x16x128xf32>
    %802 = arith.mulf %801, %798 : vector<1x16x128xf32>
    %803 = arith.select %800, %798, %802 : vector<1x16x128xi1>, vector<1x16x128xf32>
    %804 = arith.truncf %548 : vector<1x16x128xf32> to vector<1x16x128xbf16>
    %805 = arith.truncf %803 : vector<1x16x128xf32> to vector<1x16x128xbf16>
    "tpu.trace_start"() <{level = 10 : i32, message = "bnf,bmf->bnm"}> : () -> ()
    %cst_272 = arith.constant dense<0.000000e+00> : vector<1x16x16xf32>
    %806 = tpu.matmul %804, %805, %cst_272 {dimension_numbers = #tpu.dot_dimension_numbers<[2], [2], [1], [1], [0, 0, 0, 1, 1, 1], [0], [0]>} : vector<1x16x128xbf16>, vector<1x16x128xbf16>, vector<1x16x16xf32> -> vector<1x16x16xf32>
    "tpu.trace_stop"() : () -> ()
    %807 = arith.truncf %293 : vector<1x16x16xf32> to vector<1x16x16xbf16>
    %808 = arith.truncf %806 : vector<1x16x16xf32> to vector<1x16x16xbf16>
    "tpu.trace_start"() <{level = 10 : i32, message = "bji,bjf->bif"}> : () -> ()
    %cst_273 = arith.constant dense<0.000000e+00> : vector<1x16x16xf32>
    %809 = tpu.matmul %807, %808, %cst_273 {dimension_numbers = #tpu.dot_dimension_numbers<[1], [1], [2], [2], [0, 0, 0, 2, 1, 2], [0], [0]>} : vector<1x16x16xbf16>, vector<1x16x16xbf16>, vector<1x16x16xf32> -> vector<1x16x16xf32>
    "tpu.trace_stop"() : () -> ()
    %810 = tpu.concatenate %806, %809 in 2 : vector<1x16x16xf32>, vector<1x16x16xf32> -> vector<1x16x32xf32>
    %811 = vector.shape_cast %810 : vector<1x16x32xf32> to vector<16x32xf32>
    %c0_274 = arith.constant 0 : index
    %c0_275 = arith.constant 0 : index
    %812 = vector.load %arg46[%c0_274, %c0_275] : memref<32x16xbf16, #tpu.memory_space<vmem>>, vector<32x16xbf16>
    %813 = arith.truncf %811 : vector<16x32xf32> to vector<16x32xbf16>
    %cst_276 = arith.constant dense<0.000000e+00> : vector<16x16xf32>
    %814 = tpu.matmul %813, %812, %cst_276 {dimension_numbers = #tpu.dot_dimension_numbers<[1], [0], [0], [1], [0, 0, 1, 1], [], []>} : vector<16x32xbf16>, vector<32x16xbf16>, vector<16x16xf32> -> vector<16x16xf32>
    %c0_277 = arith.constant 0 : index
    %c0_278 = arith.constant 0 : index
    %815 = vector.load %arg47[%c0_277, %c0_278] : memref<1x16xf32, #tpu.memory_space<vmem>>, vector<1x16xf32>
    %816 = vector.broadcast %815 : vector<1x16xf32> to vector<16x16xf32>
    %817 = arith.addf %814, %816 : vector<16x16xf32>
    %c0_279 = arith.constant 0 : index
    %c0_280 = arith.constant 0 : index
    %818 = vector.load %arg48[%c0_279, %c0_280] : memref<1x16xf32, #tpu.memory_space<vmem>>, vector<1x16xf32>
    %819 = vector.broadcast %818 : vector<1x16xf32> to vector<16x16xf32>
    %820 = arith.mulf %817, %819 : vector<16x16xf32>
    %c0_281 = arith.constant 0 : index
    %c0_282 = arith.constant 0 : index
    %821 = vector.load %arg49[%c0_281, %c0_282] : memref<1x16xf32, #tpu.memory_space<vmem>>, vector<1x16xf32>
    %822 = vector.broadcast %821 : vector<1x16xf32> to vector<16x16xf32>
    %823 = arith.addf %820, %822 : vector<16x16xf32>
    %cst_283 = arith.constant 0.000000e+00 : f32
    %824 = vector.broadcast %cst_283 : f32 to vector<16x16xf32>
    %825 = arith.cmpf ogt, %823, %824 : vector<16x16xf32>
    %cst_284 = arith.constant 2.000000e-01 : f32
    %826 = vector.broadcast %cst_284 : f32 to vector<16x16xf32>
    %827 = arith.mulf %826, %823 : vector<16x16xf32>
    %828 = arith.select %825, %823, %827 : vector<16x16xi1>, vector<16x16xf32>
    %829 = vector.shape_cast %828 : vector<16x16xf32> to vector<1x16x16xf32>
    %830 = arith.truncf %293 : vector<1x16x16xf32> to vector<1x16x16xbf16>
    %831 = arith.truncf %829 : vector<1x16x16xf32> to vector<1x16x16xbf16>
    "tpu.trace_start"() <{level = 10 : i32, message = "bji,bjf->bif"}> : () -> ()
    %cst_285 = arith.constant dense<0.000000e+00> : vector<1x16x16xf32>
    %832 = tpu.matmul %830, %831, %cst_285 {dimension_numbers = #tpu.dot_dimension_numbers<[1], [1], [2], [2], [0, 0, 0, 2, 1, 2], [0], [0]>} : vector<1x16x16xbf16>, vector<1x16x16xbf16>, vector<1x16x16xf32> -> vector<1x16x16xf32>
    "tpu.trace_stop"() : () -> ()
    %833 = tpu.concatenate %829, %832 in 2 : vector<1x16x16xf32>, vector<1x16x16xf32> -> vector<1x16x32xf32>
    %834 = vector.shape_cast %833 : vector<1x16x32xf32> to vector<16x32xf32>
    %c0_286 = arith.constant 0 : index
    %c0_287 = arith.constant 0 : index
    %835 = vector.load %arg50[%c0_286, %c0_287] : memref<32x128xbf16, #tpu.memory_space<vmem>>, vector<32x128xbf16>
    %836 = arith.truncf %834 : vector<16x32xf32> to vector<16x32xbf16>
    %cst_288 = arith.constant dense<0.000000e+00> : vector<16x128xf32>
    %837 = tpu.matmul %836, %835, %cst_288 {dimension_numbers = #tpu.dot_dimension_numbers<[1], [0], [0], [1], [0, 0, 1, 1], [], []>} : vector<16x32xbf16>, vector<32x128xbf16>, vector<16x128xf32> -> vector<16x128xf32>
    %c0_289 = arith.constant 0 : index
    %c0_290 = arith.constant 0 : index
    %838 = vector.load %arg51[%c0_289, %c0_290] : memref<1x128xf32, #tpu.memory_space<vmem>>, vector<1x128xf32>
    %839 = vector.broadcast %838 : vector<1x128xf32> to vector<16x128xf32>
    %840 = arith.addf %837, %839 : vector<16x128xf32>
    %c0_291 = arith.constant 0 : index
    %c0_292 = arith.constant 0 : index
    %841 = vector.load %arg52[%c0_291, %c0_292] : memref<1x128xf32, #tpu.memory_space<vmem>>, vector<1x128xf32>
    %842 = vector.broadcast %841 : vector<1x128xf32> to vector<16x128xf32>
    %843 = arith.mulf %840, %842 : vector<16x128xf32>
    %c0_293 = arith.constant 0 : index
    %c0_294 = arith.constant 0 : index
    %844 = vector.load %arg53[%c0_293, %c0_294] : memref<1x128xf32, #tpu.memory_space<vmem>>, vector<1x128xf32>
    %845 = vector.broadcast %844 : vector<1x128xf32> to vector<16x128xf32>
    %846 = arith.addf %843, %845 : vector<16x128xf32>
    %cst_295 = arith.constant 0.000000e+00 : f32
    %847 = vector.broadcast %cst_295 : f32 to vector<16x128xf32>
    %848 = arith.cmpf ogt, %846, %847 : vector<16x128xf32>
    %cst_296 = arith.constant 2.000000e-01 : f32
    %849 = vector.broadcast %cst_296 : f32 to vector<16x128xf32>
    %850 = arith.mulf %849, %846 : vector<16x128xf32>
    %851 = arith.select %848, %846, %850 : vector<16x128xi1>, vector<16x128xf32>
    %852 = vector.shape_cast %851 : vector<16x128xf32> to vector<1x16x128xf32>
    %c0_297 = arith.constant 0 : index
    %c0_298 = arith.constant 0 : index
    %c0_299 = arith.constant 0 : index
    %853 = vector.load %arg54[%c0_297, %c0_298, %c0_299] : memref<1x16x16xf32, #tpu.memory_space<vmem>>, vector<1x16x16xf32>
    tpu.vector_store %arg54[%c0_297, %c0_298, %c0_299], %267 {strides = array<i32>} : memref<1x16x16xf32, #tpu.memory_space<vmem>>, vector<1x16x16xf32>,
    %c0_300 = arith.constant 0 : index
    %c0_301 = arith.constant 0 : index
    %c0_302 = arith.constant 0 : index
    %854 = vector.load %arg55[%c0_300, %c0_301, %c0_302] : memref<1x16x128xf32, #tpu.memory_space<vmem>>, vector<1x16x128xf32>
    tpu.vector_store %arg55[%c0_300, %c0_301, %c0_302], %852 {strides = array<i32>} : memref<1x16x128xf32, #tpu.memory_space<vmem>>, vector<1x16x128xf32>,
    return
  }
  func.func @transform_0(%arg0: i32) -> (i32, i32, i32) {
    %c0_i32 = arith.constant 0 : i32
    %c0_i32_0 = arith.constant 0 : i32
    %c0_i32_1 = arith.constant 0 : i32
    return %arg0, %c0_i32, %c0_i32_0 : i32, i32, i32
  }
  func.func @transform_1(%arg0: i32) -> (i32, i32, i32) {
    %c0_i32 = arith.constant 0 : i32
    %c0_i32_0 = arith.constant 0 : i32
    %c0_i32_1 = arith.constant 0 : i32
    return %arg0, %c0_i32, %c0_i32_0 : i32, i32, i32
  }
  func.func @transform_2(%arg0: i32) -> (i32, i32, i32) {
    %c0_i32 = arith.constant 0 : i32
    %c0_i32_0 = arith.constant 0 : i32
    %c0_i32_1 = arith.constant 0 : i32
    return %arg0, %c0_i32, %c0_i32_0 : i32, i32, i32
  }
  func.func @transform_3(%arg0: i32) -> (i32, i32, i32) {
    %c0_i32 = arith.constant 0 : i32
    %c0_i32_0 = arith.constant 0 : i32
    %c0_i32_1 = arith.constant 0 : i32
    return %arg0, %c0_i32, %c0_i32_0 : i32, i32, i32
  }
  func.func @transform_4(%arg0: i32) -> (i32, i32, i32) {
    %c0_i32 = arith.constant 0 : i32
    %c0_i32_0 = arith.constant 0 : i32
    %c0_i32_1 = arith.constant 0 : i32
    return %arg0, %c0_i32, %c0_i32_0 : i32, i32, i32
  }
  func.func @transform_5(%arg0: i32) -> (i32, i32) {
    %c0_i32 = arith.constant 0 : i32
    %c0_i32_0 = arith.constant 0 : i32
    %c0_i32_1 = arith.constant 0 : i32
    return %c0_i32, %c0_i32_0 : i32, i32
  }
  func.func @transform_6(%arg0: i32) -> (i32, i32) {
    %c0_i32 = arith.constant 0 : i32
    %c0_i32_0 = arith.constant 0 : i32
    %c0_i32_1 = arith.constant 0 : i32
    return %c0_i32, %c0_i32_0 : i32, i32
  }
  func.func @transform_7(%arg0: i32) -> (i32, i32) {
    %c0_i32 = arith.constant 0 : i32
    %c0_i32_0 = arith.constant 0 : i32
    %c0_i32_1 = arith.constant 0 : i32
    return %c0_i32, %c0_i32_0 : i32, i32
  }
  func.func @transform_8(%arg0: i32) -> (i32, i32) {
    %c0_i32 = arith.constant 0 : i32
    %c0_i32_0 = arith.constant 0 : i32
    %c0_i32_1 = arith.constant 0 : i32
    return %c0_i32, %c0_i32_0 : i32, i32
  }
  func.func @transform_9(%arg0: i32) -> (i32, i32) {
    %c0_i32 = arith.constant 0 : i32
    %c0_i32_0 = arith.constant 0 : i32
    %c0_i32_1 = arith.constant 0 : i32
    return %c0_i32, %c0_i32_0 : i32, i32
  }
  func.func @transform_10(%arg0: i32) -> (i32, i32) {
    %c0_i32 = arith.constant 0 : i32
    %c0_i32_0 = arith.constant 0 : i32
    %c0_i32_1 = arith.constant 0 : i32
    return %c0_i32, %c0_i32_0 : i32, i32
  }
  func.func @transform_11(%arg0: i32) -> (i32, i32) {
    %c0_i32 = arith.constant 0 : i32
    %c0_i32_0 = arith.constant 0 : i32
    %c0_i32_1 = arith.constant 0 : i32
    return %c0_i32, %c0_i32_0 : i32, i32
  }
  func.func @transform_12(%arg0: i32) -> (i32, i32) {
    %c0_i32 = arith.constant 0 : i32
    %c0_i32_0 = arith.constant 0 : i32
    %c0_i32_1 = arith.constant 0 : i32
    return %c0_i32, %c0_i32_0 : i32, i32
  }
  func.func @transform_13(%arg0: i32) -> (i32, i32) {
    %c0_i32 = arith.constant 0 : i32
    %c0_i32_0 = arith.constant 0 : i32
    %c0_i32_1 = arith.constant 0 : i32
    return %c0_i32, %c0_i32_0 : i32, i32
  }
  func.func @transform_14(%arg0: i32) -> (i32, i32) {
    %c0_i32 = arith.constant 0 : i32
    %c0_i32_0 = arith.constant 0 : i32
    %c0_i32_1 = arith.constant 0 : i32
    return %c0_i32, %c0_i32_0 : i32, i32
  }
  func.func @transform_15(%arg0: i32) -> (i32, i32) {
    %c0_i32 = arith.constant 0 : i32
    %c0_i32_0 = arith.constant 0 : i32
    %c0_i32_1 = arith.constant 0 : i32
    return %c0_i32, %c0_i32_0 : i32, i32
  }
  func.func @transform_16(%arg0: i32) -> (i32, i32) {
    %c0_i32 = arith.constant 0 : i32
    %c0_i32_0 = arith.constant 0 : i32
    %c0_i32_1 = arith.constant 0 : i32
    return %c0_i32, %c0_i32_0 : i32, i32
  }
  func.func @transform_17(%arg0: i32) -> (i32, i32) {
    %c0_i32 = arith.constant 0 : i32
    %c0_i32_0 = arith.constant 0 : i32
    %c0_i32_1 = arith.constant 0 : i32
    return %c0_i32, %c0_i32_0 : i32, i32
  }
  func.func @transform_18(%arg0: i32) -> (i32, i32) {
    %c0_i32 = arith.constant 0 : i32
    %c0_i32_0 = arith.constant 0 : i32
    %c0_i32_1 = arith.constant 0 : i32
    return %c0_i32, %c0_i32_0 : i32, i32
  }
  func.func @transform_19(%arg0: i32) -> (i32, i32) {
    %c0_i32 = arith.constant 0 : i32
    %c0_i32_0 = arith.constant 0 : i32
    %c0_i32_1 = arith.constant 0 : i32
    return %c0_i32, %c0_i32_0 : i32, i32
  }
  func.func @transform_20(%arg0: i32) -> (i32, i32) {
    %c0_i32 = arith.constant 0 : i32
    %c0_i32_0 = arith.constant 0 : i32
    %c0_i32_1 = arith.constant 0 : i32
    return %c0_i32, %c0_i32_0 : i32, i32
  }
  func.func @transform_21(%arg0: i32) -> (i32, i32) {
    %c0_i32 = arith.constant 0 : i32
    %c0_i32_0 = arith.constant 0 : i32
    %c0_i32_1 = arith.constant 0 : i32
    return %c0_i32, %c0_i32_0 : i32, i32
  }
  func.func @transform_22(%arg0: i32) -> (i32, i32) {
    %c0_i32 = arith.constant 0 : i32
    %c0_i32_0 = arith.constant 0 : i32
    %c0_i32_1 = arith.constant 0 : i32
    return %c0_i32, %c0_i32_0 : i32, i32
  }
  func.func @transform_23(%arg0: i32) -> (i32, i32) {
    %c0_i32 = arith.constant 0 : i32
    %c0_i32_0 = arith.constant 0 : i32
    %c0_i32_1 = arith.constant 0 : i32
    return %c0_i32, %c0_i32_0 : i32, i32
  }
  func.func @transform_24(%arg0: i32) -> (i32, i32) {
    %c0_i32 = arith.constant 0 : i32
    %c0_i32_0 = arith.constant 0 : i32
    %c0_i32_1 = arith.constant 0 : i32
    return %c0_i32, %c0_i32_0 : i32, i32
  }
  func.func @transform_25(%arg0: i32) -> (i32, i32) {
    %c0_i32 = arith.constant 0 : i32
    %c0_i32_0 = arith.constant 0 : i32
    %c0_i32_1 = arith.constant 0 : i32
    return %c0_i32, %c0_i32_0 : i32, i32
  }
  func.func @transform_26(%arg0: i32) -> (i32, i32) {
    %c0_i32 = arith.constant 0 : i32
    %c0_i32_0 = arith.constant 0 : i32
    %c0_i32_1 = arith.constant 0 : i32
    return %c0_i32, %c0_i32_0 : i32, i32
  }
  func.func @transform_27(%arg0: i32) -> (i32, i32) {
    %c0_i32 = arith.constant 0 : i32
    %c0_i32_0 = arith.constant 0 : i32
    %c0_i32_1 = arith.constant 0 : i32
    return %c0_i32, %c0_i32_0 : i32, i32
  }
  func.func @transform_28(%arg0: i32) -> (i32, i32) {
    %c0_i32 = arith.constant 0 : i32
    %c0_i32_0 = arith.constant 0 : i32
    %c0_i32_1 = arith.constant 0 : i32
    return %c0_i32, %c0_i32_0 : i32, i32
  }
  func.func @transform_29(%arg0: i32) -> (i32, i32) {
    %c0_i32 = arith.constant 0 : i32
    %c0_i32_0 = arith.constant 0 : i32
    %c0_i32_1 = arith.constant 0 : i32
    return %c0_i32, %c0_i32_0 : i32, i32
  }
  func.func @transform_30(%arg0: i32) -> (i32, i32) {
    %c0_i32 = arith.constant 0 : i32
    %c0_i32_0 = arith.constant 0 : i32
    %c0_i32_1 = arith.constant 0 : i32
    return %c0_i32, %c0_i32_0 : i32, i32
  }
  func.func @transform_31(%arg0: i32) -> (i32, i32) {
    %c0_i32 = arith.constant 0 : i32
    %c0_i32_0 = arith.constant 0 : i32
    %c0_i32_1 = arith.constant 0 : i32
    return %c0_i32, %c0_i32_0 : i32, i32
  }
  func.func @transform_32(%arg0: i32) -> (i32, i32) {
    %c0_i32 = arith.constant 0 : i32
    %c0_i32_0 = arith.constant 0 : i32
    %c0_i32_1 = arith.constant 0 : i32
    return %c0_i32, %c0_i32_0 : i32, i32
  }
  func.func @transform_33(%arg0: i32) -> (i32, i32) {
    %c0_i32 = arith.constant 0 : i32
    %c0_i32_0 = arith.constant 0 : i32
    %c0_i32_1 = arith.constant 0 : i32
    return %c0_i32, %c0_i32_0 : i32, i32
  }
  func.func @transform_34(%arg0: i32) -> (i32, i32) {
    %c0_i32 = arith.constant 0 : i32
    %c0_i32_0 = arith.constant 0 : i32
    %c0_i32_1 = arith.constant 0 : i32
    return %c0_i32, %c0_i32_0 : i32, i32
  }
  func.func @transform_35(%arg0: i32) -> (i32, i32) {
    %c0_i32 = arith.constant 0 : i32
    %c0_i32_0 = arith.constant 0 : i32
    %c0_i32_1 = arith.constant 0 : i32
    return %c0_i32, %c0_i32_0 : i32, i32
  }
  func.func @transform_36(%arg0: i32) -> (i32, i32) {
    %c0_i32 = arith.constant 0 : i32
    %c0_i32_0 = arith.constant 0 : i32
    %c0_i32_1 = arith.constant 0 : i32
    return %c0_i32, %c0_i32_0 : i32, i32
  }
  func.func @transform_37(%arg0: i32) -> (i32, i32) {
    %c0_i32 = arith.constant 0 : i32
    %c0_i32_0 = arith.constant 0 : i32
    %c0_i32_1 = arith.constant 0 : i32
    return %c0_i32, %c0_i32_0 : i32, i32
  }
  func.func @transform_38(%arg0: i32) -> (i32, i32) {
    %c0_i32 = arith.constant 0 : i32
    %c0_i32_0 = arith.constant 0 : i32
    %c0_i32_1 = arith.constant 0 : i32
    return %c0_i32, %c0_i32_0 : i32, i32
  }
  func.func @transform_39(%arg0: i32) -> (i32, i32) {
    %c0_i32 = arith.constant 0 : i32
    %c0_i32_0 = arith.constant 0 : i32
    %c0_i32_1 = arith.constant 0 : i32
    return %c0_i32, %c0_i32_0 : i32, i32
  }
  func.func @transform_40(%arg0: i32) -> (i32, i32) {
    %c0_i32 = arith.constant 0 : i32
    %c0_i32_0 = arith.constant 0 : i32
    %c0_i32_1 = arith.constant 0 : i32
    return %c0_i32, %c0_i32_0 : i32, i32
  }
  func.func @transform_41(%arg0: i32) -> (i32, i32) {
    %c0_i32 = arith.constant 0 : i32
    %c0_i32_0 = arith.constant 0 : i32
    %c0_i32_1 = arith.constant 0 : i32
    return %c0_i32, %c0_i32_0 : i32, i32
  }
  func.func @transform_42(%arg0: i32) -> (i32, i32) {
    %c0_i32 = arith.constant 0 : i32
    %c0_i32_0 = arith.constant 0 : i32
    %c0_i32_1 = arith.constant 0 : i32
    return %c0_i32, %c0_i32_0 : i32, i32
  }
  func.func @transform_43(%arg0: i32) -> (i32, i32) {
    %c0_i32 = arith.constant 0 : i32
    %c0_i32_0 = arith.constant 0 : i32
    %c0_i32_1 = arith.constant 0 : i32
    return %c0_i32, %c0_i32_0 : i32, i32
  }
  func.func @transform_44(%arg0: i32) -> (i32, i32) {
    %c0_i32 = arith.constant 0 : i32
    %c0_i32_0 = arith.constant 0 : i32
    %c0_i32_1 = arith.constant 0 : i32
    return %c0_i32, %c0_i32_0 : i32, i32
  }
  func.func @transform_45(%arg0: i32) -> (i32, i32) {
    %c0_i32 = arith.constant 0 : i32
    %c0_i32_0 = arith.constant 0 : i32
    %c0_i32_1 = arith.constant 0 : i32
    return %c0_i32, %c0_i32_0 : i32, i32
  }
  func.func @transform_46(%arg0: i32) -> (i32, i32) {
    %c0_i32 = arith.constant 0 : i32
    %c0_i32_0 = arith.constant 0 : i32
    %c0_i32_1 = arith.constant 0 : i32
    return %c0_i32, %c0_i32_0 : i32, i32
  }
  func.func @transform_47(%arg0: i32) -> (i32, i32) {
    %c0_i32 = arith.constant 0 : i32
    %c0_i32_0 = arith.constant 0 : i32
    %c0_i32_1 = arith.constant 0 : i32
    return %c0_i32, %c0_i32_0 : i32, i32
  }
  func.func @transform_48(%arg0: i32) -> (i32, i32) {
    %c0_i32 = arith.constant 0 : i32
    %c0_i32_0 = arith.constant 0 : i32
    %c0_i32_1 = arith.constant 0 : i32
    return %c0_i32, %c0_i32_0 : i32, i32
  }
  func.func @transform_49(%arg0: i32) -> (i32, i32) {
    %c0_i32 = arith.constant 0 : i32
    %c0_i32_0 = arith.constant 0 : i32
    %c0_i32_1 = arith.constant 0 : i32
    return %c0_i32, %c0_i32_0 : i32, i32
  }
  func.func @transform_50(%arg0: i32) -> (i32, i32) {
    %c0_i32 = arith.constant 0 : i32
    %c0_i32_0 = arith.constant 0 : i32
    %c0_i32_1 = arith.constant 0 : i32
    return %c0_i32, %c0_i32_0 : i32, i32
  }
  func.func @transform_51(%arg0: i32) -> (i32, i32) {
    %c0_i32 = arith.constant 0 : i32
    %c0_i32_0 = arith.constant 0 : i32
    %c0_i32_1 = arith.constant 0 : i32
    return %c0_i32, %c0_i32_0 : i32, i32
  }
  func.func @transform_52(%arg0: i32) -> (i32, i32) {
    %c0_i32 = arith.constant 0 : i32
    %c0_i32_0 = arith.constant 0 : i32
    %c0_i32_1 = arith.constant 0 : i32
    return %c0_i32, %c0_i32_0 : i32, i32
  }
  func.func @transform_53(%arg0: i32) -> (i32, i32, i32) {
    %c0_i32 = arith.constant 0 : i32
    %c0_i32_0 = arith.constant 0 : i32
    %c0_i32_1 = arith.constant 0 : i32
    return %arg0, %c0_i32, %c0_i32_0 : i32, i32, i32
  }
  func.func @transform_54(%arg0: i32) -> (i32, i32, i32) {
    %c0_i32 = arith.constant 0 : i32
    %c0_i32_0 = arith.constant 0 : i32
    %c0_i32_1 = arith.constant 0 : i32
    return %arg0, %c0_i32, %c0_i32_0 : i32, i32, i32
  }
}

</mosaic_0001>

<bundles_post_ra>
// kernel: decoder20_forward.1
= control target key start
LH: loop header
LB: loop body
LE: loop exit
PB: predicated region body
PF: predicated region fallthrough
CT: control target
= control target key end

     0   :  { %s6048_s6 = smov 1   ;;  %s6049_s10 = smov 2   ;;  %s7180_s0 = inlined_call_operand.smem [shape: u32[55], index: -1, kind: input, shape index: {}] }
   0x1   :  { %s6123_s5 = sld [smem:[%s7180_s0]]   ;;  %s6050_s14 = smov 3  }
   0x2   :  { %s6128_s9 = sld [smem:[%s7180_s0 + %s6048_s6]]   ;;  %s6051_s18 = smov 4  }
   0x3   :  { %s6133_s13 = sld [smem:[%s7180_s0 + %s6049_s10]]   ;;  %s6052_s22 = smov 5  }
   0x4   :  { %s6138_s17 = sld [smem:[%s7180_s0 + %s6050_s14]]   ;;  %s6053_s26 = smov 6  }
   0x5   :  { %s6143_s21 = sld [smem:[%s7180_s0 + %s6051_s18]]   ;;  %s6054_s30 = smov 7  }
   0x6   :  { %s6148_s25 = sld [smem:[%s7180_s0 + %s6052_s22]]   ;;  %s6055_s4 = smov 8  }
   0x7   :  { %7224 = sst [smem:[#allocation8_spill]] %s6123_s5  ;;  %s6056_s10 = smov 9  }
   0x8   :  { %7225 = sst [smem:[#allocation9_spill]] %s6128_s9  ;;  %s6057_s15 = smov 10  }
   0x9   :  { %7226 = sst [smem:[#allocation10_spill]] %s6133_s13  ;;  %s6058_s20 = smov 11  }
   0xa   :  { %7227 = sst [smem:[#allocation11_spill]] %s6138_s17  ;;  %s6060_s1 = smov 13  }
   0xb   :  { %7228 = sst [smem:[#allocation12_spill]] %s6143_s21  ;;  %s6061_s7 = smov 14  }
   0xc   :  { %s6153_s29 = sld [smem:[%s7180_s0 + %s6053_s26]]   ;;  %s6059_s26 = smov 12  }
   0xd   :  { %s6158_s3 = sld [smem:[%s7180_s0 + %s6054_s30]]   ;;  %s6063_s22 = smov 16  }
   0xe   :  { %s6163_s8 = sld [smem:[%s7180_s0 + %s6055_s4]]   ;;  %s6064_s28 = smov 17  }
   0xf   :  { %s6168_s14 = sld [smem:[%s7180_s0 + %s6056_s10]]  }
  0x10   :  { %s6173_s19 = sld [smem:[%s7180_s0 + %s6057_s15]]   ;;  %s6062_s15 = smov 15  }
  0x11   :  { %s6178_s24 = sld [smem:[%s7180_s0 + %s6058_s20]]  }
  0x12   :  { %s6183_s30 = sld [smem:[%s7180_s0 + %s6059_s26]]  }
  0x13   :  { %7229 = sst [smem:[#allocation13_spill]] %s6158_s3 }
  0x14   :  { %7230 = sst [smem:[#allocation14_spill]] %s6163_s8 }
  0x15   :  { %7231 = sst [smem:[#allocation15_spill]] %s6168_s14 }
  0x16   :  { %s6188_s6 = sld [smem:[%s7180_s0 + %s6060_s1]]  }
  0x17   :  { %s6193_s12 = sld [smem:[%s7180_s0 + %s6061_s7]]   ;;  %s6065_s7 = smov 18  }
  0x18   :  { %s6198_s20 = sld [smem:[%s7180_s0 + %s6062_s15]]   ;;  %s6066_s15 = smov 19  }
  0x19   :  { %s6203_s27 = sld [smem:[%s7180_s0 + %s6063_s22]]   ;;  %s6067_s22 = smov 20  }
  0x1a   :  { %s6208_s4 = sld [smem:[%s7180_s0 + %s6064_s28]]   ;;  %s6068_s28 = smov 21  }
  0x1b   :  { %s6213_s21 = sld [smem:[%s7180_s0 + %s6065_s7]]   ;;  %s6069_s7 = smov 22  }
  0x1c   :  { %7232 = sst [smem:[#allocation16_spill]] %s6188_s6 }
  0x1d   :  { %7233 = sst [smem:[#allocation17_spill]] %s6193_s12 }
  0x1e   :  { %7234 = sst [smem:[#allocation18_spill]] %s6198_s20 }
  0x1f   :  { %7235 = sst [smem:[#allocation19_spill]] %s6203_s27 }
  0x20   :  { %7236 = sst [smem:[#allocation20_spill]] %s6208_s4 }
  0x21   :  { %s6218_s17 = sld [smem:[%s7180_s0 + %s6066_s15]]   ;;  %s6070_s15 = smov 23  }
  0x22   :  { %s6223_s27 = sld [smem:[%s7180_s0 + %s6067_s22]]   ;;  %s6071_s22 = smov 24  }
  0x23   :  { %s6228_s4 = sld [smem:[%s7180_s0 + %s6068_s28]]   ;;  %s6072_s28 = smov 25  }
  0x24   :  { %s6233_s20 = sld [smem:[%s7180_s0 + %s6069_s7]]   ;;  %s6073_s7 = smov 26  }
  0x27   :  { %7237 = sst [smem:[#allocation21_spill]] %s6218_s17 }
  0x28   :  { %7238 = sst [smem:[#allocation22_spill]] %s6223_s27 }
  0x29   :  { %7239 = sst [smem:[#allocation23_spill]] %s6228_s4 }
  0x2a   :  { %7240 = sst [smem:[#allocation24_spill]] %s6233_s20 }
  0x2b   :  { %s6238_s17 = sld [smem:[%s7180_s0 + %s6070_s15]]   ;;  %s6074_s15 = smov 27  }
  0x2c   :  { %s6243_s27 = sld [smem:[%s7180_s0 + %s6071_s22]]   ;;  %s6075_s22 = smov 28  }
  0x2d   :  { %s6248_s4 = sld [smem:[%s7180_s0 + %s6072_s28]]   ;;  %s6076_s28 = smov 29  }
  0x2e   :  { %s6253_s20 = sld [smem:[%s7180_s0 + %s6073_s7]]   ;;  %s6077_s7 = smov 30  }
  0x31   :  { %7241 = sst [smem:[#allocation25_spill]] %s6238_s17 }
  0x32   :  { %7242 = sst [smem:[#allocation26_spill]] %s6243_s27 }
  0x33   :  { %7243 = sst [smem:[#allocation27_spill]] %s6248_s4 }
  0x34   :  { %7244 = sst [smem:[#allocation28_spill]] %s6253_s20 }
  0x35   :  { %s6258_s17 = sld [smem:[%s7180_s0 + %s6074_s15]]   ;;  %s6078_s15 = smov 31  }
  0x36   :  { %s6263_s27 = sld [smem:[%s7180_s0 + %s6075_s22]]   ;;  %s6079_s22 = smov 32  }
  0x37   :  { %s6268_s4 = sld [smem:[%s7180_s0 + %s6076_s28]]   ;;  %s6080_s28 = smov 33  }
  0x38   :  { %s6273_s20 = sld [smem:[%s7180_s0 + %s6077_s7]]   ;;  %s6081_s7 = smov 34  }
  0x3b   :  { %7245 = sst [smem:[#allocation29_spill]] %s6258_s17 }
  0x3c   :  { %7246 = sst [smem:[#allocation30_spill]] %s6263_s27 }
  0x3d   :  { %7247 = sst [smem:[#allocation31_spill]] %s6268_s4 }
  0x3e   :  { %7248 = sst [smem:[#allocation32_spill]] %s6273_s20 }
  0x3f   :  { %s6278_s17 = sld [smem:[%s7180_s0 + %s6078_s15]]   ;;  %s6082_s15 = smov 35  }
  0x40   :  { %s6283_s27 = sld [smem:[%s7180_s0 + %s6079_s22]]   ;;  %s6083_s22 = smov 36  }
  0x41   :  { %s6288_s4 = sld [smem:[%s7180_s0 + %s6080_s28]]   ;;  %s6084_s28 = smov 37  }
  0x42   :  { %s6293_s20 = sld [smem:[%s7180_s0 + %s6081_s7]]   ;;  %s6085_s7 = smov 38  }
  0x45   :  { %7249 = sst [smem:[#allocation33_spill]] %s6278_s17 }
  0x46   :  { %7250 = sst [smem:[#allocation34_spill]] %s6283_s27 }
  0x47   :  { %7251 = sst [smem:[#allocation35_spill]] %s6288_s4 }
  0x48   :  { %7252 = sst [smem:[#allocation36_spill]] %s6293_s20 }
  0x49   :  { %s6298_s17 = sld [smem:[%s7180_s0 + %s6082_s15]]   ;;  %s6086_s15 = smov 39  }
  0x4a   :  { %s6303_s27 = sld [smem:[%s7180_s0 + %s6083_s22]]   ;;  %s6087_s22 = smov 40  }
  0x4b   :  { %s6308_s4 = sld [smem:[%s7180_s0 + %s6084_s28]]   ;;  %s6088_s28 = smov 41  }
  0x4c   :  { %s6313_s20 = sld [smem:[%s7180_s0 + %s6085_s7]]   ;;  %s6089_s7 = smov 42  }
  0x4f   :  { %7253 = sst [smem:[#allocation37_spill]] %s6298_s17 }
  0x50   :  { %7254 = sst [smem:[#allocation38_spill]] %s6303_s27 }
  0x51   :  { %7255 = sst [smem:[#allocation39_spill]] %s6308_s4 }
  0x52   :  { %7256 = sst [smem:[#allocation40_spill]] %s6313_s20 }
  0x53   :  { %s6318_s17 = sld [smem:[%s7180_s0 + %s6086_s15]]   ;;  %s6090_s15 = smov 43  }
  0x54   :  { %s6323_s27 = sld [smem:[%s7180_s0 + %s6087_s22]]   ;;  %s6091_s22 = smov 44  }
  0x55   :  { %s6328_s4 = sld [smem:[%s7180_s0 + %s6088_s28]]   ;;  %s6092_s28 = smov 45  }
  0x56   :  { %s6333_s20 = sld [smem:[%s7180_s0 + %s6089_s7]]   ;;  %s6093_s7 = smov 46  }
  0x59   :  { %7257 = sst [smem:[#allocation41_spill]] %s6318_s17 }
  0x5a   :  { %7258 = sst [smem:[#allocation42_spill]] %s6323_s27 }
  0x5b   :  { %7259 = sst [smem:[#allocation43_spill]] %s6328_s4 }
  0x5c   :  { %7260 = sst [smem:[#allocation44_spill]] %s6333_s20 }
  0x5d   :  { %s6338_s17 = sld [smem:[%s7180_s0 + %s6090_s15]]   ;;  %s6094_s15 = smov 47  }
  0x5e   :  { %s6343_s27 = sld [smem:[%s7180_s0 + %s6091_s22]]   ;;  %s6095_s22 = smov 48  }
  0x5f   :  { %s6348_s4 = sld [smem:[%s7180_s0 + %s6092_s28]]   ;;  %s6096_s28 = smov 49  }
  0x60   :  { %s6353_s20 = sld [smem:[%s7180_s0 + %s6093_s7]]   ;;  %s6097_s7 = smov 50  }
  0x63   :  { %7261 = sst [smem:[#allocation45_spill]] %s6338_s17 }
  0x64   :  { %7262 = sst [smem:[#allocation46_spill]] %s6343_s27 }
  0x65   :  { %7263 = sst [smem:[#allocation47_spill]] %s6348_s4 }
  0x66   :  { %7264 = sst [smem:[#allocation48_spill]] %s6353_s20 }
  0x67   :  { %s6358_s17 = sld [smem:[%s7180_s0 + %s6094_s15]]   ;;  %s6098_s15 = smov 51  }
  0x68   :  { %s6363_s27 = sld [smem:[%s7180_s0 + %s6095_s22]]   ;;  %s6099_s22 = smov 52  }
  0x69   :  { %s6368_s4 = sld [smem:[%s7180_s0 + %s6096_s28]]   ;;  %s6100_s28 = smov 53  }
  0x6a   :  { %s6373_s20 = sld [smem:[%s7180_s0 + %s6097_s7]]   ;;  %s6101_s7 = smov 54  }
  0x6d   :  { %7265 = sst [smem:[#allocation49_spill]] %s6358_s17 }
  0x6e   :  { %7266 = sst [smem:[#allocation50_spill]] %s6363_s27 }
  0x6f   :  { %7267 = sst [smem:[#allocation51_spill]] %s6368_s4 }
  0x70   :  { %7268 = sst [smem:[#allocation52_spill]] %s6373_s20 }
  0x71   :  { %s6378_s17 = sld [smem:[%s7180_s0 + %s6098_s15]]  }
  0x72   :  { %s6383_s27 = sld [smem:[%s7180_s0 + %s6099_s22]]  }
  0x73   :  { %s6388_s4 = sld [smem:[%s7180_s0 + %s6100_s28]]  }
  0x74   :  { %s6393_s20 = sld [smem:[%s7180_s0 + %s6101_s7]]  }
  0x75   :  { %115 = vsyncpa [#allocation3], 0 }
  0x76   :  { %117 = vsyncpa [#allocation3 + $0x1], 0 }
  0x77   :  { %118 = vsyncpa [#allocation5], 0 }
  0x78   :  { %120 = vsyncpa [#allocation5 + $0x1], 0  ;;  %s6395_s15 = smov 0   ;;  %s6397_s16 = smov 0  }
  0x79   :  { %s6399_s18 = smov 0   ;;  %s6401_s22 = smov 0  }
  0x7a LB: > { %s7269_s14 = sld [smem:[#allocation15_spill]]  ;;  %s7270_s12 = sld [smem:[#allocation17_spill]]  ;;  %s6042_s18 = sphi %s6399_s18, %s7328_s18   ;;  %s6038_s16 = sphi %s6397_s16, %s7327_s16   ;;  %s6034_s15 = sphi %s6395_s15, %s7326_s15   ;;  %s6046_s22 = sphi %s6401_s22, %s7329_s22  }
  0x7b   : > { %s7271_s3 = sld [smem:[#allocation13_spill]]  ;;  %s6416_s0 = sadd.s32 4294967295, %s6046_s22  }
  0x7c   : > { %s5306_s23 = sadd.s32 4294967294, %s6046_s22   ;;  %s6420_s26 = sadd.s32 1, %s6046_s22  }
  0x7d   : > { %s1271_s28 = sadd.s32 1, %s6042_s18  ;;  %s1268_s1 = ssub.s32 %s6046_s22, %s6420_s26 }
  0x7e   : > { %p1281_p0 = scmp.ne.s32.totalorder %s6042_s18, %s6038_s16  ;;  %p1269_p1 = scmp.eq.s32.totalorder %s1268_s1, 0 }
  0x7f   : > { %p1282_p2 = scmp.eq.s32.totalorder %s6416_s0, 1  ;;  %p1287_p3 = scmp.ne.s32.totalorder %s6038_s16, %s6034_s15 }
  0x80   : > { %p1288_p4 = scmp.eq.s32.totalorder %s5306_s23, 1  ;;  %p5309_p7 = scmp.ge.s32.totalorder %s6046_s22, 1 }
  0x81   : > { %s6431_s2 = scalar_select %p1269_p1, %s6042_s18, %s1271_s28  }
  0x82   : > { %p6433_p5 = por %p1282_p2, %p1281_p0  ;;  %p6437_p6 = por %p1288_p4, %p1287_p3 }
  0x83   : > { %p1508_p8 = scmp.lt.s32.totalorder %s6046_s22, 3 }
  0x85   : > { %p1509_p9 = pnand %p5309_p7, %p1508_p8 }
  0x86   : > { %s7274_s9 = sld [smem:[#allocation9_spill]] (!%p1509_p9)  ;;  %v1672_v0 = vld [vmem:[%s6178_s24] sm:$0xff] (!%p1509_p9)  ;;  %vm1689_vm0 = vcmask (!%p1509_p9), 1043456   ;;  %p1651_p10 = scmp.lt.s32.totalorder (!%p1509_p9), %s6416_s0, 1  ;;  %v6102_v3 = vmov (!%p1509_p9), 0   ;;  %vm1685_vm1 = vcmask (!%p1509_p9), 64512   ;;  %v1880_v17 = vlaneseq (!%p1509_p9) }
  0x87   : > { %1512 = sbr.rel (%p1509_p9) target bundleno = 8646 (0x21c6), region = 232  ;;  %v5315_v1 = vcombine.high (!%p1509_p9), %v1672_v0, %v1672_v0  ;;  %s7275_s5 = sld [smem:[#allocation8_spill]] (!%p1509_p9)  ;;  %v5314_v2 = vcombine.low (!%p1509_p9), %v1672_v0, %v1672_v0  ;;  %1734 = vmatprep.mubr.bf16.mxu0 (!%p1509_p9), %v6102_v3  ;;  %1775 = vmatprep.mubr.bf16.mxu1 (!%p1509_p9), %v6102_v3  ;;  %v5848_v5 = vld [vmem:[%s6148_s25] sm:$0xff] (!%p1509_p9)   ;;  %v6103_v7 = vmov (!%p1509_p9), 0.0   ;;  %vm1802_vm2 = vcmask (!%p1509_p9), 130048   ;;  %v1673_v12 = vld [vmem:[%s6178_s24 + $0x8] sm:$0xff] (!%p1509_p9) }
  0x88   : > { %vm6104_vm3 = vmmov (!%p1509_p9), 0   ;;  %v5317_v13 = vcombine.high (!%p1509_p9), %v1673_v12, %v1673_v12  ;;  %v5316_v14 = vcombine.low (!%p1509_p9), %v1673_v12, %v1673_v12  ;;  %v5851_v16 = vld [vmem:[%s7271_s3] sm:$0xff] (!%p1509_p9)   ;;  %v5852_v18 = vld [vmem:[%s7271_s3 + $0x8] sm:$0xff] (!%p1509_p9)   ;;  %v6479_v19 = vshrl.u32 (!%p1509_p9), %v1880_v17, 7  ;;  %s7276_s8 = sld [smem:[#allocation14_spill]] (!%p1509_p9)  ;;  %s7277_s13 = sld [smem:[#allocation10_spill]] (!%p1509_p9) }
  0x89   : > { %5318 = vmatprep.subr.msk.bf16.mxu0 (!%p1509_p9), %vm1689_vm0, %v5315_v1  ;;  %v1691_v4 = vsel (!%p1509_p9), %vm1689_vm0, %v5314_v2, 0  ;;  %v5322_v26 = vld [vmem:[%s6153_s29] ss:$0 sm:$0xff] (!%p1509_p9)  ;;  %vm1847_vm4 = vcmask (!%p1509_p9), 261120   ;;  %vm1970_vm7 = vcmask (!%p1509_p9), 523264   ;;  %s7278_s6 = sld [smem:[#allocation16_spill]] (!%p1509_p9) }
  0x8a   : > { %1703 = vmatpush1.bf16.msra.mxu0 (!%p1509_p9), %v1691_v4  ;;  %5320 = vmatprep.subr.msk.bf16.mxu1 (!%p1509_p9), %vm1689_vm0, %v5317_v13  ;;  %v1697_v15 = vsel (!%p1509_p9), %vm1689_vm0, %v5316_v14, 0  ;;  %v6482_v20 = vsub.s32 (!%p1509_p9), 0, %v6479_v19  ;;  %s7284_s3 = sld [smem:[#allocation11_spill]] (!%p1509_p9) }
  0x8b   : > { %5531 = vmatprep.subr.bf16.mxu0 (!%p1509_p9), %v6103_v7  ;;  %1744 = vmatpush1.bf16.msra.mxu1 (!%p1509_p9), %v1697_v15 }
  0x8c   : > { %5537 = vmatprep.subr.bf16.mxu1 (!%p1509_p9), %v6103_v7 }
  0x8e   : > { %s6448_s11 = scalar_select %p1651_p10, %s6416_s0, 1 }
  0x90   : > { %s1658_s23 = scalar_lea.vmem %s7274_s9, %s6448_s11  ;;  %s5454_s28 = sshll.u32 %s6448_s11, 4 }
  0x91   : > { %v1671_v6 = vld [vmem:[%s1658_s23] sm:$0x1]  ;;  %s1655_s1 = scalar_lea.vmem %s7275_s5, %s5454_s28  ;;  %s7196_s23 = smov 32  }
  0x92   : > { %v1674_v8 = vpack.c.bf16 %v1671_v6, %v1671_v6  ;;  %v1669_v9 = vld [vmem:[%s1655_s1] sm:$0xff]  ;;  %v1670_v10 = vld [vmem:[%s1655_s1 + $0x8] sm:$0xff]  ;;  %s1661_s28 = scalar_lea.vmem %s7277_s13, %s6448_s11  ;;  %s7194_s1 = smov 96  }
  0x93   : > { %v6462_v11 = vpack.c.bf16 %v1670_v10, %v1669_v9  ;;  %s7285_s5 = sld [smem:[#allocation21_spill]]  ;;  %s7300_s9 = sld [smem:[#allocation12_spill]] }
  0x94   : > { %5319 = vmatmul.mubr.msk.bf16.vlgmr.msra.gmra.mrb[0].mxu0 %vm1685_vm1, %v1674_v8  ;;  %5321 = vmatmul.mubr.msk.bf16.vlgmr.msra.gmra.mrb[0].mxu1 %vm1685_vm1, %v1674_v8  ;;  %s7302_s13 = sld [smem:[#allocation34_spill]] }
  0x95   : > { %5532 = vmatpush3.bf16.msra.mxu0 %v5848_v5  ;;  %5533 = vmatprep.mubr.msk.bf16.mxu0 %vm6104_vm3, %v6103_v7 }
  0x96   : > { %5545 = vmatprep.subr.bf16.mxu0 %v6103_v7  ;;  %5541 = vmatprep.mubr.msk.bf16.mxu1 %vm6104_vm3, %v6103_v7 }
  0x97   : > { %5538 = vmatpush3.bf16.msra.mxu1 %v5851_v16 }
  0x98   : > { %5539 = vmatprep.subr.bf16.mxu1 %v6103_v7 }
  0x9b   : > { %5540 = vmatpush3.bf16.msra.mxu1 %v5852_v18 }
  0x9c   : > { %5534 = vmatmul.mubr.msk.bf16.vlgmr.msra.gmra.mrb[4].mxu0 %vm1802_vm2, %v6462_v11 }
  0x9d   : > { %5553 = vmatprep.mubr.msk.bf16.mxu0 %vm6104_vm3, %v6103_v7 }
 0x167   : > { %v1736_v21 = vpop.f32.mrb[0].mxu0  ;;  %v1777_v15 = vpop.f32.mrb[0].mxu1 }
 0x168   : > { %v6484_v22 = vpop.f32.mrb[1].mxu0  ;;  %v1784_v0 = vadd.f32 1.0, %v1736_v21  ;;  %v6500_v16 = vpop.f32.mrb[1].mxu1 }
 0x169   : > { %v1740_v23 = vpop.f32.mrb[2].mxu0  ;;  %v1889_v24 = vrot.slane %v6484_v22, %v6482_v20  ;;  %v1781_v18 = vpop.f32.mrb[2].mxu1 }
 0x16a   : > { %v1741_v25 = vpop.f32.mrb[3].mxu0  ;;  %v6495_v1 = vrot.slane %v1784_v0, %v6482_v20  ;;  %v1782_v21 = vpop.f32.mrb[3].mxu1  ;;  %v5325_v23 = vld [vmem:[%s7276_s8] ss:$0 sm:$0xff]  ;;  %s1664_s8 = scalar_lea.vmem %s7284_s3, %s6448_s11  ;;  %s7200_s3 = smov 48  }
 0x16b   : > { %1891 = vrot.lane.b32.xlu0 %v1889_v24, %s7196_s23 }
 0x16f   : > { %v1840_v27 = vpop.f32.mrb[4].mxu0 }
 0x170   : > { %v1841_v28 = vadd.f32 %v5322_v26, %v1840_v27  ;;  %v5535_v29 = vpop.f32.mrb[5].mxu0 }
 0x171   : > { %v1843_v30 = vpop.f32.mrb[6].mxu0 }
 0x172   : > { %v1848_v31 = vsel %vm1847_vm4, %v1841_v28, 0.0  ;;  %v1859_v32 = vmul.f32 %v1841_v28, %v1841_v28  ;;  %v1844_v33 = vadd.f32 %v5322_v26, %v1843_v30  ;;  %v5536_v34 = vpop.f32.mrb[7].mxu0 }
 0x174   : > { %v1861_v35 = vsel %vm1847_vm4, %v1859_v32, 0.0  ;;  %v1849_v36 = vsel %vm1847_vm4, %v1844_v33, 0.0  ;;  %v1860_v37 = vmul.f32 %v1844_v33, %v1844_v33 }
 0x175   : > { %v1850_v38 = vadd.f32 %v1849_v36, %v1848_v31 }
 0x176   : > { %v1862_v39 = vsel %vm1847_vm4, %v1860_v37, 0.0 }
 0x177   : > { %v1851_v40 = vrot.slane %v1850_v38, 4  ;;  %v1863_v41 = vadd.f32 %v1862_v39, %v1861_v35 }
 0x179   : > { %v1852_v42 = vadd.f32 %v1851_v40, %v1850_v38  ;;  %v1864_v43 = vrot.slane %v1863_v41, 4 }
 0x17b   : > { %v1853_v44 = vrot.slane %v1852_v42, 2  ;;  %v1865_v45 = vadd.f32 %v1864_v43, %v1863_v41 }
 0x17d   : > { %v1854_v46 = vadd.f32 %v1853_v44, %v1852_v42  ;;  %v1866_v47 = vrot.slane %v1865_v45, 2 }
 0x17f   : > { %v1855_v48 = vrot.slane %v1854_v46, 1  ;;  %v1867_v49 = vadd.f32 %v1866_v47, %v1865_v45 }
 0x181   : > { %v1856_v50 = vadd.f32 %v1855_v48, %v1854_v46  ;;  %v1868_v51 = vrot.slane %v1867_v49, 1 }
 0x183   : > { %v1858_v52 = vmul.f32 0.0625, %v1856_v50  ;;  %v1869_v53 = vadd.f32 %v1868_v51, %v1867_v49 }
 0x185   : > { %v1870_v54 = vmul.f32 0.0625, %v1869_v53  ;;  %v1871_v55 = vmul.f32 %v1858_v52, %v1858_v52  ;;  %v1875_v56 = vsub.f32 %v1844_v33, %v1858_v52  ;;  %v1874_v57 = vsub.f32 %v1841_v28, %v1858_v52 }
 0x187   : > { %v1872_v58 = vsub.f32 %v1870_v54, %v1871_v55 }
 0x189   : > { %v1873_v59 = vmax.f32 %v1872_v58, 0.0 }
 0x18b   : > { %v1876_v60 = vadd.f32 1e-05, %v1873_v59 }
 0x18d   : > { %5912 = vrsqrt.f32 %v1876_v60 }
 0x197   : > { %v5913_v61 = vpop.eup %5912 }
 0x198   : > { %v1878_v62 = vmul.f32 %v5913_v61, %v1874_v57  ;;  %v1879_v63 = vmul.f32 %v5913_v61, %v1875_v56  ;;  %v2184_v61 = vld [vmem:[%s6213_s21] sm:$0xff] }
 0x199   : > { %v5335_v0 = vcombine.low %v2184_v61, %v2184_v61 }
 0x19a   : > { %v1884_v2 = vmul.f32 %v6495_v1, %v1878_v62  ;;  %v1885_v4 = vmul.f32 %v6495_v1, %v1879_v63  ;;  %v5855_v62 = vld [vmem:[%s7269_s14] sm:$0xff]   ;;  %v5336_v63 = vcombine.high %v2184_v61, %v2184_v61 }
 0x19b   : > { %5546 = vmatpush3.bf16.msra.mxu0 %v5855_v62 }
 0x19c   : > { %5339 = vmatprep.subr.msk.bf16.mxu1 %vm1689_vm0, %v5336_v63  ;;  %5547 = vmatprep.subr.bf16.mxu0 %v6103_v7 }
 0x1dd   : > { %v1892_v5 = vpop.permute.xlu0 %1891 }
 0x1de   : > { %v1894_v6 = vadd.f32 %v1892_v5, %v1884_v2  ;;  %v1895_v8 = vadd.f32 %v1892_v5, %v1885_v4  ;;  %v2183_v2 = vld [vmem:[%s1661_s28] sm:$0x1]  ;;  %v2201_v4 = vsel %vm1689_vm0, %v5335_v0, 0  ;;  %s7279_s28 = sld [smem:[#allocation18_spill]] }
 0x1df   : > { %v2186_v5 = vpack.c.bf16 %v2183_v2, %v2183_v2 }
 0x1e0   : > { %vm1896_vm5 = vcmp.gt.f32.partialorder %v1894_v6, 0.0  ;;  %vm1897_vm6 = vcmp.gt.f32.partialorder %v1895_v8, 0.0  ;;  %v1898_v9 = vmul.f32 0.2, %v1894_v6  ;;  %v1899_v10 = vmul.f32 0.2, %v1895_v8 }
 0x1e2   : > { %v1900_v12 = vsel %vm1896_vm5, %v1894_v6, %v1898_v9  ;;  %v1901_v13 = vsel %vm1897_vm6, %v1895_v8, %v1899_v10  ;;  %v5856_v6 = vld [vmem:[%s7269_s14 + $0x8] sm:$0xff]   ;;  %v2015_v8 = vrot.slane %v1777_v15, %v6482_v20  ;;  %v5857_v9 = vld [vmem:[%s7269_s14 + $0x10] sm:$0xff]   ;;  %v5858_v10 = vld [vmem:[%s7269_s14 + $0x18] sm:$0xff]  }
 0x1e3   : > { %v1906_v14 = vpack.c.bf16 %v1901_v13, %v1900_v12  ;;  %5548 = vmatpush3.bf16.msra.mxu0 %v5856_v6 }
 0x1e4   : > { %5549 = vmatprep.subr.bf16.mxu0 %v6103_v7 }
 0x1e5   : > { %5542 = vmatmul.mubr.msk.bf16.vlgmr.msra.gmra.mrb[4].mxu1 %vm1847_vm4, %v1906_v14 }
 0x1e6   : > { %2244 = vmatprep.mubr.bf16.mxu1 %v6102_v3  ;;  %2213 = vmatpush1.bf16.msra.mxu1 %v2201_v4 }
 0x1e7   : > { %5550 = vmatpush3.bf16.msra.mxu0 %v5857_v9 }
 0x1e8   : > { %5551 = vmatprep.subr.bf16.mxu0 %v6103_v7 }
 0x1eb   : > { %5552 = vmatpush3.bf16.msra.mxu0 %v5858_v10 }
 0x1ec   : > { %5557 = vmatprep.subr.bf16.mxu0 %v6103_v7 }
 0x1ed   : > { %5340 = vmatmul.mubr.msk.bf16.vlgmr.msra.gmra.mrb[8].mxu1 %vm1685_vm1, %v2186_v5 }
 0x1ee   : > { %2285 = vmatprep.mubr.bf16.mxu1 %v6102_v3 }
 0x2b8   : > { %v1963_v24 = vpop.f32.mrb[4].mxu1 }
 0x2b9   : > { %v1964_v25 = vadd.f32 %v5325_v23, %v1963_v24  ;;  %v5543_v26 = vpop.f32.mrb[5].mxu1 }
 0x2ba   : > { %v1966_v27 = vpop.f32.mrb[6].mxu1 }
 0x2bb   : > { %v1981_v28 = vmul.f32 %v1964_v25, %v1964_v25  ;;  %v1967_v29 = vadd.f32 %v5325_v23, %v1966_v27  ;;  %v5544_v30 = vpop.f32.mrb[7].mxu1  ;;  %v1971_v31 = vsel %vm1970_vm7, %v1964_v25, 0.0 }
 0x2bd   : > { %v1972_v32 = vsel %vm1970_vm7, %v1967_v29, 0.0  ;;  %v1982_v33 = vmul.f32 %v1967_v29, %v1967_v29  ;;  %v1983_v35 = vsel %vm1970_vm7, %v1981_v28, 0.0 }
 0x2be   : > { %v1973_v34 = vadd.f32 %v1972_v32, %v1971_v31 }
 0x2bf   : > { %v1984_v36 = vsel %vm1970_vm7, %v1982_v33, 0.0 }
 0x2c0   : > { %v1974_v37 = vrot.slane %v1973_v34, 4  ;;  %v1985_v38 = vadd.f32 %v1984_v36, %v1983_v35  ;;  %v2185_v36 = vld [vmem:[%s6213_s21 + $0x8] sm:$0xff] }
 0x2c2   : > { %v1975_v39 = vadd.f32 %v1974_v37, %v1973_v34  ;;  %v1986_v40 = vrot.slane %v1985_v38, 4  ;;  %v5859_v34 = vld [vmem:[%s6183_s30] sm:$0xff]   ;;  %v5338_v37 = vcombine.high %v2185_v36, %v2185_v36 }
 0x2c4   : > { %v1976_v41 = vrot.slane %v1975_v39, 2  ;;  %v1987_v42 = vadd.f32 %v1986_v40, %v1985_v38  ;;  %v5337_v38 = vcombine.low %v2185_v36, %v2185_v36  ;;  %5341 = vmatprep.subr.msk.bf16.mxu1 %vm1689_vm0, %v5338_v37  ;;  %v5862_v40 = vld [vmem:[%s7270_s12] sm:$0xff]  }
 0x2c6   : > { %v1977_v43 = vadd.f32 %v1976_v41, %v1975_v39  ;;  %v1988_v44 = vrot.slane %v1987_v42, 2  ;;  %v2207_v39 = vsel %vm1689_vm0, %v5337_v38, 0  ;;  %v5863_v41 = vld [vmem:[%s7270_s12 + $0x8] sm:$0xff]   ;;  %s1667_s12 = scalar_lea.vmem %s7300_s9, %s6448_s11  ;;  %s7303_s9 = sld [smem:[#allocation32_spill]] }
 0x2c7   : > { %2254 = vmatpush1.bf16.msra.mxu1 %v2207_v39  ;;  %s7306_s11 = sld [smem:[#allocation37_spill]] }
 0x2c8   : > { %v1989_v45 = vadd.f32 %v1988_v44, %v1987_v42  ;;  %v1978_v46 = vrot.slane %v1977_v43, 1  ;;  %5563 = vmatprep.subr.bf16.mxu1 %v6103_v7  ;;  %v5329_v42 = vld [vmem:[%s6173_s19] ss:$0 sm:$0xff] }
 0x2ca   : > { %v1990_v47 = vrot.slane %v1989_v45, 1  ;;  %v1979_v48 = vadd.f32 %v1978_v46, %v1977_v43  ;;  %5342 = vmatmul.mubr.msk.bf16.vlgmr.msra.gmra.mrb[12].mxu1 %vm1685_vm1, %v2186_v5 }
 0x2cb   : > { %5567 = vmatprep.mubr.msk.bf16.mxu1 %vm6104_vm3, %v6103_v7  ;;  %5564 = vmatpush3.bf16.msra.mxu1 %v5862_v40 }
 0x2cc   : > { %v1991_v49 = vadd.f32 %v1990_v47, %v1989_v45  ;;  %v1980_v50 = vmul.f32 0.0625, %v1979_v48  ;;  %5565 = vmatprep.subr.bf16.mxu1 %v6103_v7 }
 0x2ce   : > { %v1992_v51 = vmul.f32 0.0625, %v1991_v49  ;;  %v1993_v52 = vmul.f32 %v1980_v50, %v1980_v50  ;;  %v1997_v53 = vsub.f32 %v1967_v29, %v1980_v50  ;;  %v1996_v54 = vsub.f32 %v1964_v25, %v1980_v50  ;;  %v6534_v29 = vpop.f32.mrb[8].mxu1 }
 0x2cf   : > { %v6536_v30 = vpop.f32.mrb[9].mxu1  ;;  %5566 = vmatpush3.bf16.msra.mxu1 %v5863_v41 }
 0x2d0   : > { %v1994_v55 = vsub.f32 %v1992_v51, %v1993_v52  ;;  %v2392_v31 = vrot.slane %v6536_v30, %v6482_v20  ;;  %v2250_v32 = vpop.f32.mrb[10].mxu1  ;;  %5583 = vmatprep.subr.bf16.mxu1 %v6103_v7  ;;  %v5343_v52 = vld [vmem:[%s7278_s6] ss:$0 sm:$0xff]  ;;  %s7286_s6 = smov 32  }
 0x2d1   : > { %v2251_v33 = vpop.f32.mrb[11].mxu1 }
 0x2d2   : > { %v1995_v56 = vmax.f32 %v1994_v55, 0.0 }
 0x2d4   : > { %v1998_v57 = vadd.f32 1e-05, %v1995_v56 }
 0x2d6   : > { %5914 = vrsqrt.f32 %v1998_v57 }
 0x2e0   : > { %v5915_v58 = vpop.eup %5914 }
 0x2e1   : > { %v2001_v59 = vmul.f32 %v5915_v58, %v1997_v53  ;;  %v2000_v60 = vmul.f32 %v5915_v58, %v1996_v54 }
 0x2e3   : > { %2006 = vrot.lane.b32.xlu1 %v2001_v59, %s7196_s23  ;;  %2004 = vrot.lane.b32.xlu0 %v2000_v60, %s7196_s23 }
 0x2e7   : > { %2017 = vrot.lane.b32.xlu1 %v2015_v8, %s7196_s23 }
 0x2eb   : > { %2394 = vrot.lane.b32.xlu1 %v2392_v31, %s7196_s23 }
 0x355   : > { %v2007_v12 = vpop.permute.xlu1 %2006  ;;  %v2005_v13 = vpop.permute.xlu0 %2004 }
 0x356   : > { %v2011_v14 = vmul.f32 %v2007_v12, %v6495_v1  ;;  %v2010_v15 = vmul.f32 %v2005_v13, %v6495_v1 }
 0x359   : > { %v6529_v18 = vpop.permute.xlu1 %2017 }
 0x35a   : > { %v2020_v21 = vadd.f32 %v6529_v18, %v2010_v15  ;;  %v2021_v23 = vadd.f32 %v6529_v18, %v2011_v14 }
 0x35c   : > { %vm2022_vm8 = vcmp.gt.f32.partialorder %v2020_v21, 0.0  ;;  %vm2023_vm9 = vcmp.gt.f32.partialorder %v2021_v23, 0.0  ;;  %v2024_v24 = vmul.f32 0.2, %v2020_v21  ;;  %v2025_v25 = vmul.f32 0.2, %v2021_v23 }
 0x35e   : > { %v2026_v26 = vsel %vm2022_vm8, %v2020_v21, %v2024_v24  ;;  %v2027_v27 = vsel %vm2023_vm9, %v2021_v23, %v2025_v25 }
 0x35f   : > { %v2036_v28 = vpack.c.bf16 %v2027_v27, %v2026_v26 }
 0x361   : > { %2045 = vrot.lane.b32.xlu0 %v2036_v28, %s7194_s1  ;;  %s7281_s1 = sld [smem:[#allocation20_spill]] }
 0x3d3   : > { %v2046_v35 = vpop.permute.xlu0 %2045 }
 0x3d4   : > { %5554 = vmatmul.mubr.msk.bf16.vlgmr.msra.gmra.mrb[8].mxu0 %vm1970_vm7, %v2046_v35 }
 0x3d5   : > { %5558 = vmatpush3.bf16.msra.mxu0 %v5859_v34  ;;  %5559 = vmatprep.mubr.msk.bf16.mxu0 %vm6104_vm3, %v6103_v7 }
 0x3d6   : > { %5571 = vmatprep.subr.bf16.mxu0 %v6103_v7 }
 0x3dc   : > { %5560 = vmatmul.mubr.msk.bf16.vlgmr.msra.gmra.mrb[12].mxu0 %vm1802_vm2, %v6462_v11 }
 0x3dd   : > { %5579 = vmatprep.mubr.msk.bf16.mxu0 %vm6104_vm3, %v6103_v7 }
 0x4a7   : > { %v2108_v43 = vpop.f32.mrb[8].mxu0 }
 0x4a8   : > { %v6562_v44 = vadd.f32 %v5329_v42, %v2108_v43  ;;  %v5555_v45 = vpop.f32.mrb[9].mxu0 }
 0x4a9   : > { %v2111_v46 = vpop.f32.mrb[10].mxu0 }
 0x4aa   : > { %v6564_v47 = vadd.f32 %v5329_v42, %v2111_v46  ;;  %v5556_v48 = vpop.f32.mrb[11].mxu0  ;;  %v2123_v49 = vmul.f32 %v6562_v44, %v6562_v44 }
 0x4ac   : > { %v2115_v50 = vadd.f32 %v6564_v47, %v6562_v44  ;;  %v2124_v51 = vmul.f32 %v6564_v47, %v6564_v47 }
 0x4ae   : > { %v2116_v53 = vrot.slane %v2115_v50, 4  ;;  %v2125_v54 = vadd.f32 %v2124_v51, %v2123_v49 }
 0x4af   : > { %v2345_v55 = vpop.f32.mrb[12].mxu0 }
 0x4b0   : > { %v2117_v56 = vadd.f32 %v2116_v53, %v2115_v50  ;;  %v2126_v57 = vrot.slane %v2125_v54, 4  ;;  %v2346_v58 = vadd.f32 %v5343_v52, %v2345_v55  ;;  %v5561_v59 = vpop.f32.mrb[13].mxu0 }
 0x4b1   : > { %v2348_v60 = vpop.f32.mrb[14].mxu0 }
 0x4b2   : > { %v2118_v61 = vrot.slane %v2117_v56, 2  ;;  %v2127_v62 = vadd.f32 %v2126_v57, %v2125_v54  ;;  %v5562_v63 = vpop.f32.mrb[15].mxu0  ;;  %v2362_v0 = vmul.f32 %v2346_v58, %v2346_v58  ;;  %v2349_v2 = vadd.f32 %v5343_v52, %v2348_v60 }
 0x4b3   : > { %v2352_v6 = vsel %vm1847_vm4, %v2346_v58, 0.0  ;;  %v2294_v60 = vadd.f32 1.0, %v6534_v29 }
 0x4b4   : > { %v2119_v4 = vadd.f32 %v2118_v61, %v2117_v56  ;;  %v2128_v5 = vrot.slane %v2127_v62, 2  ;;  %v2353_v8 = vsel %vm1847_vm4, %v2349_v2, 0.0  ;;  %v2363_v9 = vmul.f32 %v2349_v2, %v2349_v2 }
 0x4b5   : > { %v2354_v13 = vadd.f32 %v2353_v8, %v2352_v6  ;;  %v2364_v14 = vsel %vm1847_vm4, %v2362_v0, 0.0 }
 0x4b6   : > { %v2120_v10 = vrot.slane %v2119_v4, 1  ;;  %v2129_v12 = vadd.f32 %v2128_v5, %v2127_v62  ;;  %v2365_v15 = vsel %vm1847_vm4, %v2363_v9, 0.0  ;;  %v6585_v62 = vrot.slane %v2294_v60, %v6482_v20 }
 0x4b7   : > { %v2355_v24 = vrot.slane %v2354_v13, 4  ;;  %v2366_v25 = vadd.f32 %v2365_v15, %v2364_v14 }
 0x4b8   : > { %v2121_v21 = vadd.f32 %v2120_v10, %v2119_v4  ;;  %v2130_v23 = vrot.slane %v2129_v12, 1 }
 0x4b9   : > { %v2356_v28 = vadd.f32 %v2355_v24, %v2354_v13  ;;  %v2367_v31 = vrot.slane %v2366_v25, 4  ;;  %v2287_v13 = vpop.f32.mrb[12].mxu1 }
 0x4ba   : > { %v2122_v26 = vmul.f32 0.0625, %v2121_v21  ;;  %v2131_v27 = vadd.f32 %v2130_v23, %v2129_v12  ;;  %v6592_v14 = vpop.f32.mrb[13].mxu1  ;;  %v5346_v23 = vld [vmem:[%s7279_s28] ss:$0 sm:$0xff]  ;;  %s7280_s28 = sld [smem:[#allocation19_spill]] }
 0x4bb   : > { %v2357_v35 = vrot.slane %v2356_v28, 2  ;;  %v2368_v36 = vadd.f32 %v2367_v31, %v2366_v25  ;;  %v2291_v15 = vpop.f32.mrb[14].mxu1 }
 0x4bc   : > { %v2132_v32 = vmul.f32 0.0625, %v2131_v27  ;;  %v2133_v33 = vmul.f32 %v2122_v26, %v2122_v26  ;;  %v2137_v34 = vsub.f32 %v6564_v47, %v2122_v26  ;;  %v2136_v37 = vsub.f32 %v6562_v44, %v2122_v26  ;;  %v2292_v21 = vpop.f32.mrb[15].mxu1 }
 0x4bd   : > { %v2358_v39 = vadd.f32 %v2357_v35, %v2356_v28  ;;  %v2369_v40 = vrot.slane %v2368_v36, 2 }
 0x4be   : > { %v2134_v38 = vsub.f32 %v2132_v32, %v2133_v33 }
 0x4bf   : > { %v2359_v41 = vrot.slane %v2358_v39, 1  ;;  %v2370_v43 = vadd.f32 %v2369_v40, %v2368_v36 }
 0x4c0   : > { %v2135_v42 = vmax.f32 %v2134_v38, 0.0 }
 0x4c1   : > { %v2360_v45 = vadd.f32 %v2359_v41, %v2358_v39  ;;  %v2371_v48 = vrot.slane %v2370_v43, 1 }
 0x4c2   : > { %v2138_v46 = vadd.f32 1e-05, %v2135_v42 }
 0x4c3   : > { %v2361_v49 = vmul.f32 0.0625, %v2360_v45  ;;  %v2372_v50 = vadd.f32 %v2371_v48, %v2370_v43 }
 0x4c4   : > { %5916 = vrsqrt.f32 %v2138_v46 }
 0x4c5   : > { %v2374_v51 = vmul.f32 %v2361_v49, %v2361_v49  ;;  %v2378_v52 = vsub.f32 %v2349_v2, %v2361_v49  ;;  %v2377_v53 = vsub.f32 %v2346_v58, %v2361_v49  ;;  %v2373_v47 = vmul.f32 0.0625, %v2372_v50  ;;  %v2395_v2 = vpop.permute.xlu1 %2394 }
 0x4c7   : > { %v2375_v54 = vsub.f32 %v2373_v47, %v2374_v51 }
 0x4c9   : > { %v2376_v55 = vmax.f32 %v2375_v54, 0.0 }
 0x4cb   : > { %v2379_v56 = vadd.f32 1e-05, %v2376_v55 }
 0x4cd   : > { %5918 = vrsqrt.f32 %v2379_v56 }
 0x4ce   : > { %v5917_v44 = vpop.eup %5916 }
 0x4cf   : > { %v6579_v57 = vmul.f32 %v5917_v44, %v2136_v37  ;;  %v6581_v59 = vmul.f32 %v5917_v44, %v2137_v34 }
 0x4d7   : > { %v5919_v61 = vpop.eup %5918 }
 0x4d8   : > { %v2381_v63 = vmul.f32 %v5919_v61, %v2377_v53  ;;  %v2382_v0 = vmul.f32 %v5919_v61, %v2378_v52 }
 0x4da   : > { %v2387_v58 = vmul.f32 %v6585_v62, %v2381_v63  ;;  %v2388_v4 = vmul.f32 %v6585_v62, %v2382_v0 }
 0x4dc   : > { %v2397_v5 = vadd.f32 %v2395_v2, %v2387_v58  ;;  %v2398_v6 = vadd.f32 %v2395_v2, %v2388_v4  ;;  %v5864_v4 = vld [vmem:[%s7280_s28] sm:$0xff]  }
 0x4dd   : > { %5572 = vmatpush3.bf16.msra.mxu0 %v5864_v4 }
 0x4de   : > { %vm2399_vm10 = vcmp.gt.f32.partialorder %v2397_v5, 0.0  ;;  %vm2400_vm11 = vcmp.gt.f32.partialorder %v2398_v6, 0.0  ;;  %v2401_v8 = vmul.f32 0.2, %v2397_v5  ;;  %v2402_v9 = vmul.f32 0.2, %v2398_v6  ;;  %5573 = vmatprep.subr.bf16.mxu0 %v6103_v7 }
 0x4e0   : > { %v2403_v10 = vsel %vm2399_vm10, %v2397_v5, %v2401_v8  ;;  %v2404_v29 = vsel %vm2400_vm11, %v2398_v6, %v2402_v9  ;;  %v5865_v5 = vld [vmem:[%s7280_s28 + $0x8] sm:$0xff]   ;;  %v2517_v6 = vrot.slane %v2287_v13, %v6482_v20  ;;  %v5866_v8 = vld [vmem:[%s7280_s28 + $0x10] sm:$0xff]   ;;  %v5867_v9 = vld [vmem:[%s7280_s28 + $0x18] sm:$0xff]  }
 0x4e1   : > { %v2409_v12 = vpack.c.bf16 %v2404_v29, %v2403_v10  ;;  %5574 = vmatpush3.bf16.msra.mxu0 %v5865_v5 }
 0x4e2   : > { %5575 = vmatprep.subr.bf16.mxu0 %v6103_v7 }
 0x4e3   : > { %5568 = vmatmul.mubr.msk.bf16.vlgmr.msra.gmra.mrb[16].mxu1 %vm1847_vm4, %v2409_v12 }
 0x4e4   : > { %5585 = vmatprep.mubr.msk.bf16.mxu1 %vm6104_vm3, %v6103_v7 }
 0x4e5   : > { %5576 = vmatpush3.bf16.msra.mxu0 %v5866_v8  ;;  %v2663_v8 = vrot.slane %v6592_v14, %v6482_v20 }
 0x4e6   : > { %5577 = vmatprep.subr.bf16.mxu0 %v6103_v7 }
 0x4e9   : > { %5578 = vmatpush3.bf16.msra.mxu0 %v5867_v9  ;;  %v2161_v9 = vrot.slane %v6500_v16, %v6482_v20  ;;  %v2295_v16 = vadd.f32 1.0, %v6536_v30 }
 0x5b6   : > { %v2466_v24 = vpop.f32.mrb[16].mxu1 }
 0x5b7   : > { %v2467_v25 = vadd.f32 %v5346_v23, %v2466_v24  ;;  %v5569_v26 = vpop.f32.mrb[17].mxu1 }
 0x5b8   : > { %v2469_v27 = vpop.f32.mrb[18].mxu1 }
 0x5b9   : > { %v2483_v28 = vmul.f32 %v2467_v25, %v2467_v25  ;;  %v2470_v31 = vadd.f32 %v5346_v23, %v2469_v27  ;;  %v5570_v32 = vpop.f32.mrb[19].mxu1  ;;  %v2473_v33 = vsel %vm1970_vm7, %v2467_v25, 0.0 }
 0x5ba   : > { %v5350_v32 = vld [vmem:[%s7281_s1] ss:$0 sm:$0xff]  ;;  %s7283_s1 = sld [smem:[#allocation33_spill]] }
 0x5bb   : > { %v2474_v34 = vsel %vm1970_vm7, %v2470_v31, 0.0  ;;  %v2484_v35 = vmul.f32 %v2470_v31, %v2470_v31  ;;  %v2485_v37 = vsel %vm1970_vm7, %v2483_v28, 0.0 }
 0x5bc   : > { %v2475_v36 = vadd.f32 %v2474_v34, %v2473_v33 }
 0x5bd   : > { %v2486_v38 = vsel %vm1970_vm7, %v2484_v35, 0.0 }
 0x5be   : > { %v2476_v39 = vrot.slane %v2475_v36, 4  ;;  %v2487_v40 = vadd.f32 %v2486_v38, %v2485_v37 }
 0x5c0   : > { %v2477_v41 = vadd.f32 %v2476_v39, %v2475_v36  ;;  %v2488_v42 = vrot.slane %v2487_v40, 4 }
 0x5c2   : > { %v2478_v43 = vrot.slane %v2477_v41, 2  ;;  %v2489_v45 = vadd.f32 %v2488_v42, %v2487_v40 }
 0x5c4   : > { %v2479_v46 = vadd.f32 %v2478_v43, %v2477_v41  ;;  %v2490_v48 = vrot.slane %v2489_v45, 2 }
 0x5c6   : > { %v2480_v49 = vrot.slane %v2479_v46, 1  ;;  %v2491_v50 = vadd.f32 %v2490_v48, %v2489_v45 }
 0x5c8   : > { %v2481_v51 = vadd.f32 %v2480_v49, %v2479_v46  ;;  %v2492_v52 = vrot.slane %v2491_v50, 1 }
 0x5ca   : > { %v2482_v53 = vmul.f32 0.0625, %v2481_v51  ;;  %v2493_v47 = vadd.f32 %v2492_v52, %v2491_v50 }
 0x5cc   : > { %v2494_v54 = vmul.f32 0.0625, %v2493_v47  ;;  %v2495_v55 = vmul.f32 %v2482_v53, %v2482_v53  ;;  %v2499_v56 = vsub.f32 %v2470_v31, %v2482_v53  ;;  %v2498_v44 = vsub.f32 %v2467_v25, %v2482_v53 }
 0x5ce   : > { %v2496_v60 = vsub.f32 %v2494_v54, %v2495_v55 }
 0x5d0   : > { %v2497_v61 = vmax.f32 %v2496_v60, 0.0 }
 0x5d2   : > { %v2500_v63 = vadd.f32 1e-05, %v2497_v61 }
 0x5d4   : > { %5920 = vrsqrt.f32 %v2500_v63 }
 0x5de   : > { %v5921_v0 = vpop.eup %5920 }
 0x5df   : > { %v2503_v2 = vmul.f32 %v5921_v0, %v2499_v56  ;;  %v2502_v58 = vmul.f32 %v5921_v0, %v2498_v44 }
 0x5e1   : > { %2508 = vrot.lane.b32.xlu1 %v2503_v2, %s7196_s23  ;;  %2506 = vrot.lane.b32.xlu0 %v2502_v58, %s7196_s23 }
 0x5e5   : > { %2519 = vrot.lane.b32.xlu0 %v2517_v6, %s7196_s23  ;;  %s7282_s23 = smov 96  }
 0x653   : > { %v2509_v10 = vpop.permute.xlu1 %2508  ;;  %v2507_v29 = vpop.permute.xlu0 %2506 }
 0x654   : > { %v2513_v12 = vmul.f32 %v2509_v10, %v6585_v62  ;;  %v2512_v13 = vmul.f32 %v2507_v29, %v6585_v62  ;;  %v2808_v10 = vld [vmem:[%s7283_s1 + $0x8] sm:$0xff] }
 0x655   : > { %v5359_v29 = vcombine.high %v2808_v10, %v2808_v10 }
 0x657   : > { %v6612_v15 = vpop.permute.xlu0 %2519  ;;  %5364 = vmatprep.subr.msk.bf16.mxu0 %vm1689_vm0, %v5359_v29 }
 0x658   : > { %v2522_v21 = vadd.f32 %v6612_v15, %v2512_v13  ;;  %v2523_v23 = vadd.f32 %v6612_v15, %v2513_v12  ;;  %v5358_v12 = vcombine.low %v2808_v10, %v2808_v10  ;;  %v2806_v13 = vld [vmem:[%s1664_s8] sm:$0x1]  ;;  %s7288_s8 = sld [smem:[#allocation23_spill]] }
 0x65a   : > { %vm2524_vm12 = vcmp.gt.f32.partialorder %v2522_v21, 0.0  ;;  %vm2525_vm13 = vcmp.gt.f32.partialorder %v2523_v23, 0.0  ;;  %v2526_v24 = vmul.f32 0.2, %v2522_v21  ;;  %v2527_v25 = vmul.f32 0.2, %v2523_v23 }
 0x65b   : > { %v2836_v14 = vsel %vm1689_vm0, %v5358_v12, 0 }
 0x65c   : > { %v2528_v26 = vsel %vm2524_vm12, %v2522_v21, %v2526_v24  ;;  %v2529_v27 = vsel %vm2525_vm13, %v2523_v23, %v2527_v25  ;;  %v5870_v21 = vld [vmem:[%s7285_s5] sm:$0xff]   ;;  %s7287_s5 = sld [smem:[#allocation22_spill]] }
 0x65d   : > { %v2538_v28 = vpack.c.bf16 %v2529_v27, %v2528_v26  ;;  %v1785_v26 = vadd.f32 1.0, %v6484_v22  ;;  %v2647_v27 = vrot.slane %v2295_v16, %v6482_v20 }
 0x65f   : > { %2547 = vrot.lane.b32.xlu1 %v2538_v28, %s7282_s23 }
 0x662   : > { %v5368_v12 = vld [vmem:[%s7287_s5] ss:$0 sm:$0xff] }
 0x6d1   : > { %v2548_v31 = vpop.permute.xlu1 %2547 }
 0x6d2   : > { %5580 = vmatmul.mubr.msk.bf16.vlgmr.msra.gmra.mrb[16].mxu0 %vm1970_vm7, %v2548_v31 }
 0x6d3   : > { %2920 = vmatprep.mubr.bf16.mxu0 %v6102_v3  ;;  %2889 = vmatpush1.bf16.msra.mxu0 %v2836_v14 }
 0x6d4   : > { %5589 = vmatprep.subr.bf16.mxu0 %v6103_v7 }
 0x7a5   : > { %v2610_v33 = vpop.f32.mrb[16].mxu0 }
 0x7a6   : > { %v2611_v34 = vadd.f32 %v5350_v32, %v2610_v33  ;;  %v5581_v35 = vpop.f32.mrb[17].mxu0 }
 0x7a7   : > { %v2613_v36 = vpop.f32.mrb[18].mxu0 }
 0x7a8   : > { %v2614_v37 = vadd.f32 %v5350_v32, %v2613_v36  ;;  %v5582_v38 = vpop.f32.mrb[19].mxu0  ;;  %v2625_v39 = vmul.f32 %v2611_v34, %v2611_v34 }
 0x7a9   : > { %v2145_v38 = vrot.slane %v1785_v26, %v6482_v20 }
 0x7aa   : > { %v2617_v40 = vadd.f32 %v2614_v37, %v2611_v34  ;;  %v2626_v41 = vmul.f32 %v2614_v37, %v2614_v37 }
 0x7ac   : > { %v2618_v42 = vrot.slane %v2617_v40, 4  ;;  %v2627_v43 = vadd.f32 %v2626_v41, %v2625_v39 }
 0x7ae   : > { %v2619_v45 = vadd.f32 %v2618_v42, %v2617_v40  ;;  %v2628_v46 = vrot.slane %v2627_v43, 4 }
 0x7b0   : > { %v2620_v48 = vrot.slane %v2619_v45, 2  ;;  %v2629_v49 = vadd.f32 %v2628_v46, %v2627_v43 }
 0x7b2   : > { %v2621_v50 = vadd.f32 %v2620_v48, %v2619_v45  ;;  %v2630_v51 = vrot.slane %v2629_v49, 2 }
 0x7b4   : > { %v2622_v52 = vrot.slane %v2621_v50, 1  ;;  %v2631_v53 = vadd.f32 %v2630_v51, %v2629_v49 }
 0x7b6   : > { %v2623_v47 = vadd.f32 %v2622_v52, %v2621_v50  ;;  %v2632_v54 = vrot.slane %v2631_v53, 1 }
 0x7b8   : > { %v2624_v55 = vmul.f32 0.0625, %v2623_v47  ;;  %v2633_v56 = vadd.f32 %v2632_v54, %v2631_v53 }
 0x7ba   : > { %v2634_v44 = vmul.f32 0.0625, %v2633_v56  ;;  %v2635_v60 = vmul.f32 %v2624_v55, %v2624_v55  ;;  %v2639_v61 = vsub.f32 %v2614_v37, %v2624_v55  ;;  %v2638_v63 = vsub.f32 %v2611_v34, %v2624_v55 }
 0x7bc   : > { %v2636_v0 = vsub.f32 %v2634_v44, %v2635_v60 }
 0x7be   : > { %v2637_v2 = vmax.f32 %v2636_v0, 0.0 }
 0x7c0   : > { %v2640_v58 = vadd.f32 1e-05, %v2637_v2 }
 0x7c2   : > { %5922 = vrsqrt.f32 %v2640_v58 }
 0x7cc   : > { %v5923_v4 = vpop.eup %5922 }
 0x7cd   : > { %v2643_v5 = vmul.f32 %v5923_v4, %v2639_v61  ;;  %v2642_v6 = vmul.f32 %v5923_v4, %v2638_v63 }
 0x7cf   : > { %2652 = vrot.lane.b32.xlu1 %v2643_v5, %s7282_s23  ;;  %2650 = vrot.lane.b32.xlu0 %v2642_v6, %s7282_s23 }
 0x7d3   : > { %2148 = vrot.lane.b32.xlu1 %v6579_v57, %s7282_s23  ;;  %2665 = vrot.lane.b32.xlu0 %v2663_v8, %s7286_s6  ;;  %v6637_v57 = vpack.c.bf16 %v2806_v13, %v2806_v13 }
 0x7d5   : > { %5365 = vmatmul.mubr.msk.bf16.vlgmr.msra.gmra.mrb[20].mxu0 %vm1685_vm1, %v6637_v57 }
 0x7d6   : > { %5590 = vmatpush3.bf16.msra.mxu0 %v5870_v21  ;;  %5591 = vmatprep.mubr.msk.bf16.mxu0 %vm6104_vm3, %v6103_v7 }
 0x7d7   : > { %2163 = vrot.lane.b32.xlu1 %v2161_v9, %s7286_s6  ;;  %2150 = vrot.lane.b32.xlu0 %v6581_v59, %s7282_s23 }
 0x7d8   : > { %5601 = vmatprep.subr.bf16.mxu0 %v6103_v7 }
 0x7dd   : > { %5592 = vmatmul.mubr.msk.bf16.vlgmr.msra.gmra.mrb[24].mxu0 %vm1802_vm2, %v6462_v11 }
 0x7de   : > { %5605 = vmatprep.mubr.msk.bf16.mxu0 %vm6104_vm3, %v6103_v7 }
 0x841   : > { %v2653_v59 = vpop.permute.xlu1 %2652  ;;  %v2651_v23 = vpop.permute.xlu0 %2650 }
 0x842   : > { %v2658_v24 = vmul.f32 %v2653_v59, %v6585_v62  ;;  %v2656_v25 = vmul.f32 %v2651_v23, %v6585_v62  ;;  %v2659_v32 = vmul.f32 %v2653_v59, %v2647_v27  ;;  %v2657_v36 = vmul.f32 %v2651_v23, %v2647_v27 }
 0x844   : > { %v2671_v28 = vadd.f32 %v2658_v24, %v6612_v15  ;;  %v2669_v31 = vadd.f32 %v2656_v25, %v6612_v15 }
 0x845   : > { %v2149_v33 = vpop.permute.xlu1 %2148  ;;  %v2666_v34 = vpop.permute.xlu0 %2665 }
 0x846   : > { %v2679_v35 = vmul.f32 0.2, %v2671_v28  ;;  %v2677_v30 = vmul.f32 0.2, %v2669_v31  ;;  %v2154_v37 = vmul.f32 %v2149_v33, %v6495_v1  ;;  %v2667_v62 = vsel %vm1847_vm4, %v6612_v15, %v2666_v34 }
 0x847   : > { %vm2673_vm14 = vcmp.gt.f32.partialorder %v2669_v31, 0.0  ;;  %vm2675_vm15 = vcmp.gt.f32.partialorder %v2671_v28, 0.0  ;;  %v2670_v39 = vadd.f32 %v2667_v62, %v2657_v36  ;;  %v2672_v40 = vadd.f32 %v2667_v62, %v2659_v32 }
 0x848   : > { %v2167_v22 = vadd.f32 %v2154_v37, %v6529_v18  ;;  %v2681_v41 = vsel %vm2673_vm14, %v2669_v31, %v2677_v30  ;;  %v2155_v42 = vmul.f32 %v2149_v33, %v2145_v38  ;;  %v2683_v46 = vsel %vm2675_vm15, %v2671_v28, %v2679_v35  ;;  %v2807_v33 = vld [vmem:[%s7283_s1] sm:$0xff] }
 0x849   : > { %v2164_v43 = vpop.permute.xlu1 %2163  ;;  %v2151_v45 = vpop.permute.xlu0 %2150  ;;  %v2678_v48 = vmul.f32 0.2, %v2670_v39  ;;  %v2680_v49 = vmul.f32 0.2, %v2672_v40  ;;  %v2687_v53 = vpack.c.bf16 %v2683_v46, %v2681_v41  ;;  %vm2674_vm5 = vcmp.gt.f32.partialorder %v2670_v39, 0.0 }
 0x84a   : > { %v2165_v50 = vsel %vm1847_vm4, %v6529_v18, %v2164_v43  ;;  %v2156_v52 = vmul.f32 %v2151_v45, %v6495_v1  ;;  %v2157_v15 = vmul.f32 %v2151_v45, %v2145_v38  ;;  %v2175_v47 = vmul.f32 0.2, %v2167_v22 }
 0x84b   : > { %v2168_v51 = vadd.f32 %v2165_v50, %v2155_v42  ;;  %vm2676_vm6 = vcmp.gt.f32.partialorder %v2672_v40, 0.0  ;;  %2700 = vrot.lane.b32.xlu0 %v2687_v53, %s7286_s6  ;;  %v2682_v44 = vsel %vm2674_vm5, %v2670_v39, %v2678_v48  ;;  %vm2171_vm9 = vcmp.gt.f32.partialorder %v2167_v22, 0.0 }
 0x84c   : > { %v2169_v55 = vadd.f32 %v2156_v52, %v6529_v18  ;;  %v2170_v56 = vadd.f32 %v2165_v50, %v2157_v15  ;;  %v2684_v60 = vsel %vm2676_vm6, %v2672_v40, %v2680_v49  ;;  %v2179_v58 = vsel %vm2171_vm9, %v2167_v22, %v2175_v47 }
 0x84d   : > { %v2176_v54 = vmul.f32 0.2, %v2168_v51  ;;  %vm2172_vm8 = vcmp.gt.f32.partialorder %v2168_v51, 0.0  ;;  %v2688_v0 = vpack.c.bf16 %v2684_v60, %v2682_v44  ;;  %v5357_v37 = vcombine.high %v2807_v33, %v2807_v33 }
 0x84e   : > { %v2177_v61 = vmul.f32 0.2, %v2169_v55  ;;  %v2178_v63 = vmul.f32 0.2, %v2170_v56  ;;  %vm2174_vm10 = vcmp.gt.f32.partialorder %v2170_v56, 0.0  ;;  %vm2173_vm11 = vcmp.gt.f32.partialorder %v2169_v55, 0.0 }
 0x84f   : > { %v2180_v1 = vsel %vm2172_vm8, %v2168_v51, %v2176_v54  ;;  %2702 = vrot.lane.b32.xlu1 %v2688_v0, %s7286_s6  ;;  %v5356_v43 = vcombine.low %v2807_v33, %v2807_v33 }
 0x850   : > { %v2182_v2 = vsel %vm2174_vm10, %v2170_v56, %v2178_v63  ;;  %v2181_v4 = vsel %vm2173_vm11, %v2169_v55, %v2177_v61 }
 0x851   : > { %v2686_v18 = vpack.c.bf16 %v2182_v2, %v2180_v1  ;;  %v2685_v5 = vpack.c.bf16 %v2181_v4, %v2179_v58  ;;  %v2830_v52 = vsel %vm1689_vm0, %v5356_v43, 0  ;;  %v2809_v58 = vld [vmem:[%s7283_s1 + $0x10] sm:$0xff]  ;;  %s7294_s1 = sld [smem:[#allocation28_spill]] }
 0x852   : > { %v5361_v4 = vcombine.high %v2809_v58, %v2809_v58 }
 0x853   : > { %2691 = vrot.lane.b32.xlu0 %v2685_v5, %s7286_s6  ;;  %2693 = vrot.lane.b32.xlu1 %v2686_v18, %s7286_s6  ;;  %v5360_v18 = vcombine.low %v2809_v58, %v2809_v58  ;;  %s6702_s6 = sand.u32 1, %s6038_s16  }
 0x854   : > { %s7199_s23 = sshll.u32 %s6702_s6, 4 }
 0x855   : > { %v2842_v5 = vsel %vm1689_vm0, %v5360_v18, 0  ;;  %s6709_s5 = scalar_lea.vmem [#allocation2], %s7199_s23  ;;  %s7202_s23 = smov 16  }
 0x8a8   : > { %v6670_v6 = vpop.f32.mrb[20].mxu0 }
 0x8a9   : > { %v3069_v8 = vrot.slane %v6670_v6, %v6482_v20  ;;  %v6674_v9 = vpop.f32.mrb[21].mxu0 }
 0x8aa   : > { %v2926_v10 = vpop.f32.mrb[22].mxu0 }
 0x8ab   : > { %v2927_v29 = vpop.f32.mrb[23].mxu0  ;;  %3071 = vrot.lane.b32.xlu0 %v3069_v8, %s7200_s3  ;;  %v5875_v8 = vld [vmem:[%s7288_s8] sm:$0xff]   ;;  %s7289_s8 = sld [smem:[#allocation24_spill]]  ;;  %s7291_s3 = sld [smem:[#allocation26_spill]] }
 0x8b0   : > { %v3022_v13 = vpop.f32.mrb[24].mxu0 }
 0x8b1   : > { %v3023_v14 = vadd.f32 %v5368_v12, %v3022_v13  ;;  %v5593_v21 = vpop.f32.mrb[25].mxu0 }
 0x8b2   : > { %v3025_v16 = vpop.f32.mrb[26].mxu0 }
 0x8b3   : > { %v3029_v59 = vsel %vm1802_vm2, %v3023_v14, 0.0  ;;  %v3039_v23 = vmul.f32 %v3023_v14, %v3023_v14  ;;  %v3026_v24 = vadd.f32 %v5368_v12, %v3025_v16  ;;  %v5594_v25 = vpop.f32.mrb[27].mxu0 }
 0x8b5   : > { %v3041_v26 = vsel %vm1802_vm2, %v3039_v23, 0.0  ;;  %v3030_v27 = vsel %vm1802_vm2, %v3026_v24, 0.0  ;;  %v3040_v28 = vmul.f32 %v3026_v24, %v3026_v24 }
 0x8b6   : > { %v3031_v31 = vadd.f32 %v3030_v27, %v3029_v59 }
 0x8b7   : > { %v3042_v32 = vsel %vm1802_vm2, %v3040_v28, 0.0 }
 0x8b8   : > { %v3032_v34 = vrot.slane %v3031_v31, 4  ;;  %v3043_v35 = vadd.f32 %v3042_v32, %v3041_v26 }
 0x8ba   : > { %v3033_v36 = vadd.f32 %v3032_v34, %v3031_v31  ;;  %v3044_v30 = vrot.slane %v3043_v35, 4 }
 0x8bc   : > { %v3034_v22 = vrot.slane %v3033_v36, 2  ;;  %v3045_v39 = vadd.f32 %v3044_v30, %v3043_v35 }
 0x8bd   : > { %v2701_v38 = vpop.permute.xlu0 %2700 }
 0x8be   : > { %v3035_v41 = vadd.f32 %v3034_v22, %v3033_v36  ;;  %v3046_v42 = vrot.slane %v3045_v39, 2 }
 0x8c0   : > { %v3036_v45 = vrot.slane %v3035_v41, 1  ;;  %v3047_v46 = vadd.f32 %v3046_v42, %v3045_v39 }
 0x8c1   : > { %v2703_v62 = vpop.permute.xlu1 %2702 }
 0x8c2   : > { %v2704_v40 = vsel %vm1847_vm4, %v2701_v38, %v2703_v62  ;;  %v3037_v50 = vadd.f32 %v3036_v45, %v3035_v41  ;;  %v3048_v51 = vrot.slane %v3047_v46, 1  ;;  %v5371_v62 = vld [vmem:[%s7289_s8] ss:$0 sm:$0xff]  ;;  %s7290_s8 = sld [smem:[#allocation25_spill]] }
 0x8c3   : > { %5584 = vmatpush3.bf16.xpose.msra.mxu1 %v2704_v40 }
 0x8c4   : > { %5362 = vmatprep.subr.msk.bf16.mxu1 %vm1689_vm0, %v5357_v37  ;;  %v3038_v53 = vmul.f32 0.0625, %v3037_v50  ;;  %v3049_v47 = vadd.f32 %v3048_v51, %v3047_v46 }
 0x8c5   : > { %v2694_v48 = vpop.permute.xlu1 %2693  ;;  %v2692_v49 = vpop.permute.xlu0 %2691 }
 0x8c6   : > { %v2696_v15 = vsel %vm1847_vm4, %v2692_v49, %v2694_v48  ;;  %v3050_v54 = vmul.f32 0.0625, %v3049_v47  ;;  %v3051_v55 = vmul.f32 %v3038_v53, %v3038_v53  ;;  %v3055_v56 = vsub.f32 %v3026_v24, %v3038_v53 }
 0x8c7   : > { %v3054_v1 = vsub.f32 %v3023_v14, %v3038_v53 }
 0x8c8   : > { %v3052_v44 = vsub.f32 %v3050_v54, %v3051_v55 }
 0x8ca   : > { %5586 = vmatmul.mubr.bf16.vlgmr.msra.gmra.mrb[20].mxu1 %v2696_v15  ;;  %v3053_v60 = vmax.f32 %v3052_v44, 0.0 }
 0x8cb   : > { %2848 = vmatpush1.bf16.msra.mxu1 %v2830_v52  ;;  %2879 = vmatprep.mubr.bf16.mxu1 %v6102_v3 }
 0x8cc   : > { %v3056_v61 = vadd.f32 1e-05, %v3053_v60  ;;  %5366 = vmatprep.subr.msk.bf16.mxu1 %vm1689_vm0, %v5361_v4 }
 0x8ce   : > { %5924 = vrsqrt.f32 %v3056_v61 }
 0x8d2   : > { %5363 = vmatmul.mubr.msk.bf16.vlgmr.msra.gmra.mrb[24].mxu1 %vm1685_vm1, %v6637_v57 }
 0x8d3   : > { %2961 = vmatprep.mubr.bf16.mxu1 %v6102_v3  ;;  %2930 = vmatpush1.bf16.msra.mxu1 %v2842_v5 }
 0x8d4   : > { %5595 = vmatprep.subr.bf16.mxu1 %v6103_v7 }
 0x8d8   : > { %v5925_v63 = vpop.eup %5924 }
 0x8d9   : > { %v3059_v0 = vmul.f32 %v5925_v63, %v3055_v56  ;;  %v3058_v2 = vmul.f32 %v5925_v63, %v3054_v1 }
 0x8da   : > { %5367 = vmatmul.mubr.msk.bf16.vlgmr.msra.gmra.mrb[28].mxu1 %vm1685_vm1, %v6637_v57 }
 0x8db   : > { %5597 = vmatprep.mubr.msk.bf16.mxu1 %vm6104_vm3, %v6103_v7  ;;  %5596 = vmatpush3.bf16.msra.mxu1 %v5875_v8 }
 0x8dc   : > { %5609 = vmatprep.subr.bf16.mxu1 %v6103_v7 }
 0x91d   : > { %v6724_v24 = vpop.permute.xlu0 %3071 }
 0x99d   : > { %v6705_v10 = vpop.f32.mrb[20].mxu1 }
 0x99e   : > { %5083 = vst.msk [vmem:[%s6709_s5] sm:$0xff] %vm1802_vm2, %v6705_v10  ;;  %v5587_v57 = vpop.f32.mrb[21].mxu1 }
 0x99f   : > { %v6714_v29 = vpop.f32.mrb[22].mxu1 }
 0x9a0   : > { %5084 = vst.msk [vmem:[%s6709_s5 + $0x8] sm:$0xff] %vm1802_vm2, %v6714_v29  ;;  %v5588_v12 = vpop.f32.mrb[23].mxu1 }
 0x9a5   : > { %v2881_v13 = vpop.f32.mrb[24].mxu1 }
 0x9a6   : > { %v2970_v14 = vadd.f32 1.0, %v2881_v13  ;;  %v6719_v21 = vpop.f32.mrb[25].mxu1 }
 0x9a7   : > { %v2885_v16 = vpop.f32.mrb[26].mxu1 }
 0x9a8   : > { %v6722_v59 = vrot.slane %v2970_v14, %v6482_v20  ;;  %v2886_v23 = vpop.f32.mrb[27].mxu1  ;;  %v5876_v14 = vld [vmem:[%s7290_s8] sm:$0xff]  }
 0x9a9   : > { %5602 = vmatpush3.bf16.msra.mxu0 %v5876_v14 }
 0x9aa   : > { %v3064_v25 = vmul.f32 %v6722_v59, %v3058_v2  ;;  %v3065_v26 = vmul.f32 %v6722_v59, %v3059_v0  ;;  %5603 = vmatprep.subr.bf16.mxu0 %v6103_v7 }
 0x9ac   : > { %v3074_v27 = vadd.f32 %v6724_v24, %v3064_v25  ;;  %v3075_v28 = vadd.f32 %v6724_v24, %v3065_v26  ;;  %v5877_v26 = vld [vmem:[%s7290_s8 + $0x8] sm:$0xff]   ;;  %s7299_s8 = sld [smem:[#allocation46_spill]] }
 0x9ad   : > { %v6733_v36 = vpop.f32.mrb[28].mxu1  ;;  %5604 = vmatpush3.bf16.msra.mxu0 %v5877_v26 }
 0x9ae   : > { %vm3076_vm12 = vcmp.gt.f32.partialorder %v3074_v27, 0.0  ;;  %vm3077_vm13 = vcmp.gt.f32.partialorder %v3075_v28, 0.0  ;;  %v3078_v31 = vmul.f32 0.2, %v3074_v27  ;;  %v3079_v32 = vmul.f32 0.2, %v3075_v28  ;;  %5617 = vmatprep.subr.bf16.mxu0 %v6103_v7 }
 0x9af   : > { %v6735_v30 = vpop.f32.mrb[29].mxu1 }
 0x9b0   : > { %v3080_v33 = vsel %vm3076_vm12, %v3074_v27, %v3078_v31  ;;  %v3081_v34 = vsel %vm3077_vm13, %v3075_v28, %v3079_v32  ;;  %v2967_v37 = vpop.f32.mrb[30].mxu1  ;;  %vm3476_vm12 = vcmask 392192  }
 0x9b1   : > { %v3084_v35 = vpack.c.bf16 %v3081_v34, %v3080_v33  ;;  %v2968_v38 = vpop.f32.mrb[31].mxu1 }
 0x9b3   : > { %5598 = vmatmul.mubr.msk.bf16.vlgmr.msra.gmra.mrb[32].mxu1 %vm1802_vm2, %v3084_v35 }
 0x9b4   : > { %5613 = vmatprep.mubr.msk.bf16.mxu1 %vm6104_vm3, %v6103_v7 }
 0xa86   : > { %v3135_v22 = vpop.f32.mrb[32].mxu1 }
 0xa87   : > { %v3136_v39 = vadd.f32 %v5371_v62, %v3135_v22  ;;  %v5599_v40 = vpop.f32.mrb[33].mxu1 }
 0xa88   : > { %v3138_v41 = vpop.f32.mrb[34].mxu1  ;;  %v5374_v40 = vld [vmem:[%s7291_s3] ss:$0 sm:$0xff]  ;;  %s7292_s3 = sld [smem:[#allocation27_spill]] }
 0xa89   : > { %v3152_v42 = vmul.f32 %v3136_v39, %v3136_v39  ;;  %v3139_v43 = vadd.f32 %v5371_v62, %v3138_v41  ;;  %v5600_v45 = vpop.f32.mrb[35].mxu1  ;;  %v3142_v46 = vsel %vm1847_vm4, %v3136_v39, 0.0 }
 0xa8b   : > { %v3143_v48 = vsel %vm1847_vm4, %v3139_v43, 0.0  ;;  %v3153_v49 = vmul.f32 %v3139_v43, %v3139_v43  ;;  %v3154_v51 = vsel %vm1847_vm4, %v3152_v42, 0.0 }
 0xa8c   : > { %v3144_v50 = vadd.f32 %v3143_v48, %v3142_v46 }
 0xa8d   : > { %v3155_v52 = vsel %vm1847_vm4, %v3153_v49, 0.0 }
 0xa8e   : > { %v3145_v15 = vrot.slane %v3144_v50, 4  ;;  %v3156_v53 = vadd.f32 %v3155_v52, %v3154_v51 }
 0xa90   : > { %v3146_v47 = vadd.f32 %v3145_v15, %v3144_v50  ;;  %v3157_v54 = vrot.slane %v3156_v53, 4 }
 0xa92   : > { %v3147_v55 = vrot.slane %v3146_v47, 2  ;;  %v3158_v56 = vadd.f32 %v3157_v54, %v3156_v53 }
 0xa94   : > { %v3148_v44 = vadd.f32 %v3147_v55, %v3146_v47  ;;  %v3159_v60 = vrot.slane %v3158_v56, 2 }
 0xa96   : > { %v3149_v61 = vrot.slane %v3148_v44, 1  ;;  %v3160_v63 = vadd.f32 %v3159_v60, %v3158_v56 }
 0xa98   : > { %v3150_v0 = vadd.f32 %v3149_v61, %v3148_v44  ;;  %v3161_v1 = vrot.slane %v3160_v63, 1 }
 0xa9a   : > { %v3151_v2 = vmul.f32 0.0625, %v3150_v0  ;;  %v3162_v58 = vadd.f32 %v3161_v1, %v3160_v63 }
 0xa9c   : > { %v3163_v4 = vmul.f32 0.0625, %v3162_v58  ;;  %v3164_v18 = vmul.f32 %v3151_v2, %v3151_v2  ;;  %v3168_v5 = vsub.f32 %v3139_v43, %v3151_v2  ;;  %v3167_v8 = vsub.f32 %v3136_v39, %v3151_v2 }
 0xa9e   : > { %v3165_v57 = vsub.f32 %v3163_v4, %v3164_v18 }
 0xaa0   : > { %v3166_v12 = vmax.f32 %v3165_v57, 0.0 }
 0xaa2   : > { %v3169_v13 = vadd.f32 1e-05, %v3166_v12 }
 0xaa4   : > { %5926 = vrsqrt.f32 %v3169_v13 }
 0xaae   : > { %v5927_v16 = vpop.eup %5926 }
 0xaaf   : > { %v3172_v23 = vmul.f32 %v5927_v16, %v3168_v5  ;;  %v3171_v25 = vmul.f32 %v5927_v16, %v3167_v8 }
 0xab1   : > { %3177 = vrot.lane.b32.xlu0 %v3172_v23, %s7202_s23  ;;  %3175 = vrot.lane.b32.xlu1 %v3171_v25, %s7202_s23  ;;  %s7204_s23 = smov 112  }
 0xb23   : > { %v3178_v27 = vpop.permute.xlu0 %3177  ;;  %v3176_v28 = vpop.permute.xlu1 %3175 }
 0xb24   : > { %v3182_v31 = vmul.f32 %v3178_v27, %v6722_v59  ;;  %v3181_v32 = vmul.f32 %v3176_v28, %v6722_v59  ;;  %v5878_v27 = vld [vmem:[%s7292_s3] sm:$0xff]   ;;  %v5879_v28 = vld [vmem:[%s7292_s3 + $0x8] sm:$0xff]   ;;  %s7208_s3 = smov 80  }
 0xb25   : > { %5610 = vmatpush3.bf16.msra.mxu1 %v5878_v27 }
 0xb26   : > { %v3184_v33 = vadd.f32 %v3182_v31, %v6724_v24  ;;  %v3183_v34 = vadd.f32 %v3181_v32, %v6724_v24  ;;  %v3306_v31 = vrot.slane %v6674_v9, %v6482_v20  ;;  %5611 = vmatprep.subr.bf16.mxu1 %v6103_v7 }
 0xb28   : > { %vm3186_vm14 = vcmp.gt.f32.partialorder %v3184_v33, 0.0  ;;  %v3188_v35 = vmul.f32 0.2, %v3184_v33  ;;  %vm3185_vm15 = vcmp.gt.f32.partialorder %v3183_v34, 0.0  ;;  %v3187_v37 = vmul.f32 0.2, %v3183_v34 }
 0xb29   : > { %5612 = vmatpush3.bf16.msra.mxu1 %v5879_v28 }
 0xb2a   : > { %v3189_v38 = vsel %vm3185_vm15, %v3183_v34, %v3187_v37  ;;  %v3190_v62 = vsel %vm3186_vm14, %v3184_v33, %v3188_v35  ;;  %5629 = vmatprep.subr.bf16.mxu1 %v6103_v7 }
 0xb2b   : > { %v3195_v22 = vpack.c.bf16 %v3190_v62, %v3189_v38 }
 0xb2d   : > { %3204 = vrot.lane.b32.xlu1 %v3195_v22, %s7204_s23  ;;  %s7293_s23 = smov 48  }
 0xb9f   : > { %v3205_v39 = vpop.permute.xlu1 %3204 }
 0xba0   : > { %5606 = vmatmul.mubr.msk.bf16.vlgmr.msra.gmra.mrb[28].mxu0 %vm1847_vm4, %v3205_v39 }
 0xba1   : > { %5625 = vmatprep.mubr.msk.bf16.mxu0 %vm6104_vm3, %v6103_v7 }
 0xc73   : > { %v3255_v41 = vpop.f32.mrb[28].mxu0 }
 0xc74   : > { %v3256_v42 = vadd.f32 %v5374_v40, %v3255_v41  ;;  %v5607_v24 = vpop.f32.mrb[29].mxu0 }
 0xc75   : > { %v3258_v43 = vpop.f32.mrb[30].mxu0  ;;  %v5378_v24 = vld [vmem:[%s7294_s1] ss:$0 sm:$0xff]  ;;  %s7295_s1 = sld [smem:[#allocation29_spill]] }
 0xc76   : > { %v3272_v45 = vmul.f32 %v3256_v42, %v3256_v42  ;;  %v3259_v46 = vadd.f32 %v5374_v40, %v3258_v43  ;;  %v5608_v48 = vpop.f32.mrb[31].mxu0  ;;  %v3262_v49 = vsel %vm1847_vm4, %v3256_v42, 0.0 }
 0xc78   : > { %v3263_v50 = vsel %vm1847_vm4, %v3259_v46, 0.0  ;;  %v3273_v51 = vmul.f32 %v3259_v46, %v3259_v46  ;;  %v3274_v15 = vsel %vm1847_vm4, %v3272_v45, 0.0 }
 0xc79   : > { %v3264_v52 = vadd.f32 %v3263_v50, %v3262_v49 }
 0xc7a   : > { %v3275_v53 = vsel %vm1847_vm4, %v3273_v51, 0.0 }
 0xc7b   : > { %v3265_v47 = vrot.slane %v3264_v52, 4  ;;  %v3276_v54 = vadd.f32 %v3275_v53, %v3274_v15  ;;  %v5880_v28 = vld [vmem:[%s7295_s1] sm:$0xff]  }
 0xc7c   : > { %5618 = vmatpush3.bf16.msra.mxu0 %v5880_v28 }
 0xc7d   : > { %v3266_v55 = vadd.f32 %v3265_v47, %v3264_v52  ;;  %v3277_v56 = vrot.slane %v3276_v54, 4  ;;  %5619 = vmatprep.subr.bf16.mxu0 %v6103_v7 }
 0xc7f   : > { %v3267_v44 = vrot.slane %v3266_v55, 2  ;;  %v3278_v60 = vadd.f32 %v3277_v56, %v3276_v54 }
 0xc81   : > { %v3268_v61 = vadd.f32 %v3267_v44, %v3266_v55  ;;  %v3279_v63 = vrot.slane %v3278_v60, 2 }
 0xc83   : > { %v3269_v0 = vrot.slane %v3268_v61, 1  ;;  %v3280_v1 = vadd.f32 %v3279_v63, %v3278_v60 }
 0xc85   : > { %v3270_v2 = vadd.f32 %v3269_v0, %v3268_v61  ;;  %v3281_v58 = vrot.slane %v3280_v1, 1 }
 0xc87   : > { %v3271_v4 = vmul.f32 0.0625, %v3270_v2  ;;  %v3282_v18 = vadd.f32 %v3281_v58, %v3280_v1 }
 0xc89   : > { %v3283_v5 = vmul.f32 0.0625, %v3282_v18  ;;  %v3284_v8 = vmul.f32 %v3271_v4, %v3271_v4  ;;  %v3288_v57 = vsub.f32 %v3259_v46, %v3271_v4  ;;  %v3287_v12 = vsub.f32 %v3256_v42, %v3271_v4 }
 0xc8b   : > { %v3285_v13 = vsub.f32 %v3283_v5, %v3284_v8 }
 0xc8d   : > { %v3286_v14 = vmax.f32 %v3285_v13, 0.0 }
 0xc8f   : > { %v3289_v16 = vadd.f32 1e-05, %v3286_v14 }
 0xc91   : > { %5928 = vrsqrt.f32 %v3289_v16 }
 0xc9b   : > { %v5929_v23 = vpop.eup %5928 }
 0xc9c   : > { %v3292_v25 = vmul.f32 %v5929_v23, %v3288_v57  ;;  %v3291_v26 = vmul.f32 %v5929_v23, %v3287_v12 }
 0xc9e   : > { %3297 = vrot.lane.b32.xlu1 %v3292_v25, %s7293_s23  ;;  %3295 = vrot.lane.b32.xlu0 %v3291_v26, %s7293_s23 }
 0xca2   : > { %3308 = vrot.lane.b32.xlu0 %v3306_v31, %s7293_s23 }
 0xd10   : > { %v3298_v32 = vpop.permute.xlu1 %3297  ;;  %v3296_v33 = vpop.permute.xlu0 %3295 }
 0xd11   : > { %v3302_v34 = vmul.f32 %v3298_v32, %v6722_v59  ;;  %v3301_v35 = vmul.f32 %v3296_v33, %v6722_v59  ;;  %v5881_v33 = vld [vmem:[%s7295_s1 + $0x8] sm:$0xff]  }
 0xd12   : > { %5620 = vmatpush3.bf16.msra.mxu0 %v5881_v33 }
 0xd13   : > { %5621 = vmatprep.subr.bf16.mxu0 %v6103_v7 }
 0xd14   : > { %v6772_v37 = vpop.permute.xlu0 %3308 }
 0xd15   : > { %v3311_v38 = vadd.f32 %v6772_v37, %v3301_v35  ;;  %v3312_v9 = vadd.f32 %v6772_v37, %v3302_v34  ;;  %v5882_v34 = vld [vmem:[%s7295_s1 + $0x10] sm:$0xff]   ;;  %v5883_v35 = vld [vmem:[%s7295_s1 + $0x18] sm:$0xff]   ;;  %s7298_s1 = smov 16  }
 0xd16   : > { %5622 = vmatpush3.bf16.msra.mxu0 %v5882_v34 }
 0xd17   : > { %vm3313_vm5 = vcmp.gt.f32.partialorder %v3311_v38, 0.0  ;;  %vm3314_vm6 = vcmp.gt.f32.partialorder %v3312_v9, 0.0  ;;  %v3315_v62 = vmul.f32 0.2, %v3311_v38  ;;  %v3316_v22 = vmul.f32 0.2, %v3312_v9  ;;  %5623 = vmatprep.subr.bf16.mxu0 %v6103_v7 }
 0xd19   : > { %v3317_v39 = vsel %vm3313_vm5, %v3311_v38, %v3315_v62  ;;  %v3318_v40 = vsel %vm3314_vm6, %v3312_v9, %v3316_v22  ;;  %v2971_v38 = vadd.f32 1.0, %v6719_v21 }
 0xd1a   : > { %v3323_v41 = vpack.c.bf16 %v3318_v40, %v3317_v39  ;;  %5624 = vmatpush3.bf16.msra.mxu0 %v5883_v35 }
 0xd1b   : > { %v6796_v9 = vrot.slane %v2971_v38, %v6482_v20 }
 0xd1c   : > { %3332 = vrot.lane.b32.xlu1 %v3323_v41, %s7208_s3 }
 0xd8e   : > { %v3333_v42 = vpop.permute.xlu1 %3332 }
 0xd8f   : > { %5614 = vmatmul.mubr.msk.bf16.vlgmr.msra.gmra.mrb[36].mxu1 %vm1847_vm4, %v3333_v42 }
 0xd90   : > { %5637 = vmatprep.mubr.msk.bf16.mxu1 %vm6104_vm3, %v6103_v7 }
 0xe62   : > { %v3383_v43 = vpop.f32.mrb[36].mxu1 }
 0xe63   : > { %v3384_v45 = vadd.f32 %v5378_v24, %v3383_v43  ;;  %v5615_v46 = vpop.f32.mrb[37].mxu1 }
 0xe64   : > { %v3386_v48 = vpop.f32.mrb[38].mxu1 }
 0xe65   : > { %v3400_v49 = vmul.f32 %v3384_v45, %v3384_v45  ;;  %v3387_v50 = vadd.f32 %v5378_v24, %v3386_v48  ;;  %v5616_v51 = vpop.f32.mrb[39].mxu1  ;;  %v3390_v52 = vsel %vm1970_vm7, %v3384_v45, 0.0 }
 0xe67   : > { %v3391_v15 = vsel %vm1970_vm7, %v3387_v50, 0.0  ;;  %v3401_v53 = vmul.f32 %v3387_v50, %v3387_v50  ;;  %v3402_v54 = vsel %vm1970_vm7, %v3400_v49, 0.0 }
 0xe68   : > { %v3392_v47 = vadd.f32 %v3391_v15, %v3390_v52 }
 0xe69   : > { %v3403_v55 = vsel %vm1970_vm7, %v3401_v53, 0.0 }
 0xe6a   : > { %v3393_v56 = vrot.slane %v3392_v47, 4  ;;  %v3404_v44 = vadd.f32 %v3403_v55, %v3402_v54 }
 0xe6c   : > { %v3394_v60 = vadd.f32 %v3393_v56, %v3392_v47  ;;  %v3405_v61 = vrot.slane %v3404_v44, 4 }
 0xe6e   : > { %v3395_v63 = vrot.slane %v3394_v60, 2  ;;  %v3406_v0 = vadd.f32 %v3405_v61, %v3404_v44 }
 0xe70   : > { %v3396_v1 = vadd.f32 %v3395_v63, %v3394_v60  ;;  %v3407_v2 = vrot.slane %v3406_v0, 2 }
 0xe72   : > { %v3397_v58 = vrot.slane %v3396_v1, 1  ;;  %v3408_v4 = vadd.f32 %v3407_v2, %v3406_v0 }
 0xe74   : > { %v3398_v18 = vadd.f32 %v3397_v58, %v3396_v1  ;;  %v3409_v5 = vrot.slane %v3408_v4, 1 }
 0xe76   : > { %v3399_v8 = vmul.f32 0.0625, %v3398_v18  ;;  %v3410_v57 = vadd.f32 %v3409_v5, %v3408_v4 }
 0xe78   : > { %v3411_v12 = vmul.f32 0.0625, %v3410_v57  ;;  %v3412_v13 = vmul.f32 %v3399_v8, %v3399_v8  ;;  %v3416_v14 = vsub.f32 %v3387_v50, %v3399_v8  ;;  %v3415_v16 = vsub.f32 %v3384_v45, %v3399_v8 }
 0xe7a   : > { %v3413_v23 = vsub.f32 %v3411_v12, %v3412_v13 }
 0xe7c   : > { %v3414_v25 = vmax.f32 %v3413_v23, 0.0 }
 0xe7e   : > { %v3417_v26 = vadd.f32 1e-05, %v3414_v25 }
 0xe80   : > { %5930 = vrsqrt.f32 %v3417_v26 }
 0xe8a   : > { %v5931_v27 = vpop.eup %5930 }
 0xe8b   : > { %v3420_v31 = vmul.f32 %v5931_v27, %v3416_v14  ;;  %v3419_v32 = vmul.f32 %v5931_v27, %v3415_v16 }
 0xe8d   : > { %3429 = vrot.lane.b32.xlu1 %v3420_v31, %s7208_s3  ;;  %3427 = vrot.lane.b32.xlu0 %v3419_v32, %s7208_s3  ;;  %s7296_s3 = sld [smem:[#allocation30_spill]] }
 0xe93   : > { %v5382_v44 = vld [vmem:[%s7296_s3] ss:$0 sm:$0xff]  ;;  %s7297_s3 = sld [smem:[#allocation31_spill]] }
 0xeff   : > { %v3430_v62 = vpop.permute.xlu1 %3429  ;;  %v3428_v22 = vpop.permute.xlu0 %3427 }
 0xf00   : > { %v3435_v39 = vmul.f32 %v3430_v62, %v6722_v59  ;;  %v3436_v40 = vmul.f32 %v3430_v62, %v6796_v9  ;;  %v3433_v41 = vmul.f32 %v3428_v22, %v6722_v59  ;;  %v3434_v42 = vmul.f32 %v3428_v22, %v6796_v9 }
 0xf02   : > { %v3439_v24 = vadd.f32 %v3435_v39, %v6772_v37  ;;  %v3440_v43 = vadd.f32 %v3436_v40, %v6772_v37  ;;  %v3437_v45 = vadd.f32 %v3433_v41, %v6772_v37  ;;  %v3438_v21 = vadd.f32 %v3434_v42, %v6772_v37 }
 0xf04   : > { %v3447_v46 = vmul.f32 0.2, %v3439_v24  ;;  %v3448_v48 = vmul.f32 0.2, %v3440_v43  ;;  %v3445_v49 = vmul.f32 0.2, %v3437_v45 }
 0xf05   : > { %v3446_v50 = vmul.f32 0.2, %v3438_v21  ;;  %vm3442_vm8 = vcmp.gt.f32.partialorder %v3438_v21, 0.0  ;;  %vm3444_vm9 = vcmp.gt.f32.partialorder %v3440_v43, 0.0  ;;  %vm3441_vm10 = vcmp.gt.f32.partialorder %v3437_v45, 0.0 }
 0xf06   : > { %v3452_v51 = vsel %vm3444_vm9, %v3440_v43, %v3448_v48  ;;  %vm3443_vm11 = vcmp.gt.f32.partialorder %v3439_v24, 0.0  ;;  %v3449_v59 = vsel %vm3441_vm10, %v3437_v45, %v3445_v49  ;;  %v5885_v48 = vld [vmem:[%s7297_s3 + $0x8] sm:$0xff]   ;;  %v3590_v49 = vrot.slane %v6733_v36, %v6482_v20 }
 0xf07   : > { %v3450_v52 = vsel %vm3442_vm8, %v3438_v21, %v3446_v50  ;;  %v3451_v15 = vsel %vm3443_vm11, %v3439_v24, %v3447_v46  ;;  %v5884_v46 = vld [vmem:[%s7297_s3] sm:$0xff]   ;;  %v5886_v50 = vld [vmem:[%s7297_s3 + $0x10] sm:$0xff]  }
 0xf08   : > { %v3462_v53 = vpack.c.bf16 %v3452_v51, %v3450_v52  ;;  %v3461_v47 = vpack.c.bf16 %v3451_v15, %v3449_v59  ;;  %5630 = vmatpush3.bf16.msra.mxu1 %v5884_v46  ;;  %v5887_v51 = vld [vmem:[%s7297_s3 + $0x18] sm:$0xff]   ;;  %v3763_v52 = vld [vmem:[%s7299_s8 + $0x8] sm:$0xff]  ;;  %s7301_s3 = smov 112  }
 0xf09   : > { %5631 = vmatprep.subr.bf16.mxu1 %v6103_v7 }
 0xf0a   : > { %3474 = vrot.lane.b32.xlu1 %v3462_v53, %s7293_s23  ;;  %3472 = vrot.lane.b32.xlu0 %v3461_v47, %s7293_s23  ;;  %v5397_v53 = vcombine.high %v3763_v52, %v3763_v52 }
 0xf0c   : > { %5632 = vmatpush3.bf16.msra.mxu1 %v5885_v48 }
 0xf0d   : > { %5633 = vmatprep.subr.bf16.mxu1 %v6103_v7 }
 0xf10   : > { %5634 = vmatpush3.bf16.msra.mxu1 %v5886_v50 }
 0xf11   : > { %5635 = vmatprep.subr.bf16.mxu1 %v6103_v7 }
 0xf14   : > { %5636 = vmatpush3.bf16.msra.mxu1 %v5887_v51 }
 0xf15   : > { %5402 = vmatprep.subr.msk.bf16.mxu1 %vm1689_vm0, %v5397_v53 }
 0xf7c   : > { %v3475_v54 = vpop.permute.xlu1 %3474  ;;  %v3473_v55 = vpop.permute.xlu0 %3472 }
 0xf7d   : > { %v3477_v56 = vsel %vm3476_vm12, %v3473_v55, %v3475_v54 }
 0xf7e   : > { %5626 = vmatmul.mubr.msk.bf16.vlgmr.msra.gmra.mrb[32].mxu0 %vm1970_vm7, %v3477_v56 }
 0xf7f   : > { %3834 = vmatprep.mubr.bf16.mxu0 %v6102_v3 }
0x1051   : > { %v3539_v60 = vpop.f32.mrb[32].mxu0 }
0x1052   : > { %v3540_v61 = vadd.f32 %v5382_v44, %v3539_v60  ;;  %v5627_v63 = vpop.f32.mrb[33].mxu0 }
0x1053   : > { %v3542_v0 = vpop.f32.mrb[34].mxu0 }
0x1054   : > { %v3556_v1 = vmul.f32 %v3540_v61, %v3540_v61  ;;  %v3543_v2 = vadd.f32 %v5382_v44, %v3542_v0  ;;  %v5628_v58 = vpop.f32.mrb[35].mxu0  ;;  %v3546_v4 = vsel %vm1970_vm7, %v3540_v61, 0.0 }
0x1056   : > { %v3547_v18 = vsel %vm1970_vm7, %v3543_v2, 0.0  ;;  %v3557_v5 = vmul.f32 %v3543_v2, %v3543_v2  ;;  %v3558_v57 = vsel %vm1970_vm7, %v3556_v1, 0.0 }
0x1057   : > { %v3548_v8 = vadd.f32 %v3547_v18, %v3546_v4  ;;  %v3761_v18 = vld [vmem:[%s1667_s12] sm:$0x1]  ;;  %s7304_s12 = sld [smem:[#allocation36_spill]] }
0x1058   : > { %v3559_v12 = vsel %vm1970_vm7, %v3557_v5, 0.0  ;;  %v3765_v5 = vpack.c.bf16 %v3761_v18, %v3761_v18 }
0x1059   : > { %v3549_v13 = vrot.slane %v3548_v8, 4  ;;  %v3560_v14 = vadd.f32 %v3559_v12, %v3558_v57 }
0x105b   : > { %v3550_v16 = vadd.f32 %v3549_v13, %v3548_v8  ;;  %v3561_v23 = vrot.slane %v3560_v14, 4  ;;  %v5396_v8 = vcombine.low %v3763_v52, %v3763_v52  ;;  %v5890_v13 = vld [vmem:[%s7302_s13] sm:$0xff]   ;;  %s7305_s13 = sld [smem:[#allocation35_spill]] }
0x105d   : > { %v3551_v25 = vrot.slane %v3550_v16, 2  ;;  %v3562_v26 = vadd.f32 %v3561_v23, %v3560_v14  ;;  %v3791_v57 = vsel %vm1689_vm0, %v5396_v8, 0 }
0x105f   : > { %v3552_v27 = vadd.f32 %v3551_v25, %v3550_v16  ;;  %v3563_v28 = vrot.slane %v3562_v26, 2 }
0x1061   : > { %v3553_v31 = vrot.slane %v3552_v27, 1  ;;  %v3564_v32 = vadd.f32 %v3563_v28, %v3562_v26 }
0x1063   : > { %v3554_v33 = vadd.f32 %v3553_v31, %v3552_v27  ;;  %v3565_v34 = vrot.slane %v3564_v32, 1 }
0x1065   : > { %v3555_v35 = vmul.f32 0.0625, %v3554_v33  ;;  %v3566_v38 = vadd.f32 %v3565_v34, %v3564_v32  ;;  %v5895_v34 = vld [vmem:[%s7304_s12] sm:$0xff]   ;;  %s7308_s12 = sld [smem:[#allocation39_spill]] }
0x1067   : > { %v3567_v62 = vmul.f32 0.0625, %v3566_v38  ;;  %v3568_v22 = vmul.f32 %v3555_v35, %v3555_v35  ;;  %v3572_v39 = vsub.f32 %v3543_v2, %v3555_v35  ;;  %v3571_v40 = vsub.f32 %v3540_v61, %v3555_v35  ;;  %v3762_v2 = vld [vmem:[%s7299_s8] sm:$0xff] }
0x1068   : > { %v5395_v58 = vcombine.high %v3762_v2, %v3762_v2  ;;  %v5394_v4 = vcombine.low %v3762_v2, %v3762_v2 }
0x1069   : > { %v3569_v41 = vsub.f32 %v3567_v62, %v3568_v22 }
0x106a   : > { %5400 = vmatprep.subr.msk.bf16.mxu0 %vm1689_vm0, %v5395_v58 }
0x106b   : > { %v3570_v42 = vmax.f32 %v3569_v41, 0.0 }
0x106d   : > { %v3573_v24 = vadd.f32 1e-05, %v3570_v42 }
0x106f   : > { %5932 = vrsqrt.f32 %v3573_v24 }
0x1079   : > { %v5933_v43 = vpop.eup %5932 }
0x107a   : > { %v3576_v45 = vmul.f32 %v5933_v43, %v3572_v39  ;;  %v3575_v21 = vmul.f32 %v5933_v43, %v3571_v40 }
0x107c   : > { %3581 = vrot.lane.b32.xlu1 %v3576_v45, %s7298_s1  ;;  %3579 = vrot.lane.b32.xlu0 %v3575_v21, %s7298_s1 }
0x1080   : > { %3592 = vrot.lane.b32.xlu0 %v3590_v49, %s7293_s23 }
0x10ee   : > { %v3580_v59 = vpop.permute.xlu0 %3579  ;;  %v3582_v15 = vpop.permute.xlu1 %3581 }
0x10ef   : > { %v3586_v36 = vmul.f32 %v3582_v15, %v6796_v9  ;;  %v3585_v47 = vmul.f32 %v3580_v59, %v6796_v9  ;;  %v5406_v15 = vld [vmem:[%s7305_s13] ss:$0 sm:$0xff]  ;;  %s7309_s13 = sld [smem:[#allocation40_spill]] }
0x10f2   : > { %v6832_v54 = vpop.permute.xlu0 %3592 }
0x10f3   : > { %v3595_v55 = vsel %vm3476_vm12, %v6772_v37, %v6832_v54  ;;  %v3785_v37 = vsel %vm1689_vm0, %v5394_v4, 0 }
0x10f4   : > { %v3597_v56 = vadd.f32 %v3595_v55, %v3585_v47  ;;  %v3598_v44 = vadd.f32 %v3595_v55, %v3586_v36  ;;  %3803 = vmatpush1.bf16.msra.mxu0 %v3785_v37 }
0x10f6   : > { %vm3599_vm13 = vcmp.gt.f32.partialorder %v3597_v56, 0.0  ;;  %vm3600_vm14 = vcmp.gt.f32.partialorder %v3598_v44, 0.0  ;;  %v3601_v60 = vmul.f32 0.2, %v3597_v56  ;;  %v3602_v61 = vmul.f32 0.2, %v3598_v44 }
0x10f7   : > { %5401 = vmatmul.mubr.msk.bf16.vlgmr.msra.gmra.mrb[36].mxu0 %vm1685_vm1, %v3765_v5 }
0x10f8   : > { %v3603_v63 = vsel %vm3599_vm13, %v3597_v56, %v3601_v60  ;;  %v3604_v0 = vsel %vm3600_vm14, %v3598_v44, %v3602_v61  ;;  %3916 = vmatprep.mubr.bf16.mxu0 %v6102_v3 }
0x10f9   : > { %v3613_v1 = vpack.c.bf16 %v3604_v0, %v3603_v63 }
0x10fb   : > { %3622 = vrot.lane.b32.xlu1 %v3613_v1, %s7301_s3 }
0x116d   : > { %v3623_v12 = vpop.permute.xlu1 %3622 }
0x116e   : > { %5638 = vmatmul.mubr.msk.bf16.vlgmr.msra.gmra.mrb[40].mxu1 %vm1970_vm7, %v3623_v12 }
0x116f   : > { %3844 = vmatpush1.bf16.msra.mxu1 %v3791_v57  ;;  %3875 = vmatprep.mubr.bf16.mxu1 %v6102_v3  ;;  %v3764_v3 = vld [vmem:[%s7299_s8 + $0x10] sm:$0xff]  ;;  %s7313_s8 = sld [smem:[#allocation43_spill]] }
0x1170   : > { %5641 = vmatprep.subr.bf16.mxu1 %v6103_v7  ;;  %v5399_v23 = vcombine.high %v3764_v3, %v3764_v3  ;;  %v5398_v25 = vcombine.low %v3764_v3, %v3764_v3 }
0x1172   : > { %5404 = vmatprep.subr.msk.bf16.mxu0 %vm1689_vm0, %v5399_v23  ;;  %v3797_v28 = vsel %vm1689_vm0, %v5398_v25, 0 }
0x1173   : > { %3885 = vmatpush1.bf16.msra.mxu0 %v3797_v28 }
0x1174   : > { %5647 = vmatprep.subr.bf16.mxu0 %v6103_v7 }
0x1176   : > { %5403 = vmatmul.mubr.msk.bf16.vlgmr.msra.gmra.mrb[44].mxu1 %vm1685_vm1, %v3765_v5  ;;  %5405 = vmatmul.mubr.msk.bf16.vlgmr.msra.gmra.mrb[40].mxu0 %vm1685_vm1, %v3765_v5 }
0x1177   : > { %5642 = vmatpush3.bf16.msra.mxu1 %v5890_v13  ;;  %5643 = vmatprep.mubr.msk.bf16.mxu1 %vm6104_vm3, %v6103_v7 }
0x1178   : > { %5653 = vmatprep.subr.bf16.mxu1 %v6103_v7  ;;  %5649 = vmatprep.mubr.msk.bf16.mxu0 %vm6104_vm3, %v6103_v7 }
0x1179   : > { %5648 = vmatpush3.bf16.msra.mxu0 %v5895_v34 }
0x117a   : > { %5661 = vmatprep.subr.bf16.mxu0 %v6103_v7 }
0x117e   : > { %5644 = vmatmul.mubr.msk.bf16.vlgmr.msra.gmra.mrb[48].mxu1 %vm1802_vm2, %v6462_v11  ;;  %v5388_v11 = vld [vmem:[%s7303_s9] ss:$0 sm:$0xff]  ;;  %s7307_s9 = sld [smem:[#allocation38_spill]] }
0x117f   : > { %5657 = vmatprep.mubr.msk.bf16.mxu1 %vm6104_vm3, %v6103_v7 }
0x11ca   : > { %v6858_v14 = vpop.f32.mrb[36].mxu0 }
0x11cb   : > { %v6861_v16 = vpop.f32.mrb[37].mxu0 }
0x11cc   : > { %v3840_v26 = vpop.f32.mrb[38].mxu0 }
0x11cd   : > { %v3841_v27 = vpop.f32.mrb[39].mxu0 }
0x1241   : > { %v3685_v31 = vpop.f32.mrb[40].mxu1 }
0x1242   : > { %v6870_v32 = vadd.f32 %v5388_v11, %v3685_v31  ;;  %v5639_v33 = vpop.f32.mrb[41].mxu1 }
0x1243   : > { %v3688_v35 = vpop.f32.mrb[42].mxu1 }
0x1244   : > { %v6873_v38 = vadd.f32 %v5388_v11, %v3688_v35  ;;  %v5640_v62 = vpop.f32.mrb[43].mxu1  ;;  %v3700_v22 = vmul.f32 %v6870_v32, %v6870_v32 }
0x1246   : > { %v3692_v39 = vadd.f32 %v6873_v38, %v6870_v32  ;;  %v3701_v40 = vmul.f32 %v6873_v38, %v6873_v38 }
0x1248   : > { %v3693_v41 = vrot.slane %v3692_v39, 4  ;;  %v3702_v42 = vadd.f32 %v3701_v40, %v3700_v22 }
0x1249   : > { %v6882_v24 = vpop.f32.mrb[44].mxu1 }
0x124a   : > { %v3694_v43 = vadd.f32 %v3693_v41, %v3692_v39  ;;  %v3703_v45 = vrot.slane %v3702_v42, 4  ;;  %v4024_v21 = vrot.slane %v6882_v24, %v6482_v20  ;;  %v6886_v46 = vpop.f32.mrb[45].mxu1 }
0x124b   : > { %v3881_v48 = vpop.f32.mrb[46].mxu1 }
0x124c   : > { %v3695_v49 = vrot.slane %v3694_v43, 2  ;;  %v3704_v50 = vadd.f32 %v3703_v45, %v3702_v42  ;;  %4026 = vrot.lane.b32.xlu0 %v4024_v21, %s7293_s23  ;;  %v3882_v51 = vpop.f32.mrb[47].mxu1 }
0x124e   : > { %v3696_v59 = vadd.f32 %v3695_v49, %v3694_v43  ;;  %v3705_v52 = vrot.slane %v3704_v50, 2 }
0x1250   : > { %v3697_v53 = vrot.slane %v3696_v59, 1  ;;  %v3706_v36 = vadd.f32 %v3705_v52, %v3704_v50 }
0x1251   : > { %v3977_v47 = vpop.f32.mrb[48].mxu1 }
0x1252   : > { %v3698_v55 = vadd.f32 %v3697_v53, %v3696_v59  ;;  %v3707_v56 = vrot.slane %v3706_v36, 1  ;;  %v3978_v44 = vadd.f32 %v5406_v15, %v3977_v47  ;;  %v5645_v60 = vpop.f32.mrb[49].mxu1 }
0x1253   : > { %v3980_v61 = vpop.f32.mrb[50].mxu1 }
0x1254   : > { %v3699_v63 = vmul.f32 0.0625, %v3698_v55  ;;  %v3708_v0 = vadd.f32 %v3707_v56, %v3706_v36  ;;  %v3994_v1 = vmul.f32 %v3978_v44, %v3978_v44  ;;  %v5646_v2 = vpop.f32.mrb[51].mxu1  ;;  %v3984_v58 = vsel %vm1802_vm2, %v3978_v44, 0.0 }
0x1255   : > { %v3981_v4 = vadd.f32 %v5406_v15, %v3980_v61  ;;  %v3925_v55 = vadd.f32 1.0, %v6858_v14 }
0x1256   : > { %v3709_v18 = vmul.f32 0.0625, %v3708_v0  ;;  %v3710_v37 = vmul.f32 %v3699_v63, %v3699_v63  ;;  %v3714_v5 = vsub.f32 %v6873_v38, %v3699_v63  ;;  %v3996_v8 = vsel %vm1802_vm2, %v3994_v1, 0.0 }
0x1257   : > { %v3985_v57 = vsel %vm1802_vm2, %v3981_v4, 0.0  ;;  %v3995_v12 = vmul.f32 %v3981_v4, %v3981_v4  ;;  %v3713_v13 = vsub.f32 %v6870_v32, %v3699_v63  ;;  %v6902_v56 = vrot.slane %v3925_v55, %v6482_v20 }
0x1258   : > { %v3711_v3 = vsub.f32 %v3709_v18, %v3710_v37  ;;  %v3986_v23 = vadd.f32 %v3985_v57, %v3984_v58  ;;  %v6913_v18 = vpop.f32.mrb[40].mxu0  ;;  %v5409_v57 = vld [vmem:[%s7306_s11] ss:$0 sm:$0xff]  ;;  %s7310_s11 = sld [smem:[#allocation41_spill]] }
0x1259   : > { %v3997_v25 = vsel %vm1802_vm2, %v3995_v12, 0.0  ;;  %v6915_v37 = vpop.f32.mrb[41].mxu0 }
0x125a   : > { %v3987_v26 = vrot.slane %v3986_v23, 4  ;;  %v3998_v27 = vadd.f32 %v3997_v25, %v3996_v8  ;;  %v3712_v28 = vmax.f32 %v3711_v3, 0.0 }
0x125c   : > { %v3988_v11 = vadd.f32 %v3987_v26, %v3986_v23  ;;  %v3999_v31 = vrot.slane %v3998_v27, 4  ;;  %v3715_v33 = vadd.f32 1e-05, %v3712_v28 }
0x125e   : > { %v3989_v34 = vrot.slane %v3988_v11, 2  ;;  %v4000_v35 = vadd.f32 %v3999_v31, %v3998_v27  ;;  %5934 = vrsqrt.f32 %v3715_v33 }
0x1260   : > { %v3990_v38 = vadd.f32 %v3989_v34, %v3988_v11  ;;  %v4001_v62 = vrot.slane %v4000_v35, 2 }
0x1262   : > { %v3991_v22 = vrot.slane %v3990_v38, 1  ;;  %v4002_v39 = vadd.f32 %v4001_v62, %v4000_v35 }
0x1264   : > { %v3992_v40 = vadd.f32 %v3991_v22, %v3990_v38  ;;  %v4003_v41 = vrot.slane %v4002_v39, 1 }
0x1266   : > { %v3993_v32 = vmul.f32 0.0625, %v3992_v40  ;;  %v4004_v42 = vadd.f32 %v4003_v41, %v4002_v39 }
0x1268   : > { %v5935_v43 = vpop.eup %5934  ;;  %v4005_v45 = vmul.f32 0.0625, %v4004_v42  ;;  %v4006_v21 = vmul.f32 %v3993_v32, %v3993_v32  ;;  %v4010_v48 = vsub.f32 %v3981_v4, %v3993_v32  ;;  %v4009_v49 = vsub.f32 %v3978_v44, %v3993_v32 }
0x1269   : > { %v6896_v50 = vmul.f32 %v5935_v43, %v3713_v13  ;;  %v6898_v51 = vmul.f32 %v5935_v43, %v3714_v5  ;;  %v3922_v5 = vpop.f32.mrb[42].mxu0 }
0x126a   : > { %v4007_v59 = vsub.f32 %v4005_v45, %v4006_v21  ;;  %v3923_v8 = vpop.f32.mrb[43].mxu0 }
0x126c   : > { %v4008_v52 = vmax.f32 %v4007_v59, 0.0 }
0x126e   : > { %v4011_v15 = vadd.f32 1e-05, %v4008_v52 }
0x1270   : > { %5936 = vrsqrt.f32 %v4011_v15 }
0x127a   : > { %v5937_v53 = vpop.eup %5936 }
0x127b   : > { %v4014_v36 = vmul.f32 %v5937_v53, %v4010_v48  ;;  %v4013_v47 = vmul.f32 %v5937_v53, %v4009_v49 }
0x127d   : > { %v4019_v60 = vmul.f32 %v6902_v56, %v4013_v47  ;;  %v4020_v44 = vmul.f32 %v6902_v56, %v4014_v36 }
0x12be   : > { %v6906_v61 = vpop.permute.xlu0 %4026 }
0x12bf   : > { %v4029_v63 = vadd.f32 %v6906_v61, %v4019_v60  ;;  %v4030_v0 = vadd.f32 %v6906_v61, %v4020_v44  ;;  %v5896_v44 = vld [vmem:[%s7307_s9] sm:$0xff]  }
0x12c0   : > { %5654 = vmatpush3.bf16.msra.mxu1 %v5896_v44 }
0x12c1   : > { %vm4031_vm0 = vcmp.gt.f32.partialorder %v4029_v63, 0.0  ;;  %vm4032_vm1 = vcmp.gt.f32.partialorder %v4030_v0, 0.0  ;;  %v4033_v1 = vmul.f32 0.2, %v4029_v63  ;;  %v4034_v2 = vmul.f32 0.2, %v4030_v0  ;;  %5655 = vmatprep.subr.bf16.mxu1 %v6103_v7 }
0x12c3   : > { %v4035_v58 = vsel %vm4031_vm0, %v4029_v63, %v4033_v1  ;;  %v4036_v14 = vsel %vm4032_vm1, %v4030_v0, %v4034_v2  ;;  %v5897_v2 = vld [vmem:[%s7307_s9 + $0x8] sm:$0xff]   ;;  %s7315_s9 = sld [smem:[#allocation45_spill]] }
0x12c4   : > { %v4039_v4 = vpack.c.bf16 %v4036_v14, %v4035_v58  ;;  %5656 = vmatpush3.bf16.msra.mxu1 %v5897_v2 }
0x12c5   : > { %5669 = vmatprep.subr.bf16.mxu1 %v6103_v7 }
0x12c6   : > { %5650 = vmatmul.mubr.msk.bf16.vlgmr.msra.gmra.mrb[44].mxu0 %vm1802_vm2, %v4039_v4 }
0x12c7   : > { %5665 = vmatprep.mubr.msk.bf16.mxu0 %vm6104_vm3, %v6103_v7 }
0x1399   : > { %v4090_v12 = vpop.f32.mrb[44].mxu0 }
0x139a   : > { %v4091_v13 = vadd.f32 %v5409_v57, %v4090_v12  ;;  %v5651_v3 = vpop.f32.mrb[45].mxu0 }
0x139b   : > { %v4093_v23 = vpop.f32.mrb[46].mxu0 }
0x139c   : > { %v4107_v25 = vmul.f32 %v4091_v13, %v4091_v13  ;;  %v4094_v26 = vadd.f32 %v5409_v57, %v4093_v23  ;;  %v5652_v27 = vpop.f32.mrb[47].mxu0  ;;  %v4097_v28 = vsel %vm1847_vm4, %v4091_v13, 0.0 }
0x139d   : > { %v5412_v27 = vld [vmem:[%s7308_s12] ss:$0 sm:$0xff]  ;;  %s7311_s12 = smov 80  }
0x139e   : > { %v4098_v11 = vsel %vm1847_vm4, %v4094_v26, 0.0  ;;  %v4108_v31 = vmul.f32 %v4094_v26, %v4094_v26  ;;  %v4109_v34 = vsel %vm1847_vm4, %v4107_v25, 0.0 }
0x139f   : > { %v4099_v33 = vadd.f32 %v4098_v11, %v4097_v28 }
0x13a0   : > { %v4110_v35 = vsel %vm1847_vm4, %v4108_v31, 0.0 }
0x13a1   : > { %v4100_v38 = vrot.slane %v4099_v33, 4  ;;  %v4111_v62 = vadd.f32 %v4110_v35, %v4109_v34 }
0x13a3   : > { %v4101_v22 = vadd.f32 %v4100_v38, %v4099_v33  ;;  %v4112_v39 = vrot.slane %v4111_v62, 4 }
0x13a5   : > { %v4102_v40 = vrot.slane %v4101_v22, 2  ;;  %v4113_v41 = vadd.f32 %v4112_v39, %v4111_v62 }
0x13a7   : > { %v4103_v32 = vadd.f32 %v4102_v40, %v4101_v22  ;;  %v4114_v42 = vrot.slane %v4113_v41, 2 }
0x13a9   : > { %v4104_v43 = vrot.slane %v4103_v32, 1  ;;  %v4115_v45 = vadd.f32 %v4114_v42, %v4113_v41 }
0x13ab   : > { %v4105_v21 = vadd.f32 %v4104_v43, %v4103_v32  ;;  %v4116_v48 = vrot.slane %v4115_v45, 1 }
0x13ad   : > { %v4106_v49 = vmul.f32 0.0625, %v4105_v21  ;;  %v4117_v59 = vadd.f32 %v4116_v48, %v4115_v45 }
0x13af   : > { %v4118_v52 = vmul.f32 0.0625, %v4117_v59  ;;  %v4119_v15 = vmul.f32 %v4106_v49, %v4106_v49  ;;  %v4123_v53 = vsub.f32 %v4094_v26, %v4106_v49  ;;  %v4122_v36 = vsub.f32 %v4091_v13, %v4106_v49 }
0x13b1   : > { %v4120_v47 = vsub.f32 %v4118_v52, %v4119_v15 }
0x13b3   : > { %v4121_v55 = vmax.f32 %v4120_v47, 0.0 }
0x13b5   : > { %v4124_v60 = vadd.f32 1e-05, %v4121_v55 }
0x13b7   : > { %5938 = vrsqrt.f32 %v4124_v60 }
0x13c1   : > { %v5939_v63 = vpop.eup %5938 }
0x13c2   : > { %v4127_v0 = vmul.f32 %v5939_v63, %v4123_v53  ;;  %v4126_v1 = vmul.f32 %v5939_v63, %v4122_v36 }
0x13c4   : > { %4132 = vrot.lane.b32.xlu0 %v4127_v0, %s7298_s1  ;;  %4130 = vrot.lane.b32.xlu1 %v4126_v1, %s7298_s1 }
0x1436   : > { %v4133_v58 = vpop.permute.xlu0 %4132  ;;  %v4131_v14 = vpop.permute.xlu1 %4130 }
0x1437   : > { %v4137_v4 = vmul.f32 %v4133_v58, %v6902_v56  ;;  %v4136_v5 = vmul.f32 %v4131_v14, %v6902_v56 }
0x1439   : > { %v4139_v8 = vadd.f32 %v4137_v4, %v6906_v61  ;;  %v4138_v57 = vadd.f32 %v4136_v5, %v6906_v61 }
0x143b   : > { %vm4141_vm15 = vcmp.gt.f32.partialorder %v4139_v8, 0.0  ;;  %v4143_v12 = vmul.f32 0.2, %v4139_v8  ;;  %vm4140_vm5 = vcmp.gt.f32.partialorder %v4138_v57, 0.0  ;;  %v4142_v13 = vmul.f32 0.2, %v4138_v57 }
0x143d   : > { %v4144_v3 = vsel %vm4140_vm5, %v4138_v57, %v4142_v13  ;;  %v4145_v23 = vsel %vm4141_vm15, %v4139_v8, %v4143_v12  ;;  %v5898_v8 = vld [vmem:[%s7309_s13] sm:$0xff]   ;;  %v5899_v57 = vld [vmem:[%s7309_s13 + $0x8] sm:$0xff]   ;;  %v4261_v12 = vrot.slane %v6886_v46, %v6482_v20 }
0x143e   : > { %v4150_v25 = vpack.c.bf16 %v4145_v23, %v4144_v3  ;;  %5662 = vmatpush3.bf16.msra.mxu0 %v5898_v8 }
0x143f   : > { %5663 = vmatprep.subr.bf16.mxu0 %v6103_v7 }
0x1440   : > { %4159 = vrot.lane.b32.xlu1 %v4150_v25, %s7301_s3 }
0x1442   : > { %5664 = vmatpush3.bf16.msra.mxu0 %v5899_v57 }
0x1443   : > { %5681 = vmatprep.subr.bf16.mxu0 %v6103_v7 }
0x14b2   : > { %v4160_v26 = vpop.permute.xlu1 %4159 }
0x14b3   : > { %5658 = vmatmul.mubr.msk.bf16.vlgmr.msra.gmra.mrb[52].mxu1 %vm1847_vm4, %v4160_v26 }
0x14b4   : > { %5677 = vmatprep.mubr.msk.bf16.mxu1 %vm6104_vm3, %v6103_v7 }
0x1586   : > { %v4210_v28 = vpop.f32.mrb[52].mxu1 }
0x1587   : > { %v4211_v11 = vadd.f32 %v5412_v27, %v4210_v28  ;;  %v5659_v31 = vpop.f32.mrb[53].mxu1 }
0x1588   : > { %v4213_v61 = vpop.f32.mrb[54].mxu1 }
0x1589   : > { %v4227_v33 = vmul.f32 %v4211_v11, %v4211_v11  ;;  %v4214_v34 = vadd.f32 %v5412_v27, %v4213_v61  ;;  %v5660_v35 = vpop.f32.mrb[55].mxu1  ;;  %v4217_v38 = vsel %vm1847_vm4, %v4211_v11, 0.0 }
0x158a   : > { %v5416_v35 = vld [vmem:[%s7310_s11] ss:$0 sm:$0xff]  ;;  %s7312_s11 = sld [smem:[#allocation42_spill]] }
0x158b   : > { %v4218_v62 = vsel %vm1847_vm4, %v4214_v34, 0.0  ;;  %v4228_v22 = vmul.f32 %v4214_v34, %v4214_v34  ;;  %v4229_v40 = vsel %vm1847_vm4, %v4227_v33, 0.0 }
0x158c   : > { %v4219_v39 = vadd.f32 %v4218_v62, %v4217_v38 }
0x158d   : > { %v4230_v41 = vsel %vm1847_vm4, %v4228_v22, 0.0 }
0x158e   : > { %v4220_v32 = vrot.slane %v4219_v39, 4  ;;  %v4231_v42 = vadd.f32 %v4230_v41, %v4229_v40 }
0x1590   : > { %v4221_v43 = vadd.f32 %v4220_v32, %v4219_v39  ;;  %v4232_v45 = vrot.slane %v4231_v42, 4 }
0x1592   : > { %v4222_v21 = vrot.slane %v4221_v43, 2  ;;  %v4233_v48 = vadd.f32 %v4232_v45, %v4231_v42 }
0x1594   : > { %v4223_v49 = vadd.f32 %v4222_v21, %v4221_v43  ;;  %v4234_v59 = vrot.slane %v4233_v48, 2 }
0x1596   : > { %v4224_v52 = vrot.slane %v4223_v49, 1  ;;  %v4235_v15 = vadd.f32 %v4234_v59, %v4233_v48 }
0x1598   : > { %v4225_v53 = vadd.f32 %v4224_v52, %v4223_v49  ;;  %v4236_v36 = vrot.slane %v4235_v15, 1 }
0x159a   : > { %v4226_v47 = vmul.f32 0.0625, %v4225_v53  ;;  %v4237_v55 = vadd.f32 %v4236_v36, %v4235_v15 }
0x159c   : > { %v4238_v60 = vmul.f32 0.0625, %v4237_v55  ;;  %v4239_v44 = vmul.f32 %v4226_v47, %v4226_v47  ;;  %v4243_v63 = vsub.f32 %v4214_v34, %v4226_v47  ;;  %v4242_v0 = vsub.f32 %v4211_v11, %v4226_v47 }
0x159e   : > { %v4240_v1 = vsub.f32 %v4238_v60, %v4239_v44 }
0x15a0   : > { %v4241_v2 = vmax.f32 %v4240_v1, 0.0 }
0x15a2   : > { %v4244_v58 = vadd.f32 1e-05, %v4241_v2 }
0x15a4   : > { %5940 = vrsqrt.f32 %v4244_v58 }
0x15ae   : > { %v5941_v14 = vpop.eup %5940 }
0x15af   : > { %v4247_v4 = vmul.f32 %v5941_v14, %v4243_v63  ;;  %v4246_v5 = vmul.f32 %v5941_v14, %v4242_v0 }
0x15b1   : > { %4252 = vrot.lane.b32.xlu1 %v4247_v4, %s7293_s23  ;;  %4250 = vrot.lane.b32.xlu0 %v4246_v5, %s7293_s23 }
0x15b5   : > { %4263 = vrot.lane.b32.xlu0 %v4261_v12, %s7293_s23 }
0x1623   : > { %v4253_v13 = vpop.permute.xlu1 %4252  ;;  %v4251_v3 = vpop.permute.xlu0 %4250 }
0x1624   : > { %v4257_v23 = vmul.f32 %v4253_v13, %v6902_v56  ;;  %v4256_v25 = vmul.f32 %v4251_v3, %v6902_v56 }
0x1627   : > { %v6952_v26 = vpop.permute.xlu0 %4263 }
0x1628   : > { %v4266_v27 = vadd.f32 %v6952_v26, %v4256_v25  ;;  %v4267_v46 = vadd.f32 %v6952_v26, %v4257_v23  ;;  %v5900_v23 = vld [vmem:[%s7312_s11] sm:$0xff]  }
0x1629   : > { %5670 = vmatpush3.bf16.msra.mxu1 %v5900_v23 }
0x162a   : > { %vm4268_vm6 = vcmp.gt.f32.partialorder %v4266_v27, 0.0  ;;  %vm4269_vm8 = vcmp.gt.f32.partialorder %v4267_v46, 0.0  ;;  %v4270_v28 = vmul.f32 0.2, %v4266_v27  ;;  %v4271_v11 = vmul.f32 0.2, %v4267_v46  ;;  %5671 = vmatprep.subr.bf16.mxu1 %v6103_v7 }
0x162c   : > { %v4272_v31 = vsel %vm4268_vm6, %v4266_v27, %v4270_v28  ;;  %v4273_v61 = vsel %vm4269_vm8, %v4267_v46, %v4271_v11  ;;  %v5901_v46 = vld [vmem:[%s7312_s11 + $0x8] sm:$0xff]   ;;  %v5902_v28 = vld [vmem:[%s7312_s11 + $0x10] sm:$0xff]   ;;  %v5903_v11 = vld [vmem:[%s7312_s11 + $0x18] sm:$0xff]   ;;  %s6111_s11 = smov [#allocation2]  }
0x162d   : > { %v4278_v33 = vpack.c.bf16 %v4273_v61, %v4272_v31  ;;  %5672 = vmatpush3.bf16.msra.mxu1 %v5901_v46  ;;  %v3926_v31 = vadd.f32 1.0, %v6861_v16  ;;  %s5956_s13 = sshll.u32 %s6111_s11, 4  ;;  %s5957_s13 = int_to_ptr.vmem [resolvable:$false] %s5956_s13 }
0x162e   : > { %5673 = vmatprep.subr.bf16.mxu1 %v6103_v7  ;;  %s5958_s14 = scalar_lea.vmem %s5957_s13, 512 }
0x162f   : > { %4287 = vrot.lane.b32.xlu1 %v4278_v33, %s7311_s12  ;;  %v6977_v61 = vrot.slane %v3926_v31, %v6482_v20 }
0x1631   : > { %5674 = vmatpush3.bf16.msra.mxu1 %v5902_v28 }
0x1632   : > { %5675 = vmatprep.subr.bf16.mxu1 %v6103_v7 }
0x1635   : > { %5676 = vmatpush3.bf16.msra.mxu1 %v5903_v11 }
0x1636   : > { %5693 = vmatprep.subr.bf16.mxu1 %v6103_v7 }
0x16a1   : > { %v4288_v34 = vpop.permute.xlu1 %4287 }
0x16a2   : > { %5666 = vmatmul.mubr.msk.bf16.vlgmr.msra.gmra.mrb[48].mxu0 %vm1847_vm4, %v4288_v34 }
0x16a3   : > { %5689 = vmatprep.mubr.msk.bf16.mxu0 %vm6104_vm3, %v6103_v7 }
0x1775   : > { %v4338_v38 = vpop.f32.mrb[48].mxu0 }
0x1776   : > { %v4339_v62 = vadd.f32 %v5416_v35, %v4338_v38  ;;  %v5667_v22 = vpop.f32.mrb[49].mxu0 }
0x1777   : > { %v4341_v39 = vpop.f32.mrb[50].mxu0 }
0x1778   : > { %v4355_v40 = vmul.f32 %v4339_v62, %v4339_v62  ;;  %v4342_v41 = vadd.f32 %v5416_v35, %v4341_v39  ;;  %v5668_v32 = vpop.f32.mrb[51].mxu0  ;;  %v4345_v42 = vsel %vm1970_vm7, %v4339_v62, 0.0 }
0x177a   : > { %v4346_v43 = vsel %vm1970_vm7, %v4342_v41, 0.0  ;;  %v4356_v45 = vmul.f32 %v4342_v41, %v4342_v41  ;;  %v4357_v48 = vsel %vm1970_vm7, %v4355_v40, 0.0 }
0x177b   : > { %v4347_v21 = vadd.f32 %v4346_v43, %v4345_v42 }
0x177c   : > { %v4358_v49 = vsel %vm1970_vm7, %v4356_v45, 0.0 }
0x177d   : > { %v4348_v59 = vrot.slane %v4347_v21, 4  ;;  %v4359_v52 = vadd.f32 %v4358_v49, %v4357_v48 }
0x177f   : > { %v4349_v15 = vadd.f32 %v4348_v59, %v4347_v21  ;;  %v4360_v53 = vrot.slane %v4359_v52, 4 }
0x1781   : > { %v4350_v36 = vrot.slane %v4349_v15, 2  ;;  %v4361_v47 = vadd.f32 %v4360_v53, %v4359_v52 }
0x1783   : > { %v4351_v55 = vadd.f32 %v4350_v36, %v4349_v15  ;;  %v4362_v60 = vrot.slane %v4361_v47, 2 }
0x1785   : > { %v4352_v44 = vrot.slane %v4351_v55, 1  ;;  %v4363_v63 = vadd.f32 %v4362_v60, %v4361_v47  ;;  %v5420_v47 = vld [vmem:[%s7313_s8] ss:$0 sm:$0xff]  ;;  %s7314_s8 = sld [smem:[#allocation44_spill]] }
0x1787   : > { %v4353_v0 = vadd.f32 %v4352_v44, %v4351_v55  ;;  %v4364_v1 = vrot.slane %v4363_v63, 1 }
0x1789   : > { %v4354_v2 = vmul.f32 0.0625, %v4353_v0  ;;  %v4365_v58 = vadd.f32 %v4364_v1, %v4363_v63 }
0x178b   : > { %v4366_v14 = vmul.f32 0.0625, %v4365_v58  ;;  %v4367_v4 = vmul.f32 %v4354_v2, %v4354_v2  ;;  %v4371_v5 = vsub.f32 %v4342_v41, %v4354_v2  ;;  %v4370_v8 = vsub.f32 %v4339_v62, %v4354_v2 }
0x178d   : > { %v4368_v57 = vsub.f32 %v4366_v14, %v4367_v4 }
0x178f   : > { %v4369_v12 = vmax.f32 %v4368_v57, 0.0 }
0x1791   : > { %v4372_v13 = vadd.f32 1e-05, %v4369_v12 }
0x1793   : > { %5942 = vrsqrt.f32 %v4372_v13 }
0x179d   : > { %v5943_v3 = vpop.eup %5942 }
0x179e   : > { %v4375_v25 = vmul.f32 %v5943_v3, %v4371_v5  ;;  %v4374_v27 = vmul.f32 %v5943_v3, %v4370_v8 }
0x17a0   : > { %4384 = vrot.lane.b32.xlu1 %v4375_v25, %s7311_s12  ;;  %4382 = vrot.lane.b32.xlu0 %v4374_v27, %s7311_s12 }
0x1812   : > { %v4385_v33 = vpop.permute.xlu1 %4384  ;;  %v4383_v34 = vpop.permute.xlu0 %4382 }
0x1813   : > { %v4390_v35 = vmul.f32 %v4385_v33, %v6902_v56  ;;  %v4391_v38 = vmul.f32 %v4385_v33, %v6977_v61  ;;  %v4388_v62 = vmul.f32 %v4383_v34, %v6902_v56  ;;  %v4389_v22 = vmul.f32 %v4383_v34, %v6977_v61 }
0x1815   : > { %v4394_v39 = vadd.f32 %v4390_v35, %v6952_v26  ;;  %v4395_v40 = vadd.f32 %v4391_v38, %v6952_v26  ;;  %v4392_v41 = vadd.f32 %v4388_v62, %v6952_v26  ;;  %v4393_v16 = vadd.f32 %v4389_v22, %v6952_v26 }
0x1817   : > { %v4402_v32 = vmul.f32 0.2, %v4394_v39  ;;  %v4403_v42 = vmul.f32 0.2, %v4395_v40  ;;  %v4400_v43 = vmul.f32 0.2, %v4392_v41 }
0x1818   : > { %v4401_v45 = vmul.f32 0.2, %v4393_v16  ;;  %vm4397_vm9 = vcmp.gt.f32.partialorder %v4393_v16, 0.0  ;;  %vm4399_vm10 = vcmp.gt.f32.partialorder %v4395_v40, 0.0  ;;  %vm4396_vm11 = vcmp.gt.f32.partialorder %v4392_v41, 0.0 }
0x1819   : > { %v4407_v21 = vsel %vm4399_vm10, %v4395_v40, %v4403_v42  ;;  %vm4398_vm13 = vcmp.gt.f32.partialorder %v4394_v39, 0.0  ;;  %v4404_v56 = vsel %vm4396_vm11, %v4392_v41, %v4400_v43  ;;  %vm2747_vm11 = vcmp.gt.f32.partialorder %v6705_v10, 0.0 }
0x181a   : > { %v4405_v48 = vsel %vm4397_vm9, %v4393_v16, %v4401_v45  ;;  %v4406_v49 = vsel %vm4398_vm13, %v4394_v39, %v4402_v32 }
0x181b   : > { %v4417_v59 = vpack.c.bf16 %v4407_v21, %v4405_v48  ;;  %v4416_v52 = vpack.c.bf16 %v4406_v49, %v4404_v56  ;;  %v5904_v21 = vld [vmem:[%s7314_s8] sm:$0xff]   ;;  %v5905_v56 = vld [vmem:[%s7314_s8 + $0x8] sm:$0xff]   ;;  %v4544_v48 = vrot.slane %v6913_v18, %v6482_v20  ;;  %v5906_v49 = vld [vmem:[%s7314_s8 + $0x10] sm:$0xff]  }
0x181c   : > { %5682 = vmatpush3.bf16.msra.mxu0 %v5904_v21 }
0x181d   : > { %4429 = vrot.lane.b32.xlu1 %v4417_v59, %s7293_s23  ;;  %4427 = vrot.lane.b32.xlu0 %v4416_v52, %s7293_s23  ;;  %v5907_v59 = vld [vmem:[%s7314_s8 + $0x18] sm:$0xff]   ;;  %s7320_s8 = sld [smem:[#allocation51_spill]] }
0x181e   : > { %5683 = vmatprep.subr.bf16.mxu0 %v6103_v7 }
0x1820   : > { %5684 = vmatpush3.bf16.msra.mxu0 %v5905_v56 }
0x1821   : > { %5685 = vmatprep.subr.bf16.mxu0 %v6103_v7 }
0x1824   : > { %5686 = vmatpush3.bf16.msra.mxu0 %v5906_v49 }
0x1825   : > { %5687 = vmatprep.subr.bf16.mxu0 %v6103_v7 }
0x1828   : > { %5688 = vmatpush3.bf16.msra.mxu0 %v5907_v59  ;;  %v4691_v59 = vrot.slane %v6915_v37, %v6482_v20 }
0x1829   : > { %5699 = vmatprep.subr.bf16.mxu0 %v6103_v7 }
0x188f   : > { %v4430_v15 = vpop.permute.xlu1 %4429  ;;  %v4428_v53 = vpop.permute.xlu0 %4427 }
0x1890   : > { %v4431_v36 = vsel %vm3476_vm12, %v4428_v53, %v4430_v15 }
0x1891   : > { %5678 = vmatmul.mubr.msk.bf16.vlgmr.msra.gmra.mrb[56].mxu1 %vm1970_vm7, %v4431_v36 }
0x1892   : > { %5695 = vmatprep.mubr.msk.bf16.mxu1 %vm6104_vm3, %v6103_v7 }
0x1964   : > { %v4493_v55 = vpop.f32.mrb[56].mxu1 }
0x1965   : > { %v4494_v60 = vadd.f32 %v5420_v47, %v4493_v55  ;;  %v5679_v44 = vpop.f32.mrb[57].mxu1 }
0x1966   : > { %v4496_v63 = vpop.f32.mrb[58].mxu1 }
0x1967   : > { %v4510_v0 = vmul.f32 %v4494_v60, %v4494_v60  ;;  %v4497_v1 = vadd.f32 %v5420_v47, %v4496_v63  ;;  %v5680_v2 = vpop.f32.mrb[59].mxu1  ;;  %v4500_v58 = vsel %vm1970_vm7, %v4494_v60, 0.0 }
0x1969   : > { %v4501_v14 = vsel %vm1970_vm7, %v4497_v1, 0.0  ;;  %v4511_v4 = vmul.f32 %v4497_v1, %v4497_v1  ;;  %v4512_v8 = vsel %vm1970_vm7, %v4510_v0, 0.0 }
0x196a   : > { %v4502_v5 = vadd.f32 %v4501_v14, %v4500_v58  ;;  %v5426_v14 = vld [vmem:[%s7315_s9] ss:$0 sm:$0xff]  ;;  %s7318_s9 = sld [smem:[#allocation49_spill]] }
0x196b   : > { %v4513_v57 = vsel %vm1970_vm7, %v4511_v4, 0.0 }
0x196c   : > { %v4503_v12 = vrot.slane %v4502_v5, 4  ;;  %v4514_v13 = vadd.f32 %v4513_v57, %v4512_v8 }
0x196e   : > { %v4504_v3 = vadd.f32 %v4503_v12, %v4502_v5  ;;  %v4515_v23 = vrot.slane %v4514_v13, 4 }
0x1970   : > { %v4505_v25 = vrot.slane %v4504_v3, 2  ;;  %v4516_v27 = vadd.f32 %v4515_v23, %v4514_v13 }
0x1972   : > { %v4506_v46 = vadd.f32 %v4505_v25, %v4504_v3  ;;  %v4517_v28 = vrot.slane %v4516_v27, 2 }
0x1974   : > { %v4507_v11 = vrot.slane %v4506_v46, 1  ;;  %v4518_v31 = vadd.f32 %v4517_v28, %v4516_v27 }
0x1976   : > { %v4508_v33 = vadd.f32 %v4507_v11, %v4506_v46  ;;  %v4519_v34 = vrot.slane %v4518_v31, 1 }
0x1978   : > { %v4509_v35 = vmul.f32 0.0625, %v4508_v33  ;;  %v4520_v38 = vadd.f32 %v4519_v34, %v4518_v31 }
0x197a   : > { %v4521_v62 = vmul.f32 0.0625, %v4520_v38  ;;  %v4522_v22 = vmul.f32 %v4509_v35, %v4509_v35  ;;  %v4526_v39 = vsub.f32 %v4497_v1, %v4509_v35  ;;  %v4525_v40 = vsub.f32 %v4494_v60, %v4509_v35 }
0x197c   : > { %v4523_v41 = vsub.f32 %v4521_v62, %v4522_v22 }
0x197e   : > { %v4524_v16 = vmax.f32 %v4523_v41, 0.0 }
0x1980   : > { %v4527_v32 = vadd.f32 1e-05, %v4524_v16 }
0x1982   : > { %5944 = vrsqrt.f32 %v4527_v32 }
0x198c   : > { %v5945_v42 = vpop.eup %5944 }
0x198d   : > { %v4530_v43 = vmul.f32 %v5945_v42, %v4526_v39  ;;  %v4529_v45 = vmul.f32 %v5945_v42, %v4525_v40 }
0x198f   : > { %4535 = vrot.lane.b32.xlu1 %v4530_v43, %s7298_s1  ;;  %4533 = vrot.lane.b32.xlu0 %v4529_v45, %s7298_s1 }
0x1993   : > { %4546 = vrot.lane.b32.xlu0 %v4544_v48, %s7293_s23 }
0x1a01   : > { %v4534_v52 = vpop.permute.xlu0 %4533  ;;  %v4536_v15 = vpop.permute.xlu1 %4535 }
0x1a02   : > { %v4540_v53 = vmul.f32 %v4536_v15, %v6977_v61  ;;  %v4539_v18 = vmul.f32 %v4534_v52, %v6977_v61  ;;  %v3738_v52 = vrot.slane %v6735_v30, %v6482_v20  ;;  %v3927_v15 = vadd.f32 1.0, %v6882_v24 }
0x1a05   : > { %v7013_v36 = vpop.permute.xlu0 %4546 }
0x1a06   : > { %v4548_v47 = vsel %vm3476_vm12, %v6952_v26, %v7013_v36 }
0x1a07   : > { %v4550_v55 = vadd.f32 %v4548_v47, %v4539_v18  ;;  %v4551_v60 = vadd.f32 %v4548_v47, %v4540_v53 }
0x1a09   : > { %vm4552_vm14 = vcmp.gt.f32.partialorder %v4550_v55, 0.0  ;;  %vm4553_vm0 = vcmp.gt.f32.partialorder %v4551_v60, 0.0  ;;  %v4554_v44 = vmul.f32 0.2, %v4550_v55  ;;  %v4555_v63 = vmul.f32 0.2, %v4551_v60 }
0x1a0b   : > { %v4556_v0 = vsel %vm4552_vm14, %v4550_v55, %v4554_v44  ;;  %v4557_v1 = vsel %vm4553_vm0, %v4551_v60, %v4555_v63  ;;  %v4675_v55 = vrot.slane %v3927_v15, %v6482_v20  ;;  %vm2748_vm14 = vcmp.gt.f32.partialorder %v6714_v29, 0.0 }
0x1a0c   : > { %v4566_v2 = vpack.c.bf16 %v4557_v1, %v4556_v0 }
0x1a0e   : > { %4575 = vrot.lane.b32.xlu1 %v4566_v2, %s7301_s3  ;;  %s7317_s3 = sld [smem:[#allocation48_spill]] }
0x1a80   : > { %v4576_v58 = vpop.permute.xlu1 %4575 }
0x1a81   : > { %5690 = vmatmul.mubr.msk.bf16.vlgmr.msra.gmra.mrb[52].mxu0 %vm1970_vm7, %v4576_v58 }
0x1a82   : > { %5701 = vmatprep.mubr.msk.bf16.mxu0 %vm6104_vm3, %v6103_v7 }
0x1b54   : > { %v4638_v4 = vpop.f32.mrb[52].mxu0 }
0x1b55   : > { %v4639_v26 = vadd.f32 %v5426_v14, %v4638_v4  ;;  %v5691_v5 = vpop.f32.mrb[53].mxu0 }
0x1b56   : > { %v4641_v8 = vpop.f32.mrb[54].mxu0 }
0x1b57   : > { %v4642_v57 = vadd.f32 %v5426_v14, %v4641_v8  ;;  %v5692_v12 = vpop.f32.mrb[55].mxu0  ;;  %v4653_v13 = vmul.f32 %v4639_v26, %v4639_v26 }
0x1b59   : > { %v4645_v3 = vadd.f32 %v4642_v57, %v4639_v26  ;;  %v4654_v23 = vmul.f32 %v4642_v57, %v4642_v57 }
0x1b5b   : > { %v4646_v25 = vrot.slane %v4645_v3, 4  ;;  %v4655_v27 = vadd.f32 %v4654_v23, %v4653_v13 }
0x1b5d   : > { %v4647_v46 = vadd.f32 %v4646_v25, %v4645_v3  ;;  %v4656_v28 = vrot.slane %v4655_v27, 4 }
0x1b5f   : > { %v4648_v11 = vrot.slane %v4647_v46, 2  ;;  %v4657_v31 = vadd.f32 %v4656_v28, %v4655_v27 }
0x1b61   : > { %v4649_v33 = vadd.f32 %v4648_v11, %v4647_v46  ;;  %v4658_v34 = vrot.slane %v4657_v31, 2 }
0x1b63   : > { %v4650_v35 = vrot.slane %v4649_v33, 1  ;;  %v4659_v38 = vadd.f32 %v4658_v34, %v4657_v31 }
0x1b65   : > { %v4651_v62 = vadd.f32 %v4650_v35, %v4649_v33  ;;  %v4660_v22 = vrot.slane %v4659_v38, 1 }
0x1b67   : > { %v4652_v39 = vmul.f32 0.0625, %v4651_v62  ;;  %v4661_v40 = vadd.f32 %v4660_v22, %v4659_v38 }
0x1b69   : > { %v4662_v41 = vmul.f32 0.0625, %v4661_v40  ;;  %v4663_v16 = vmul.f32 %v4652_v39, %v4652_v39  ;;  %v4667_v32 = vsub.f32 %v4642_v57, %v4652_v39  ;;  %v4666_v42 = vsub.f32 %v4639_v26, %v4652_v39 }
0x1b6b   : > { %v4664_v43 = vsub.f32 %v4662_v41, %v4663_v16  ;;  %v2755_v16 = vand.u32 127, %v1880_v17 }
0x1b6d   : > { %v4665_v45 = vmax.f32 %v4664_v43, 0.0  ;;  %vm2756_vm13 = vcmp.eq.s32.totalorder %v6479_v19, %v2755_v16 }
0x1b6f   : > { %v4668_v21 = vadd.f32 1e-05, %v4665_v45 }
0x1b71   : > { %5946 = vrsqrt.f32 %v4668_v21  ;;  %v2750_v21 = vsel %vm2748_vm14, %v6714_v29, 0.0 }
0x1b7b   : > { %v5947_v56 = vpop.eup %5946 }
0x1b7c   : > { %v4671_v48 = vmul.f32 %v5947_v56, %v4667_v32  ;;  %v4670_v49 = vmul.f32 %v5947_v56, %v4666_v42  ;;  %v2749_v32 = vsel %vm2747_vm11, %v6705_v10, 0.0  ;;  %v2753_v42 = vadd.s32 8, %v6479_v19 }
0x1b7d   : > { %v2758_v43 = vsel %vm2756_vm13, 0.0, %v2749_v32 }
0x1b7e   : > { %4680 = vrot.lane.b32.xlu1 %v4671_v48, %s7311_s12  ;;  %4678 = vrot.lane.b32.xlu0 %v4670_v49, %s7311_s12  ;;  %v2760_v45 = vsel %vm1802_vm2, %v2758_v43, 0.0  ;;  %vm2757_vm0 = vcmp.eq.s32.totalorder %v2753_v42, %v2755_v16 }
0x1b7f   : > { %v2759_v56 = vsel %vm2757_vm0, 0.0, %v2750_v21 }
0x1b80   : > { %v2763_v17 = vsel %vm1802_vm2, %v2759_v56, 0.0 }
0x1b82   : > { %3725 = vrot.lane.b32.xlu1 %v6896_v50, %s7311_s12  ;;  %4693 = vrot.lane.b32.xlu0 %v4691_v59, %s7293_s23  ;;  %v2972_v50 = vadd.f32 1.0, %v6670_v6 }
0x1b84   : > { %v3722_v58 = vrot.slane %v2972_v50, %v6482_v20 }
0x1b86   : > { %3740 = vrot.lane.b32.xlu1 %v3738_v52, %s7293_s23  ;;  %3727 = vrot.lane.b32.xlu0 %v6898_v51, %s7311_s12  ;;  %s7319_s12 = sld [smem:[#allocation50_spill]] }
0x1bf0   : > { %v4681_v53 = vpop.permute.xlu1 %4680  ;;  %v4679_v18 = vpop.permute.xlu0 %4678 }
0x1bf1   : > { %v4686_v47 = vmul.f32 %v4681_v53, %v6977_v61  ;;  %v4684_v37 = vmul.f32 %v4679_v18, %v6977_v61  ;;  %v4687_v44 = vmul.f32 %v4681_v53, %v4675_v55  ;;  %v4685_v1 = vmul.f32 %v4679_v18, %v4675_v55 }
0x1bf2   : > { %v2780_v55 = vsub.s32 %v2755_v16, %v6479_v19 }
0x1bf3   : > { %v4700_v60 = vadd.f32 %v4686_v47, %v7013_v36  ;;  %v4698_v30 = vadd.f32 %v4684_v37, %v7013_v36  ;;  %v2782_v37 = vadd.s32 4294967288, %v2755_v16 }
0x1bf4   : > { %v3726_v63 = vpop.permute.xlu1 %3725  ;;  %v4694_v0 = vpop.permute.xlu0 %4693 }
0x1bf5   : > { %v4708_v51 = vmul.f32 0.2, %v4700_v60  ;;  %v4706_v24 = vmul.f32 0.2, %v4698_v30  ;;  %v3731_v2 = vmul.f32 %v3726_v63, %v6796_v9  ;;  %v4695_v61 = vsel %vm3476_vm12, %v7013_v36, %v4694_v0 }
0x1bf6   : > { %vm4702_vm7 = vcmp.gt.f32.partialorder %v4698_v30, 0.0  ;;  %vm4704_vm1 = vcmp.gt.f32.partialorder %v4700_v60, 0.0  ;;  %v4699_v14 = vadd.f32 %v4695_v61, %v4685_v1  ;;  %v4701_v4 = vadd.f32 %v4695_v61, %v4687_v44 }
0x1bf7   : > { %v3745_v6 = vadd.f32 %v3731_v2, %v6832_v54  ;;  %v4710_v26 = vsel %vm4702_vm7, %v4698_v30, %v4706_v24  ;;  %v3732_v5 = vmul.f32 %v3726_v63, %v3722_v58  ;;  %v4712_v12 = vsel %vm4704_vm1, %v4700_v60, %v4708_v51 }
0x1bf8   : > { %v3741_v8 = vpop.permute.xlu1 %3740  ;;  %v3728_v57 = vpop.permute.xlu0 %3727  ;;  %v4707_v13 = vmul.f32 0.2, %v4699_v14  ;;  %v4709_v3 = vmul.f32 0.2, %v4701_v4  ;;  %v4716_v27 = vpack.c.bf16 %v4712_v12, %v4710_v26  ;;  %vm4703_vm15 = vcmp.gt.f32.partialorder %v4699_v14, 0.0 }
0x1bf9   : > { %v3742_v23 = vsel %vm3476_vm12, %v6832_v54, %v3741_v8  ;;  %v3733_v25 = vmul.f32 %v3728_v57, %v6796_v9  ;;  %v3734_v36 = vmul.f32 %v3728_v57, %v3722_v58  ;;  %v3753_v46 = vmul.f32 0.2, %v3745_v6 }
0x1bfa   : > { %v3746_v20 = vadd.f32 %v3742_v23, %v3732_v5  ;;  %vm4705_vm5 = vcmp.gt.f32.partialorder %v4701_v4, 0.0  ;;  %4728 = vrot.lane.b32.xlu0 %v4716_v27, %s7293_s23  ;;  %v4711_v33 = vsel %vm4703_vm15, %v4699_v14, %v4707_v13  ;;  %vm3749_vm8 = vcmp.gt.f32.partialorder %v3745_v6, 0.0 }
0x1bfb   : > { %v3747_v11 = vadd.f32 %v3733_v25, %v6832_v54  ;;  %v3748_v31 = vadd.f32 %v3742_v23, %v3734_v36  ;;  %v4713_v34 = vsel %vm4705_vm5, %v4701_v4, %v4709_v3  ;;  %v3757_v39 = vsel %vm3749_vm8, %v3745_v6, %v3753_v46 }
0x1bfc   : > { %v3754_v28 = vmul.f32 0.2, %v3746_v20  ;;  %vm3750_vm6 = vcmp.gt.f32.partialorder %v3746_v20, 0.0  ;;  %v4717_v62 = vpack.c.bf16 %v4713_v34, %v4711_v33  ;;  %v2785_v60 = vsub.s32 %v2782_v37, %v6479_v19 }
0x1bfd   : > { %v3755_v35 = vmul.f32 0.2, %v3747_v11  ;;  %v3756_v38 = vmul.f32 0.2, %v3748_v31  ;;  %vm3752_vm9 = vcmp.gt.f32.partialorder %v3748_v31, 0.0  ;;  %vm3751_vm10 = vcmp.gt.f32.partialorder %v3747_v11, 0.0 }
0x1bfe   : > { %v3758_v9 = vsel %vm3750_vm6, %v3746_v20, %v3754_v28  ;;  %4730 = vrot.lane.b32.xlu1 %v4717_v62, %s7293_s23  ;;  %vm2787_vm1 = vcmask 130112   ;;  %v5437_v62 = vld [vmem:[%s7318_s9] ss:$0 sm:$0xff]  ;;  %s7221_s9 = sshll.u32 %s6416_s0, 8 }
0x1bff   : > { %v3760_v22 = vsel %vm3752_vm9, %v3748_v31, %v3756_v38  ;;  %v3759_v40 = vsel %vm3751_vm10, %v3747_v11, %v3755_v35  ;;  %v5433_v35 = vld [vmem:[%s7317_s3] ss:$0 sm:$0xff]  ;;  %s5106_s3 = sshll.u32 %s6709_s5, 4  ;;  %s7097_s3 = int_to_ptr.vmem [resolvable:$true] %s5106_s3 }
0x1c00   : > { %v4715_v41 = vpack.c.bf16 %v3760_v22, %v3758_v9  ;;  %v4714_v54 = vpack.c.bf16 %v3759_v40, %v3757_v39  ;;  %v5438_v39 = vld [vmem:[%s7319_s12] ss:$0 sm:$0xff]  ;;  %s7103_s12 = scalar_lea.hbm %s6388_s4, %s7221_s9  ;;  %p5959_p0 = scmp.lt.s32.totalorder %s7097_s3, %s5957_s13 }
0x1c02   : > { %4720 = vrot.lane.b32.xlu0 %v4714_v54, %s7293_s23  ;;  %4722 = vrot.lane.b32.xlu1 %v4715_v41, %s7293_s23  ;;  %s7316_s23 = sld [smem:[#allocation47_spill]] }
0x1c08   : > { %v5908_v13 = vld [vmem:[%s7316_s23] sm:$0xff]   ;;  %v5909_v3 = vld [vmem:[%s7316_s23 + $0x8] sm:$0xff]  }
0x1c21   : > { %2761 = vadd.xlane.f32.xlu0 %v2760_v45 }
0x1c26   : > { %2764 = vadd.xlane.f32.xlu1 %v2763_v17 }
0x1c6c   : > { %v4729_v48 = vpop.permute.xlu0 %4728 }
0x1c70   : > { %v4731_v49 = vpop.permute.xlu1 %4730 }
0x1c71   : > { %v4732_v10 = vsel %vm3476_vm12, %v4729_v48, %v4731_v49  ;;  %v5910_v49 = vld [vmem:[%s7320_s8] sm:$0xff]  }
0x1c72   : > { %5694 = vmatpush3.bf16.xpose.msra.mxu1 %v4732_v10  ;;  %v5911_v10 = vld [vmem:[%s7320_s8 + $0x8] sm:$0xff]   ;;  %s5952_s8 = scalar_lea.vmem %s7097_s3, 256 }
0x1c73   : > { %5705 = vmatprep.subr.bf16.mxu1 %v6103_v7  ;;  %p5953_p11 = scmp.ne.s32.totalorder %s7097_s3, %s5952_s8  ;;  %p5960_p1 = scmp.lt.s32.totalorder %s5958_s14, %s5952_s8 }
0x1c74   : > { %v4723_v59 = vpop.permute.xlu1 %4722  ;;  %v4721_v52 = vpop.permute.xlu0 %4720 }
0x1c75   : > { %v4724_v15 = vsel %vm3476_vm12, %v4721_v52, %v4723_v59  ;;  %p5954_p12 = pnand %p5953_p11, %p6433_p5  ;;  %p5961_p2 = por %p5960_p1, %p5959_p0 }
0x1c77   : > { %p5955_p13 = pneg %p5954_p12 }
0x1c79   : > { %5696 = vmatmul.mubr.bf16.vlgmr.msra.gmra.mrb[60].mxu1 %v4724_v15  ;;  %p5962_p3 = pnand %p5961_p2, %p5955_p13 }
0x1c7a   : > { %5709 = vmatprep.mubr.msk.bf16.mxu1 %vm6104_vm3, %v6103_v7  ;;  %5706 = vmatpush3.bf16.msra.mxu1 %v5908_v13 }
0x1c7b   : > { %5707 = vmatprep.subr.bf16.mxu1 %v6103_v7 }
0x1c7e   : > { %5708 = vmatpush3.bf16.msra.mxu1 %v5909_v3 }
0x1c7f   : > { %5719 = vmatprep.subr.bf16.mxu1 %v6103_v7 }
0x1cae   : > { %v2762_v29 = vpop.xlane.xlu0 %2761 }
0x1caf   : > { %v2768_v53 = vmax.f32 %v2762_v29, 1e-12  ;;  %vm2766_vm7 = vcmp.gt.f32.partialorder %v2762_v29, 0.0 }
0x1cb1   : > { %5948 = vrsqrt.f32 %v2768_v53 }
0x1cb3   : > { %v2765_v18 = vpop.xlane.xlu1 %2764 }
0x1cb4   : > { %v2769_v47 = vmax.f32 %v2765_v18, 1e-12  ;;  %vm2767_vm12 = vcmp.gt.f32.partialorder %v2765_v18, 0.0 }
0x1cb6   : > { %5950 = vrsqrt.f32 %v2769_v47 }
0x1cbb   : > { %v5949_v50 = vpop.eup %5948 }
0x1cbc   : > { %v2772_v30 = vsel %vm2766_vm7, %v5949_v50, 0.0 }
0x1cbd   : > { %v2781_v0 = vrot.slane %v2772_v30, %v2780_v55  ;;  %v2774_v24 = vmul.f32 %v2772_v30, %v2758_v43 }
0x1cc0   : > { %v5951_v44 = vpop.eup %5950 }
0x1cc1   : > { %v2773_v63 = vsel %vm2767_vm12, %v5951_v44, 0.0 }
0x1cc2   : > { %v2775_v51 = vmul.f32 %v2773_v63, %v2759_v56  ;;  %v2786_v1 = vrot.slane %v2773_v63, %v2785_v60 }
0x1cc4   : > { %v2788_v2 = vsel %vm2787_vm1, %v2786_v1, %v2781_v0 }
0x1cc5   : > { %v2802_v58 = vmul.f32 %v2788_v2, %v2774_v24  ;;  %v2803_v61 = vmul.f32 %v2788_v2, %v2775_v51 }
0x1cc7   : > { %v2804_v6 = vsub.f32 0.0, %v2802_v58  ;;  %v2805_v14 = vsub.f32 0.0, %v2803_v61 }
0x1cc9   : > { %v4775_v4 = vpack.c.bf16 %v2805_v14, %v2804_v6 }
0x1ccb   : > { %4777 = vxpose.xlu0.c.b16.start.end [1/1] (short) (narrow) %v4775_v4, 16 }
0x1d31   : > { %v4785_v12 = vpop.trf.xlu0 }
0x1d4c   : > { %v4768_v26 = vpop.f32.mrb[60].mxu1 }
0x1d4d   : > { %v5697_v19 = vpop.f32.mrb[61].mxu1 }
0x1d4e   : > { %v4771_v5 = vpop.f32.mrb[62].mxu1 }
0x1d4f   : > { %v4776_v8 = vpack.c.bf16 %v4771_v5, %v4768_v26  ;;  %v5698_v57 = vpop.f32.mrb[63].mxu1 }
0x1d51   : > { %5700 = vmatpush3.bf16.msra.mxu0 %v4776_v8 }
0x1d52   : > { %5713 = vmatprep.subr.bf16.mxu0 %v6103_v7 }
0x1d54   : > { %5702 = vmatmul.mubr.msk.bf16.vlgmr.msra.gmra.mrb[56].mxu0 %vm1802_vm2, %v4785_v12 }
0x1d55   : > { %5715 = vmatprep.mubr.msk.bf16.mxu0 %vm6104_vm3, %v6103_v7 }
0x1e27   : > { %v4830_v23 = vpop.f32.mrb[56].mxu0 }
0x1e28   : > { %v5703_v20 = vpop.f32.mrb[57].mxu0 }
0x1e29   : > { %v4833_v25 = vpop.f32.mrb[58].mxu0 }
0x1e2a   : > { %v5836_v36 = vpack.i.bf16 %v4833_v25, %v4830_v23  ;;  %v5704_v27 = vpop.f32.mrb[59].mxu0 }
0x1e2c   : > { %5837 = vrot.lane.b32.xlu1 %v5836_v36, %s7298_s1 }
0x1e9e   : > { %v5838_v46 = vpop.permute.xlu1 %5837 }
0x1e9f   : > { %v5840_v28 = vunpack.i.h.bf16 %v5838_v46  ;;  %v5839_v11 = vunpack.i.l.bf16 %v5838_v46 }
0x1ea1   : > { %v4846_v31 = vsel %vm1802_vm2, %v4771_v5, %v5840_v28  ;;  %v4845_v33 = vsel %vm1802_vm2, %v4768_v26, %v5839_v11 }
0x1ea2   : > { %v4851_v34 = vpack.c.bf16 %v4846_v31, %v4845_v33 }
0x1ea4   : > { %5710 = vmatmul.mubr.msk.bf16.vlgmr.msra.gmra.mrb[64].mxu1 %vm1847_vm4, %v4851_v34 }
0x1ea5   : > { %5723 = vmatprep.mubr.msk.bf16.mxu1 %vm6104_vm3, %v6103_v7  ;;  %5720 = vmatpush3.bf16.msra.mxu1 %v5910_v49 }
0x1ea6   : > { %5721 = vmatprep.subr.bf16.mxu1 %v6103_v7 }
0x1ea9   : > { %5722 = vmatpush3.bf16.msra.mxu1 %v5911_v10 }
0x1f77   : > { %v4908_v38 = vpop.f32.mrb[64].mxu1 }
0x1f78   : > { %v4909_v9 = vadd.f32 %v5433_v35, %v4908_v38  ;;  %v5711_v22 = vpop.f32.mrb[65].mxu1 }
0x1f79   : > { %v4911_v40 = vpop.f32.mrb[66].mxu1 }
0x1f7a   : > { %v4922_v41 = vmul.f32 %v5437_v62, %v4909_v9  ;;  %v4912_v54 = vadd.f32 %v5433_v35, %v4911_v40  ;;  %v5712_v16 = vpop.f32.mrb[67].mxu1 }
0x1f7c   : > { %v4931_v32 = vadd.f32 %v5438_v39, %v4922_v41  ;;  %v4923_v42 = vmul.f32 %v5437_v62, %v4912_v54 }
0x1f7e   : > { %v4935_v43 = vmul.f32 0.2, %v4931_v32  ;;  %v4932_v45 = vadd.f32 %v5438_v39, %v4923_v42  ;;  %vm4933_vm15 = vcmp.gt.f32.partialorder %v4931_v32, 0.0 }
0x1f80   : > { %vm4934_vm5 = vcmp.gt.f32.partialorder %v4932_v45, 0.0  ;;  %v4936_v21 = vmul.f32 0.2, %v4932_v45  ;;  %v4937_v56 = vsel %vm4933_vm15, %v4931_v32, %v4935_v43 }
0x1f82   : > { %v4938_v17 = vsel %vm4934_vm5, %v4932_v45, %v4936_v21 }
0x1f83   : > { %v4939_v48 = vpack.c.bf16 %v4938_v17, %v4937_v56 }
0x1f85   : > { %5714 = vmatpush3.bf16.msra.mxu0 %v4939_v48 }
0x1f88   : > { %5716 = vmatmul.mubr.msk.bf16.vlgmr.msra.gmra.mrb[60].mxu0 %vm1802_vm2, %v4785_v12 }
0x205b   : > { %v4974_v59 = vpop.f32.mrb[60].mxu0 }
0x205c   : > { %v5717_v52 = vpop.f32.mrb[61].mxu0 }
0x205d   : > { %v4977_v15 = vpop.f32.mrb[62].mxu0 }
0x205e   : > { %v5841_v29 = vpack.i.bf16 %v4977_v15, %v4974_v59  ;;  %v5718_v53 = vpop.f32.mrb[63].mxu0 }
0x2060   : > { %5842 = vrot.lane.b32.xlu1 %v5841_v29, %s7298_s1  ;;  %s5088_s1 = scalar_lea.sflag [#allocation3], %s6702_s6 }
0x20d2   : > { %v5843_v18 = vpop.permute.xlu1 %5842 }
0x20d3   : > { %v5845_v47 = vunpack.i.h.bf16 %v5843_v18  ;;  %v5844_v37 = vunpack.i.l.bf16 %v5843_v18 }
0x20d5   : > { %v4990_v7 = vsel %vm1802_vm2, %v4938_v17, %v5845_v47  ;;  %v4989_v50 = vsel %vm1802_vm2, %v4937_v56, %v5844_v37 }
0x20d6   : > { %v4995_v55 = vpack.c.bf16 %v4990_v7, %v4989_v50 }
0x20d8   : > { %5724 = vmatmul.mubr.msk.bf16.vlgmr.msra.gmra.mrb[68].mxu1 %vm1847_vm4, %v4995_v55 }
0x20d9   : > { %5965 = shalt.err (!%p5962_p3)
}
0x20da   : > { %s5966_s5 = scalar_lea.hbm %s7103_s12, 256  ;;  %s5970_s11 = scalar_lea.hbm %s6388_s4, 512 }
0x20db   : > { %p5967_p4 = scmp.ne.s32.totalorder %s7103_s12, %s5966_s5  ;;  %p5971_p9 = scmp.lt.u32.totalorder %s7103_s12, %s6388_s4 }
0x20dc   : > { %p5972_p10 = scmp.lt.u32.totalorder %s5970_s11, %s5966_s5  ;;  %p5974_p12 = scmp.lt.u32.totalorder %s5966_s5, %s7103_s12 }
0x20dd   : > { %p5968_p7 = pnand %p5967_p4, %p6433_p5 }
0x20de   : > { %p5973_p11 = por %p5972_p10, %p5971_p9 }
0x20df   : > { %p5969_p8 = pneg %p5968_p7 }
0x20e0   : > { %p5975_p0 = por %p5974_p12, %p5973_p11 }
0x20e2   : > { %p5976_p13 = pnand %p5975_p0, %p5969_p8 }
0x20e4   : > { %5979 = shalt.err (!%p5976_p13)
}
0x20e5   : > { %s7222_s14 = smov 128   ;;  %s7321_s13 = sld [smem:[#allocation52_spill]]  ;;  %v5444_v44 = vld [vmem:[%s6378_s17] ss:$0 sm:$0xff] }
0x20e6   : > { %s7223_s8 = smov 8   ;;  %v5445_v51 = vld [vmem:[%s6383_s27] ss:$0 sm:$0xff]  ;;  %s7322_s5 = sshll.u32 %s6702_s6, 4 }
0x20e7   : > { %5727 = dma.vmem_to_hbm [thread:$0]  (%p6433_p5), %s7097_s3, 256, %s7103_s12, %s5088_s1, %s7222_s14, %s7222_s14, %s7223_s8  }
0x20e8   : > { %s1650_s11 = scalar_lea.vmem [#allocation4], %s7322_s5  ;;  %s7323_s3 = sshll.u32 %s6416_s0, 8 }
0x20e9   : > { %s5122_s9 = sshll.u32 %s1650_s11, 4  ;;  %s7138_s12 = scalar_lea.hbm %s6393_s20, %s7323_s3  ;;  %s7133_s9 = int_to_ptr.vmem [resolvable:$true] %s5122_s9 }
0x20ea   : > { %s5093_s1 = scalar_lea.sflag [#allocation5], %s6702_s6  ;;  %s6114_s5 = smov [#allocation4]  }
0x20eb   : > { %v5440_v60 = vld [vmem:[%s7321_s13] ss:$0 sm:$0xff]  ;;  %s5980_s13 = scalar_lea.vmem %s7133_s9, 256  ;;  %s5984_s14 = sshll.u32 %s6114_s5, 4  ;;  %s5985_s14 = int_to_ptr.vmem [resolvable:$false] %s5984_s14 }
0x20ec   : > { %p5981_p1 = scmp.ne.s32.totalorder %s7133_s9, %s5980_s13  ;;  %s5986_s8 = scalar_lea.vmem %s5985_s14, 512 }
0x20ed   : > { %p5987_p4 = scmp.lt.s32.totalorder %s7133_s9, %s5985_s14  ;;  %p5988_p7 = scmp.lt.s32.totalorder %s5986_s8, %s5980_s13 }
0x20ee   : > { %p5982_p2 = pnand %p5981_p1, %p6433_p5 }
0x20ef   : > { %p5989_p8 = por %p5988_p7, %p5987_p4 }
0x20f0   : > { %p5983_p3 = pneg %p5982_p2 }
0x20f2   : > { %p5990_p9 = pnand %p5989_p8, %p5983_p3 }
0x21ab   : > { %v5052_v30 = vpop.f32.mrb[68].mxu1 }
0x21ac   : > { %v5053_v63 = vadd.f32 %v5440_v60, %v5052_v30  ;;  %v5725_v0 = vpop.f32.mrb[69].mxu1 }
0x21ad   : > { %v5055_v1 = vpop.f32.mrb[70].mxu1 }
0x21ae   : > { %v5066_v24 = vmul.f32 %v5444_v44, %v5053_v63  ;;  %v5056_v2 = vadd.f32 %v5440_v60, %v5055_v1  ;;  %v5726_v58 = vpop.f32.mrb[71].mxu1 }
0x21b0   : > { %v5075_v61 = vadd.f32 %v5445_v51, %v5066_v24  ;;  %v5067_v6 = vmul.f32 %v5444_v44, %v5056_v2 }
0x21b2   : > { %vm5077_vm2 = vcmp.gt.f32.partialorder %v5075_v61, 0.0  ;;  %v5079_v14 = vmul.f32 0.2, %v5075_v61  ;;  %v5076_v4 = vadd.f32 %v5445_v51, %v5067_v6 }
0x21b4   : > { %v5081_v26 = vsel %vm5077_vm2, %v5075_v61, %v5079_v14  ;;  %vm5078_vm3 = vcmp.gt.f32.partialorder %v5076_v4, 0.0  ;;  %v5080_v19 = vmul.f32 0.2, %v5076_v4 }
0x21b5   : > { %5085 = vst [vmem:[%s1650_s11] sm:$0xff] %v5081_v26 }
0x21b6   : > { %v5082_v5 = vsel %vm5078_vm3, %v5076_v4, %v5080_v19 }
0x21b7   : > { %5086 = vst [vmem:[%s1650_s11 + $0x8] sm:$0xff] %v5082_v5 }
0x21b8   : > { %5993 = shalt.err (!%p5990_p9)
}
0x21b9   : > { %s5994_s0 = scalar_lea.hbm %s7138_s12, 256  ;;  %s5998_s11 = scalar_lea.hbm %s6393_s20, 512 }
0x21ba   : > { %p5995_p10 = scmp.ne.s32.totalorder %s7138_s12, %s5994_s0  ;;  %p5999_p0 = scmp.lt.u32.totalorder %s7138_s12, %s6393_s20 }
0x21bb   : > { %p6000_p13 = scmp.lt.u32.totalorder %s5998_s11, %s5994_s0  ;;  %p6002_p2 = scmp.lt.u32.totalorder %s5994_s0, %s7138_s12 }
0x21bc   : > { %p5996_p11 = pnand %p5995_p10, %p6433_p5 }
0x21bd   : > { %p6001_p1 = por %p6000_p13, %p5999_p0 }
0x21be   : > { %p5997_p12 = pneg %p5996_p11 }
0x21bf   : > { %p6003_p4 = por %p6002_p2, %p6001_p1 }
0x21c1   : > { %p6004_p3 = pnand %p6003_p4, %p5997_p12 }
0x21c3   : > { %6007 = shalt.err (!%p6004_p3)
}
0x21c4   : > { %s7324_s14 = smov 8   ;;  %s7325_s8 = smov 128  }
0x21c5   : > { %5728 = dma.vmem_to_hbm [thread:$0]  (%p6433_p5), %s7133_s9, 256, %s7138_s12, %s5093_s1, %s7325_s8, %s7325_s8, %s7324_s14  }
0x21c6 PF: > { %p5738_p7 = scmp.ge.s32.totalorder %s6046_s22, 2  ;;  %s5137_s3 = sand.u32 1, %s6034_s15  }
0x21c7   : > { %s5138_s13 = scalar_lea.sflag [#allocation3], %s5137_s3 }
0x21c8   : > { %p5732_p8 = pnand %p5738_p7, %p6437_p6 }
0x21ca   : > { %6025 = dma.done.wait (!%p5732_p8), %s5138_s13, 256  }
0x21cb   : > { %6027 = vsyncadd (!%p5732_p8), %s5138_s13, 4294967040  ;;  %s5147_s7 = scalar_lea.sflag [#allocation5], %s5137_s3 }
0x21cc   : > { %6029 = dma.done.wait (!%p5732_p8), %s5147_s7, 256  }
0x21cd   : > { %6031 = vsyncadd (!%p5732_p8), %s5147_s7, 4294967040  ;;  %p123_p5 = scmp.ge.s32.totalorder %s6420_s26, 4   ;;  %s7326_s15 = smov %s6038_s16 }
0x21ce   : > { %s7327_s16 = smov %s6042_s18  ;;  %s7328_s18 = smov %s6431_s2 }
0x21cf   : > { %s7329_s22 = smov %s6420_s26  ;;  %125 = sbr.rel (!%p123_p5) target bundleno = 122 (0x7a), region = 350 }
0x21d6   :  { %5152 = vsyncpa [#allocation3], 1 }
0x21d7   :  { %5154 = vsyncpa [#allocation3 + $0x1], 1 }
0x21d8   :  { %5155 = vsyncpa [#allocation5], 1 }
0x21d9   :  { %5157 = vsyncpa [#allocation5 + $0x1], 1 }

</bundles_post_ra>
